<compile_context>
chip_gen: v7x
topology: tpu7x:2x2x1
jax: 0.10.0
libtpu: 0.0.40
codegen_flags: <defaults>
</compile_context>

<pallas_src>
import math

import jax
import jax.numpy as jnp
from jax.experimental import pallas as pl
from jax.experimental.pallas import tpu as pltpu

# ----------------------------- synthetic config ------------------------------
B = 2             # batch
L = 16            # seq_len
P = 8             # pred_len
C_IN = 4          # enc_in == c_out
D = 32            # d_model
H = 4             # n_heads
DH = D // H       # d_head
D_FF = 32         # d_ff
K_TOP = 2         # top_k frequencies
N_LAYERS = 2      # e_layers == d_layers
EPS = 1e-5        # LayerNorm eps
F_NUM = L // 2 - 1        # candidate rfft frequencies (even L: indices 1 .. L/2-1)
FP = 8                    # frequencies padded to a full sublane group


# --------------------------- static blob layouts ------------------------------
def _pad8(n):
    return -(-n // 8) * 8


def _make_layout(entries):
    layout, off = {}, 0
    for name, rows in entries:
        layout[name] = (off, rows)
        off += _pad8(rows)          # 8-row alignment -> aligned sublane loads
    return layout, off


_D_ENTRIES = (
    [("w3k0", C_IN), ("w3k1", C_IN), ("w3k2", C_IN), ("wtemp", 1), ("pe", L)]
    + [e for l in range(N_LAYERS) for e in [
        (f"Wg{l}", H * D), (f"gconst{l}", L),
        (f"ln1w{l}", 1), (f"ln1b{l}", 1), (f"ln2w{l}", 1), (f"ln2b{l}", 1),
        (f"w1{l}", D), (f"w2{l}", D_FF),
        (f"Klev{l}", C_IN * L), (f"dfexp{l}", P)]]
)
_L_ENTRIES = (
    [("sprev", L), ("snext", L), ("dft", 2 * FP), ("ext", L + P)]
    + [(f"Kd1{l}", H * L) for l in range(N_LAYERS)]
)
_C_ENTRIES = (
    [("wp", D), ("bp", 1), ("eyeC", C_IN)]
    + [e for l in range(N_LAYERS) for e in [
        (f"wsp{l}", D), (f"wgp{l}", D), (f"lconst{l}", L)]]
)

LAY_D, ROWS_D = _make_layout(_D_ENTRIES)   # blob with last dim D  (=32)
LAY_L, ROWS_L = _make_layout(_L_ENTRIES)   # blob with last dim L  (=16)
LAY_C, ROWS_C = _make_layout(_C_ENTRIES)   # blob with last dim C  (=4)


# ------------------------------ kernel helpers --------------------------------
def _layernorm(x, w, b):
    mu = jnp.mean(x, axis=-1, keepdims=True)
    xc = x - mu
    var = jnp.mean(xc * xc, axis=-1, keepdims=True)
    return xc * jax.lax.rsqrt(var + EPS) * w + b


def _topk_mask(mag2):
    """mag2: (FP, D) squared amplitudes (rows >= F_NUM are padding).  Returns a
    {0,1} mask selecting, per column, the K_TOP largest rows (ties -> lower idx)."""
    ridx = jax.lax.broadcasted_iota(jnp.int32, mag2.shape, 0)
    ridx_f = ridx.astype(jnp.float32)
    neg = jnp.float32(-1e30)
    work = jnp.where(ridx < F_NUM, mag2, neg)          # never pick padded rows
    mask = jnp.zeros_like(mag2)
    for _ in range(K_TOP):
        mx = jnp.max(work, axis=0, keepdims=True)
        cand = jnp.where(work >= mx, ridx_f, jnp.float32(FP))
        sel = ridx_f == jnp.min(cand, axis=0, keepdims=True)   # one-hot per column
        mask = mask + sel.astype(jnp.float32)
        work = jnp.where(sel, neg, work)
    return mask


# ------------------------------ fused kernel ----------------------------------
def etsformer_kernel(x_ref, xm_ref, bd_ref, bl_ref, bc_ref, out_ref):
    f32 = jnp.float32
    nb = x_ref.shape[0]                     # batches handled by this grid step

    def gD(name, r0=0, r1=None):
        off, rows = LAY_D[name]
        return bd_ref[off + r0: off + (rows if r1 is None else r1), :]

    def gL(name, r0=0, r1=None):
        off, rows = LAY_L[name]
        return bl_ref[off + r0: off + (rows if r1 is None else r1), :]

    def gC(name, r0=0, r1=None):
        off, rows = LAY_C[name]
        return bc_ref[off + r0: off + (rows if r1 is None else r1), :]

    sprev, snext = gL("sprev"), gL("snext")
    dft_mat, ext_mat = gL("dft"), gL("ext")
    w3k0, w3k1, w3k2 = gD("w3k0"), gD("w3k1"), gD("w3k2")
    wtemp, pe = gD("wtemp"), gD("pe")
    wp, bp, eyeC = gC("wp"), gC("bp"), gC("eyeC")

    for b in range(nb):                      # independent chains -> ILP when nb > 1
        x = x_ref[b]                         # (L, C_IN)
        xm = xm_ref[b]                       # (L, 1)

        # ---- DataEmbedding: circular Conv1d(k=3); shifts as tiny MXU matmuls ----
        x_prev = jnp.dot(sprev, x, preferred_element_type=f32)    # x[t-1 mod L]
        x_next = jnp.dot(snext, x, preferred_element_type=f32)    # x[t+1 mod L]
        tok = (jnp.dot(x_prev, w3k0, preferred_element_type=f32)
               + jnp.dot(x, w3k1, preferred_element_type=f32)
               + jnp.dot(x_next, w3k2, preferred_element_type=f32))
        res = tok + xm * wtemp + pe                                # (L, D)

        level = x                                                  # (L, C_IN)
        growth_repr = None
        season_repr = None

        for l in range(N_LAYERS):
            # ---- FourierLayer: rfft (1 matmul) + in-kernel top-k + extrapolation
            dft = jnp.dot(dft_mat, res, preferred_element_type=f32)   # (2FP, D)
            xr, xi = dft[:FP], dft[FP:]
            mask = _topk_mask(xr * xr + xi * xi)        # squared mag: same top-k
            masked = dft * jnp.concatenate([mask, mask], axis=0)
            season = jnp.dot(ext_mat, masked,
                             preferred_element_type=f32) * (2.0 / L)   # (L+P, D)
            season_L = season[:L]
            res2 = res - season_L

            # ---- GrowthLayer: growth[1:] = gconst + sum_h Kd1_h @ (res2 @ Wg_h)
            # (first difference, z0, biases, ES init all folded at init time)
            ges = gD(f"gconst{l}")                                   # (L, D)
            for h in range(H):
                t1 = jnp.dot(res2, gD(f"Wg{l}", h * D, (h + 1) * D),
                             preferred_element_type=f32)
                ges = ges + jnp.dot(gL(f"Kd1{l}", h * L, (h + 1) * L), t1,
                                    preferred_element_type=f32)

            # ---- residual update: res = norm2(z + FF(z)), z = norm1(res2 - growth[1:])
            z = _layernorm(res2 - ges, gD(f"ln1w{l}"), gD(f"ln1b{l}"))
            ff = jnp.dot(jax.nn.sigmoid(jnp.dot(z, gD(f"w1{l}"),
                                                preferred_element_type=f32)),
                         gD(f"w2{l}"), preferred_element_type=f32)
            new_res = _layernorm(z + ff, gD(f"ln2w{l}"), gD(f"ln2b{l}"))

            # ---- LevelLayer: per-channel ES; biases / growth[0] folded into lconst
            ssp = jnp.dot(season_L, gC(f"wsp{l}"), preferred_element_type=f32)
            gesp = jnp.dot(ges, gC(f"wgp{l}"), preferred_element_type=f32)
            uv = jnp.concatenate([level - ssp, gesp], axis=0)        # (2L, C)
            new_level = gC(f"lconst{l}")                             # (L, C)
            for c in range(C_IN):
                pc = jnp.dot(gD(f"Klev{l}", c * L, (c + 1) * L), uv,
                             preferred_element_type=f32)             # (L, C)
                new_level = new_level + pc * eyeC[c:c + 1, :]        # keep column c
            level = new_level

            res = new_res

            # ---- decoder horizon terms (damped last growth row + seasonal tail)
            g_term = ges[L - 1:L] * gD(f"dfexp{l}")                  # (P, D)
            s_term = season[L:]                                      # (P, D)
            growth_repr = g_term if growth_repr is None else growth_repr + g_term
            season_repr = s_term if season_repr is None else season_repr + s_term

        # ---- Decoder prediction head ----
        g_out = jnp.dot(growth_repr, wp, preferred_element_type=f32) + bp
        s_out = jnp.dot(season_repr, wp, preferred_element_type=f32) + bp
        out_ref[b] = level[L - 1:L, :] + g_out + s_out               # (P, C_IN)


# ------------------------------- call wrapper ----------------------------------
def _is_multicore_tpu():
    """v7x (2 TCs/chip) and megacore chips benefit from grid=(B,) batch splitting;
    single-TC v5e/v6e run the grid serially, so there the batch is folded into one
    grid step instead."""
    try:
        kind = jax.devices()[0].device_kind.lower()
    except Exception:
        return True
    return any(tag in kind for tag in ("v7", "v4", "v5p"))


def make_forward(multicore):
    if multicore:
        grid, nb, sem = (B,), 1, ("parallel",)
        dmap = lambda b: (b, 0, 0)
    else:
        grid, nb, sem = (1,), B, ("arbitrary",)
        dmap = lambda b: (0, 0, 0)
    wmap = lambda b: (0, 0)
    in_specs = [
        pl.BlockSpec((nb, L, C_IN), dmap),
        pl.BlockSpec((nb, L, 1), dmap),
        pl.BlockSpec((ROWS_D, D), wmap),
        pl.BlockSpec((ROWS_L, L), wmap),
        pl.BlockSpec((ROWS_C, C_IN), wmap),
    ]
    call = pl.pallas_call(
        etsformer_kernel,
        grid=grid,
        in_specs=in_specs,
        out_specs=pl.BlockSpec((nb, P, C_IN), dmap),
        out_shape=jax.ShapeDtypeStruct((B, P, C_IN), jnp.float32),
        compiler_params=pltpu.CompilerParams(dimension_semantics=sem),
    )

    def forward(blobs, x, x_mark):
        return call(x, x_mark, blobs["D"], blobs["L"], blobs["C"])

    return forward


# ------------------------------ parameter setup --------------------------------
def _pack(arrs, layout, total_rows, width):
    blob = jnp.zeros((total_rows, width), jnp.float32)
    for name, (off, rows) in layout.items():
        a = jnp.asarray(arrs[name], jnp.float32)
        assert a.shape == (rows, width), (name, a.shape, (rows, width))
        blob = blob.at[off:off + rows, :].set(a)
    return blob


def init_params(key):
    keys = jax.random.split(key, 64)
    it = iter(keys)

    def nrm(shape, scale=0.1):
        return (scale * jax.random.normal(next(it), shape)).astype(jnp.float32)

    packD, packL, packC = {}, {}, {}

    # --- DataEmbedding ---
    wtok = nrm((D, C_IN, 3))                       # Conv1d weight (out, in, k)
    w3k = jnp.transpose(wtok, (2, 1, 0))           # (3, C_IN, D): per-tap x @ Wk^T
    packD["w3k0"], packD["w3k1"], packD["w3k2"] = w3k[0], w3k[1], w3k[2]
    packD["wtemp"] = nrm((D, 1)).T                 # Linear(1, D, bias=False).weight.T
    pos = jnp.arange(L, dtype=jnp.float32)[:, None]
    div = jnp.exp(jnp.arange(0, D, 2, dtype=jnp.float32) * (-math.log(10000.0) / D))
    pe = jnp.zeros((L, D), jnp.float32)
    pe = pe.at[:, 0::2].set(jnp.sin(pos * div))
    pe = pe.at[:, 1::2].set(jnp.cos(pos * div))
    packD["pe"] = pe

    # circular-shift operators for the kernel-size-3 conv (replace sublane concats)
    eyeL = jnp.eye(L, dtype=jnp.float32)
    packL["sprev"] = jnp.roll(eyeL, 1, axis=0)     # row t selects x[t-1 mod L]
    packL["snext"] = jnp.roll(eyeL, -1, axis=0)    # row t selects x[t+1 mod L]

    # --- DFT / extrapolation operators (FourierLayer, even L, low_freq=1) ---
    fidx = jnp.arange(1, F_NUM + 1, dtype=jnp.float32)
    tt = jnp.arange(L, dtype=jnp.float32)
    ang = 2.0 * math.pi * fidx[:, None] * tt[None, :] / L
    zrow = jnp.zeros((FP - F_NUM, L), jnp.float32)
    packL["dft"] = jnp.concatenate([jnp.cos(ang), zrow, -jnp.sin(ang), zrow], axis=0)
    te = jnp.arange(L + P, dtype=jnp.float32)
    ange = 2.0 * math.pi * (fidx[None, :] / L) * te[:, None]
    zcol = jnp.zeros((L + P, FP - F_NUM), jnp.float32)
    packL["ext"] = jnp.concatenate([jnp.cos(ange), zcol, -jnp.sin(ange), zcol], axis=1)

    # shared triangular helpers for the exponential-smoothing operators
    ti = jnp.arange(L)
    diff = ti[:, None] - ti[None, :]
    tri = (diff >= 0).astype(jnp.float32)
    dclip = jnp.maximum(diff, 0).astype(jnp.float32)
    tpow = jnp.arange(L, dtype=jnp.float32) + 1.0
    d1op = eyeL - jnp.eye(L, k=-1, dtype=jnp.float32)    # first difference (I - S)

    for l in range(N_LAYERS):
        # ---------- GrowthLayer ----------
        z0 = nrm((H, DH))
        win_t = nrm((D, D)).T                    # in_proj.weight.T
        bin_ = nrm((D,))
        wout_t = nrm((D, D)).T                   # out_proj.weight.T
        bout = nrm((D,))
        alpha = jax.nn.sigmoid(nrm((H,), scale=1.0))
        v0 = nrm((H, DH))

        # fold diff / z0 / biases / ES-init / out_proj:  growth[1:] = gconst +
        # sum_h Kd1_h @ (res2 @ Wg_h)
        Wg_rows, Kd1_rows = [], []
        gconst = jnp.broadcast_to(bout[None, :], (L, D))
        for h in range(H):
            kes_h = (1.0 - alpha[h]) * (alpha[h] ** dclip) * tri        # (L, L)
            kd1_h = kes_h @ d1op
            initg_h = (alpha[h] ** tpow)[:, None] * v0[h][None, :]      # (L, DH)
            c_h = initg_h - kes_h[:, 0:1] * z0[h][None, :]              # (L, DH)
            win_h = win_t[:, h * DH:(h + 1) * DH]                       # (D, DH)
            wout_h = wout_t[h * DH:(h + 1) * DH, :]                     # (DH, D)
            bin_h = bin_[h * DH:(h + 1) * DH]
            Wg_rows.append(win_h @ wout_h)                              # (D, D)
            Kd1_rows.append(kd1_h)
            gconst = gconst + (kd1_h.sum(axis=1, keepdims=True)
                               * (bin_h[None, :] @ wout_h)
                               + c_h @ wout_h)
        packD[f"Wg{l}"] = jnp.concatenate(Wg_rows, axis=0)              # (H*D, D)
        packL[f"Kd1{l}"] = jnp.concatenate(Kd1_rows, axis=0)            # (H*L, L)
        packD[f"gconst{l}"] = gconst
        g0 = v0.reshape(1, D) @ wout_t + bout[None, :]                  # growth[0] row

        # ---------- Feedforward + LayerNorms (eval mode; dropout = identity) -----
        packD[f"w1{l}"] = nrm((D_FF, D)).T
        packD[f"w2{l}"] = nrm((D, D_FF)).T
        packD[f"ln1w{l}"] = jnp.ones((1, D), jnp.float32)
        packD[f"ln1b{l}"] = jnp.zeros((1, D), jnp.float32)
        packD[f"ln2w{l}"] = jnp.ones((1, D), jnp.float32)
        packD[f"ln2b{l}"] = jnp.zeros((1, D), jnp.float32)

        # ---------- LevelLayer ----------
        wgp_w = nrm((C_IN, D))                   # growth_pred.weight
        bgp = nrm((C_IN,))
        wsp_w = nrm((C_IN, D))                   # season_pred.weight
        bsp = nrm((C_IN,))
        al = jax.nn.sigmoid(nrm((C_IN,), scale=1.0))
        v0l = nrm((C_IN,))

        packC[f"wgp{l}"] = wgp_w.T               # biases folded into lconst
        packC[f"wsp{l}"] = wsp_w.T
        g0p = g0 @ wgp_w.T + bgp[None, :]        # projected growth[0] row (1, C)
        lconst = (al[None, :] ** tpow[:, None]) * v0l[None, :]          # init*v0
        Klev_rows = []
        for c in range(C_IN):
            kmain_c = (1.0 - al[c]) * (al[c] ** dclip) * tri            # (L, L)
            kaux_c = (al[c] ** (dclip + 1.0)) * tri
            kauxs_c = jnp.concatenate(
                [kaux_c[:, 1:], jnp.zeros((L, 1), jnp.float32)], axis=1)
            Klev_rows.append(jnp.concatenate([kmain_c, kauxs_c], axis=1))  # (L, 2L)
            lconst = lconst.at[:, c].add(
                kaux_c[:, 0] * g0p[0, c]
                + kaux_c[:, 1:].sum(axis=1) * bgp[c]
                - kmain_c.sum(axis=1) * bsp[c])
        packD[f"Klev{l}"] = jnp.concatenate(Klev_rows, axis=0)          # (C*L, 2L)
        packC[f"lconst{l}"] = lconst

        # ---------- DecoderLayer damping ----------
        phi = jax.nn.sigmoid(nrm((H,), scale=1.0))
        powers = jnp.arange(1, P + 1, dtype=jnp.float32)[:, None]
        df = jnp.cumsum(phi[None, :] ** powers, axis=0)                 # (P, H)
        packD[f"dfexp{l}"] = jnp.repeat(df, DH, axis=1)                 # (P, D)

    # --- decoder prediction head (shared for growth and season) ---
    wp_w = nrm((C_IN, D))
    packC["wp"] = wp_w.T
    packC["bp"] = nrm((C_IN,)).reshape(1, C_IN)
    packC["eyeC"] = jnp.eye(C_IN, dtype=jnp.float32)

    return {
        "D": _pack(packD, LAY_D, ROWS_D, D),
        "L": _pack(packL, LAY_L, ROWS_L, L),
        "C": _pack(packC, LAY_C, ROWS_C, C_IN),
    }


# ----------------------------------- main ---------------------------------------
if __name__ == "__main__":
    key = jax.random.PRNGKey(0)
    kx, kp = jax.random.split(key)
    x = jax.random.normal(kx, (B, L, C_IN), dtype=jnp.float32)
    # default x_mark from Model.forward: arange(L)/L as (B, L, 1), then ==1 -> 0.9999
    x_mark = jnp.broadcast_to(
        (jnp.arange(L, dtype=jnp.float32) / L)[None, :, None], (B, L, 1))
    x_mark = jnp.where(x_mark == 1.0, 0.9999, x_mark)

    blobs = init_params(kp)
    fwd = jax.jit(make_forward(_is_multicore_tpu()))
    preds = jax.block_until_ready(fwd(blobs, x, x_mark))

    assert preds.shape == (B, P, C_IN), preds.shape
    assert bool(jnp.all(jnp.isfinite(preds)))
    # TODO(synk): classification / imputation / anomaly branches and training-mode
    # Transform / dropout are not exercised (long_term_forecast eval path only).
    print("KERNEL_OK")
</pallas_src>

<mosaic_0001>
module attributes {stable_mosaic.version = 11 : i64} {
  func.func @etsformer_kernel(%arg0: i32, %arg1: memref<2x16x4xf32, #tpu.memory_space<vmem>>, %arg2: memref<2x16x1xf32, #tpu.memory_space<vmem>>, %arg3: memref<672x32xf32, #tpu.memory_space<vmem>>, %arg4: memref<200x16xf32, #tpu.memory_space<vmem>>, %arg5: memref<208x4xf32, #tpu.memory_space<vmem>>, %arg6: memref<2x8x4xf32, #tpu.memory_space<vmem>>) attributes {dimension_semantics = [#tpu.dimension_semantics<arbitrary>], iteration_bounds = array<i64: 1>, scalar_prefetch = 0 : i64, scratch_operands = 0 : i64, tpu.core_type = #tpu.core_type<tc>, window_params = [{pipeline_mode = #tpu.pipeline_mode<synchronous>, transform_indices = @transform_0, window_bounds = array<i64: 2, 16, 4>}, {pipeline_mode = #tpu.pipeline_mode<synchronous>, transform_indices = @transform_1, window_bounds = array<i64: 2, 16, 1>}, {pipeline_mode = #tpu.pipeline_mode<synchronous>, transform_indices = @transform_2, window_bounds = array<i64: 672, 32>}, {pipeline_mode = #tpu.pipeline_mode<synchronous>, transform_indices = @transform_3, window_bounds = array<i64: 200, 16>}, {pipeline_mode = #tpu.pipeline_mode<synchronous>, transform_indices = @transform_4, window_bounds = array<i64: 208, 4>}, {pipeline_mode = #tpu.pipeline_mode<synchronous>, transform_indices = @transform_5, window_bounds = array<i64: 2, 8, 4>}]} {
    %c0 = arith.constant 0 : index
    %c0_0 = arith.constant 0 : index
    %0 = vector.load %arg4[%c0, %c0_0] : memref<200x16xf32, #tpu.memory_space<vmem>>, vector<16x16xf32>
    %c16 = arith.constant 16 : index
    %c0_1 = arith.constant 0 : index
    %1 = vector.load %arg4[%c16, %c0_1] : memref<200x16xf32, #tpu.memory_space<vmem>>, vector<16x16xf32>
    %c32 = arith.constant 32 : index
    %c0_2 = arith.constant 0 : index
    %2 = vector.load %arg4[%c32, %c0_2] : memref<200x16xf32, #tpu.memory_space<vmem>>, vector<16x16xf32>
    %c48 = arith.constant 48 : index
    %c0_3 = arith.constant 0 : index
    %3 = vector.load %arg4[%c48, %c0_3] : memref<200x16xf32, #tpu.memory_space<vmem>>, vector<24x16xf32>
    %c0_4 = arith.constant 0 : index
    %c0_5 = arith.constant 0 : index
    %4 = vector.load %arg3[%c0_4, %c0_5] : memref<672x32xf32, #tpu.memory_space<vmem>>, vector<4x32xf32>
    %c8 = arith.constant 8 : index
    %c0_6 = arith.constant 0 : index
    %5 = vector.load %arg3[%c8, %c0_6] : memref<672x32xf32, #tpu.memory_space<vmem>>, vector<4x32xf32>
    %c16_7 = arith.constant 16 : index
    %c0_8 = arith.constant 0 : index
    %6 = vector.load %arg3[%c16_7, %c0_8] : memref<672x32xf32, #tpu.memory_space<vmem>>, vector<4x32xf32>
    %c24 = arith.constant 24 : index
    %c0_9 = arith.constant 0 : index
    %7 = vector.load %arg3[%c24, %c0_9] : memref<672x32xf32, #tpu.memory_space<vmem>>, vector<1x32xf32>
    %c32_10 = arith.constant 32 : index
    %c0_11 = arith.constant 0 : index
    %8 = vector.load %arg3[%c32_10, %c0_11] : memref<672x32xf32, #tpu.memory_space<vmem>>, vector<16x32xf32>
    %c0_12 = arith.constant 0 : index
    %c0_13 = arith.constant 0 : index
    %9 = vector.load %arg5[%c0_12, %c0_13] : memref<208x4xf32, #tpu.memory_space<vmem>>, vector<32x4xf32>
    %c32_14 = arith.constant 32 : index
    %c0_15 = arith.constant 0 : index
    %10 = vector.load %arg5[%c32_14, %c0_15] : memref<208x4xf32, #tpu.memory_space<vmem>>, vector<1x4xf32>
    %c40 = arith.constant 40 : index
    %c0_16 = arith.constant 0 : index
    %11 = vector.load %arg5[%c40, %c0_16] : memref<208x4xf32, #tpu.memory_space<vmem>>, vector<4x4xf32>
    %c0_17 = arith.constant 0 : index
    %c0_18 = arith.constant 0 : index
    %c0_19 = arith.constant 0 : index
    %12 = vector.load %arg1[%c0_17, %c0_18, %c0_19] : memref<2x16x4xf32, #tpu.memory_space<vmem>>, vector<1x16x4xf32>
    %13 = vector.shape_cast %12 : vector<1x16x4xf32> to vector<16x4xf32>
    %c0_20 = arith.constant 0 : index
    %c0_21 = arith.constant 0 : index
    %c0_22 = arith.constant 0 : index
    %14 = vector.load %arg2[%c0_20, %c0_21, %c0_22] : memref<2x16x1xf32, #tpu.memory_space<vmem>>, vector<1x16x1xf32>
    %15 = vector.shape_cast %14 : vector<1x16x1xf32> to vector<16x1xf32>
    %cst = arith.constant dense<0.000000e+00> : vector<16x4xf32>
    %16 = tpu.matmul %0, %13, %cst {dimension_numbers = #tpu.dot_dimension_numbers<[1], [0], [0], [1], [0, 0, 1, 1], [], []>} : vector<16x16xf32>, vector<16x4xf32>, vector<16x4xf32> -> vector<16x4xf32>
    %cst_23 = arith.constant dense<0.000000e+00> : vector<16x4xf32>
    %17 = tpu.matmul %1, %13, %cst_23 {dimension_numbers = #tpu.dot_dimension_numbers<[1], [0], [0], [1], [0, 0, 1, 1], [], []>} : vector<16x16xf32>, vector<16x4xf32>, vector<16x4xf32> -> vector<16x4xf32>
    %cst_24 = arith.constant dense<0.000000e+00> : vector<16x32xf32>
    %18 = tpu.matmul %16, %4, %cst_24 {dimension_numbers = #tpu.dot_dimension_numbers<[1], [0], [0], [1], [0, 0, 1, 1], [], []>} : vector<16x4xf32>, vector<4x32xf32>, vector<16x32xf32> -> vector<16x32xf32>
    %cst_25 = arith.constant dense<0.000000e+00> : vector<16x32xf32>
    %19 = tpu.matmul %13, %5, %cst_25 {dimension_numbers = #tpu.dot_dimension_numbers<[1], [0], [0], [1], [0, 0, 1, 1], [], []>} : vector<16x4xf32>, vector<4x32xf32>, vector<16x32xf32> -> vector<16x32xf32>
    %20 = arith.addf %18, %19 : vector<16x32xf32>
    %cst_26 = arith.constant dense<0.000000e+00> : vector<16x32xf32>
    %21 = tpu.matmul %17, %6, %cst_26 {dimension_numbers = #tpu.dot_dimension_numbers<[1], [0], [0], [1], [0, 0, 1, 1], [], []>} : vector<16x4xf32>, vector<4x32xf32>, vector<16x32xf32> -> vector<16x32xf32>
    %22 = arith.addf %20, %21 : vector<16x32xf32>
    %23 = vector.broadcast %15 : vector<16x1xf32> to vector<16x32xf32>
    %24 = vector.broadcast %7 : vector<1x32xf32> to vector<16x32xf32>
    %25 = arith.mulf %23, %24 : vector<16x32xf32>
    %26 = arith.addf %22, %25 : vector<16x32xf32>
    %27 = arith.addf %26, %8 : vector<16x32xf32>
    %cst_27 = arith.constant dense<0.000000e+00> : vector<16x32xf32>
    %28 = tpu.matmul %2, %27, %cst_27 {dimension_numbers = #tpu.dot_dimension_numbers<[1], [0], [0], [1], [0, 0, 1, 1], [], []>} : vector<16x16xf32>, vector<16x32xf32>, vector<16x32xf32> -> vector<16x32xf32>
    %29 = vector.extract_strided_slice %28 {offsets = [0, 0], sizes = [8, 32], strides = [1, 1]} : vector<16x32xf32> to vector<8x32xf32>
    %30 = vector.extract_strided_slice %28 {offsets = [8, 0], sizes = [8, 32], strides = [1, 1]} : vector<16x32xf32> to vector<8x32xf32>
    %31 = arith.mulf %29, %29 : vector<8x32xf32>
    %32 = arith.mulf %30, %30 : vector<8x32xf32>
    %33 = arith.addf %31, %32 : vector<8x32xf32>
    %34 = tpu.iota {dimensions = array<i32: 0>} : vector<8x32xi32>
    %35 = arith.sitofp %34 : vector<8x32xi32> to vector<8x32xf32>
    %c7_i32 = arith.constant 7 : i32
    %36 = vector.broadcast %c7_i32 : i32 to vector<8x32xi32>
    %37 = arith.cmpi slt, %34, %36 : vector<8x32xi32>
    %cst_28 = arith.constant -1.000000e+30 : f32
    %38 = vector.broadcast %cst_28 : f32 to vector<8x32xf32>
    %39 = arith.select %37, %33, %38 : vector<8x32xi1>, vector<8x32xf32>
    %cst_29 = arith.constant 0.000000e+00 : f32
    %40 = vector.broadcast %cst_29 : f32 to vector<8x32xf32>
    %cst_30 = arith.constant dense<0xFF800000> : vector<32xf32>
    %41 = vector.multi_reduction <maximumf>, %39, %cst_30 [0] : vector<8x32xf32> to vector<32xf32>
    %42 = vector.shape_cast %41 : vector<32xf32> to vector<1x32xf32>
    %43 = vector.broadcast %42 : vector<1x32xf32> to vector<8x32xf32>
    %44 = arith.cmpf oge, %39, %43 : vector<8x32xf32>
    %cst_31 = arith.constant 8.000000e+00 : f32
    %45 = vector.broadcast %cst_31 : f32 to vector<8x32xf32>
    %46 = arith.select %44, %35, %45 : vector<8x32xi1>, vector<8x32xf32>
    %cst_32 = arith.constant dense<0x7F800000> : vector<32xf32>
    %47 = vector.multi_reduction <minimumf>, %46, %cst_32 [0] : vector<8x32xf32> to vector<32xf32>
    %48 = vector.shape_cast %47 : vector<32xf32> to vector<1x32xf32>
    %49 = vector.broadcast %48 : vector<1x32xf32> to vector<8x32xf32>
    %50 = arith.cmpf oeq, %35, %49 : vector<8x32xf32>
    %51 = arith.extui %50 : vector<8x32xi1> to vector<8x32xi32>
    %52 = arith.sitofp %51 : vector<8x32xi32> to vector<8x32xf32>
    %53 = arith.addf %40, %52 : vector<8x32xf32>
    %cst_33 = arith.constant -1.000000e+30 : f32
    %54 = vector.broadcast %cst_33 : f32 to vector<8x32xf32>
    %55 = arith.select %50, %54, %39 : vector<8x32xi1>, vector<8x32xf32>
    %cst_34 = arith.constant dense<0xFF800000> : vector<32xf32>
    %56 = vector.multi_reduction <maximumf>, %55, %cst_34 [0] : vector<8x32xf32> to vector<32xf32>
    %57 = vector.shape_cast %56 : vector<32xf32> to vector<1x32xf32>
    %58 = vector.broadcast %57 : vector<1x32xf32> to vector<8x32xf32>
    %59 = arith.cmpf oge, %55, %58 : vector<8x32xf32>
    %cst_35 = arith.constant 8.000000e+00 : f32
    %60 = vector.broadcast %cst_35 : f32 to vector<8x32xf32>
    %61 = arith.select %59, %35, %60 : vector<8x32xi1>, vector<8x32xf32>
    %cst_36 = arith.constant dense<0x7F800000> : vector<32xf32>
    %62 = vector.multi_reduction <minimumf>, %61, %cst_36 [0] : vector<8x32xf32> to vector<32xf32>
    %63 = vector.shape_cast %62 : vector<32xf32> to vector<1x32xf32>
    %64 = vector.broadcast %63 : vector<1x32xf32> to vector<8x32xf32>
    %65 = arith.cmpf oeq, %35, %64 : vector<8x32xf32>
    %66 = arith.extui %65 : vector<8x32xi1> to vector<8x32xi32>
    %67 = arith.sitofp %66 : vector<8x32xi32> to vector<8x32xf32>
    %68 = arith.addf %53, %67 : vector<8x32xf32>
    %69 = tpu.concatenate %68, %68 in 0 : vector<8x32xf32>, vector<8x32xf32> -> vector<16x32xf32>
    %70 = arith.mulf %28, %69 : vector<16x32xf32>
    %cst_37 = arith.constant dense<0.000000e+00> : vector<24x32xf32>
    %71 = tpu.matmul %3, %70, %cst_37 {dimension_numbers = #tpu.dot_dimension_numbers<[1], [0], [0], [1], [0, 0, 1, 1], [], []>} : vector<24x16xf32>, vector<16x32xf32>, vector<24x32xf32> -> vector<24x32xf32>
    %cst_38 = arith.constant 1.250000e-01 : f32
    %72 = vector.broadcast %cst_38 : f32 to vector<24x32xf32>
    %73 = arith.mulf %71, %72 : vector<24x32xf32>
    %74 = vector.extract_strided_slice %73 {offsets = [0, 0], sizes = [16, 32], strides = [1, 1]} : vector<24x32xf32> to vector<16x32xf32>
    %75 = arith.subf %27, %74 : vector<16x32xf32>
    %c176 = arith.constant 176 : index
    %c0_39 = arith.constant 0 : index
    %76 = vector.load %arg3[%c176, %c0_39] : memref<672x32xf32, #tpu.memory_space<vmem>>, vector<16x32xf32>
    %c48_40 = arith.constant 48 : index
    %c0_41 = arith.constant 0 : index
    %77 = vector.load %arg3[%c48_40, %c0_41] : memref<672x32xf32, #tpu.memory_space<vmem>>, vector<32x32xf32>
    %cst_42 = arith.constant dense<0.000000e+00> : vector<16x32xf32>
    %78 = tpu.matmul %75, %77, %cst_42 {dimension_numbers = #tpu.dot_dimension_numbers<[1], [0], [0], [1], [0, 0, 1, 1], [], []>} : vector<16x32xf32>, vector<32x32xf32>, vector<16x32xf32> -> vector<16x32xf32>
    %c72 = arith.constant 72 : index
    %c0_43 = arith.constant 0 : index
    %79 = vector.load %arg4[%c72, %c0_43] : memref<200x16xf32, #tpu.memory_space<vmem>>, vector<16x16xf32>
    %cst_44 = arith.constant dense<0.000000e+00> : vector<16x32xf32>
    %80 = tpu.matmul %79, %78, %cst_44 {dimension_numbers = #tpu.dot_dimension_numbers<[1], [0], [0], [1], [0, 0, 1, 1], [], []>} : vector<16x16xf32>, vector<16x32xf32>, vector<16x32xf32> -> vector<16x32xf32>
    %81 = arith.addf %76, %80 : vector<16x32xf32>
    %c80 = arith.constant 80 : index
    %c0_45 = arith.constant 0 : index
    %82 = vector.load %arg3[%c80, %c0_45] : memref<672x32xf32, #tpu.memory_space<vmem>>, vector<32x32xf32>
    %cst_46 = arith.constant dense<0.000000e+00> : vector<16x32xf32>
    %83 = tpu.matmul %75, %82, %cst_46 {dimension_numbers = #tpu.dot_dimension_numbers<[1], [0], [0], [1], [0, 0, 1, 1], [], []>} : vector<16x32xf32>, vector<32x32xf32>, vector<16x32xf32> -> vector<16x32xf32>
    %c88 = arith.constant 88 : index
    %c0_47 = arith.constant 0 : index
    %84 = vector.load %arg4[%c88, %c0_47] : memref<200x16xf32, #tpu.memory_space<vmem>>, vector<16x16xf32>
    %cst_48 = arith.constant dense<0.000000e+00> : vector<16x32xf32>
    %85 = tpu.matmul %84, %83, %cst_48 {dimension_numbers = #tpu.dot_dimension_numbers<[1], [0], [0], [1], [0, 0, 1, 1], [], []>} : vector<16x16xf32>, vector<16x32xf32>, vector<16x32xf32> -> vector<16x32xf32>
    %86 = arith.addf %81, %85 : vector<16x32xf32>
    %c112 = arith.constant 112 : index
    %c0_49 = arith.constant 0 : index
    %87 = vector.load %arg3[%c112, %c0_49] : memref<672x32xf32, #tpu.memory_space<vmem>>, vector<32x32xf32>
    %cst_50 = arith.constant dense<0.000000e+00> : vector<16x32xf32>
    %88 = tpu.matmul %75, %87, %cst_50 {dimension_numbers = #tpu.dot_dimension_numbers<[1], [0], [0], [1], [0, 0, 1, 1], [], []>} : vector<16x32xf32>, vector<32x32xf32>, vector<16x32xf32> -> vector<16x32xf32>
    %c104 = arith.constant 104 : index
    %c0_51 = arith.constant 0 : index
    %89 = vector.load %arg4[%c104, %c0_51] : memref<200x16xf32, #tpu.memory_space<vmem>>, vector<16x16xf32>
    %cst_52 = arith.constant dense<0.000000e+00> : vector<16x32xf32>
    %90 = tpu.matmul %89, %88, %cst_52 {dimension_numbers = #tpu.dot_dimension_numbers<[1], [0], [0], [1], [0, 0, 1, 1], [], []>} : vector<16x16xf32>, vector<16x32xf32>, vector<16x32xf32> -> vector<16x32xf32>
    %91 = arith.addf %86, %90 : vector<16x32xf32>
    %c144 = arith.constant 144 : index
    %c0_53 = arith.constant 0 : index
    %92 = vector.load %arg3[%c144, %c0_53] : memref<672x32xf32, #tpu.memory_space<vmem>>, vector<32x32xf32>
    %cst_54 = arith.constant dense<0.000000e+00> : vector<16x32xf32>
    %93 = tpu.matmul %75, %92, %cst_54 {dimension_numbers = #tpu.dot_dimension_numbers<[1], [0], [0], [1], [0, 0, 1, 1], [], []>} : vector<16x32xf32>, vector<32x32xf32>, vector<16x32xf32> -> vector<16x32xf32>
    %c120 = arith.constant 120 : index
    %c0_55 = arith.constant 0 : index
    %94 = vector.load %arg4[%c120, %c0_55] : memref<200x16xf32, #tpu.memory_space<vmem>>, vector<16x16xf32>
    %cst_56 = arith.constant dense<0.000000e+00> : vector<16x32xf32>
    %95 = tpu.matmul %94, %93, %cst_56 {dimension_numbers = #tpu.dot_dimension_numbers<[1], [0], [0], [1], [0, 0, 1, 1], [], []>} : vector<16x16xf32>, vector<16x32xf32>, vector<16x32xf32> -> vector<16x32xf32>
    %96 = arith.addf %91, %95 : vector<16x32xf32>
    %97 = arith.subf %75, %96 : vector<16x32xf32>
    %c192 = arith.constant 192 : index
    %c0_57 = arith.constant 0 : index
    %98 = vector.load %arg3[%c192, %c0_57] : memref<672x32xf32, #tpu.memory_space<vmem>>, vector<1x32xf32>
    %c200 = arith.constant 200 : index
    %c0_58 = arith.constant 0 : index
    %99 = vector.load %arg3[%c200, %c0_58] : memref<672x32xf32, #tpu.memory_space<vmem>>, vector<1x32xf32>
    %cst_59 = arith.constant dense<0.000000e+00> : vector<16xf32>
    %100 = vector.multi_reduction <add>, %97, %cst_59 [1] : vector<16x32xf32> to vector<16xf32>
    %101 = vector.shape_cast %100 : vector<16xf32> to vector<16x1xf32>
    %cst_60 = arith.constant 3.200000e+01 : f32
    %102 = vector.broadcast %cst_60 : f32 to vector<16x1xf32>
    %103 = arith.divf %101, %102 : vector<16x1xf32>
    %104 = vector.broadcast %103 : vector<16x1xf32> to vector<16x32xf32>
    %105 = arith.subf %97, %104 : vector<16x32xf32>
    %106 = arith.mulf %105, %105 : vector<16x32xf32>
    %cst_61 = arith.constant dense<0.000000e+00> : vector<16xf32>
    %107 = vector.multi_reduction <add>, %106, %cst_61 [1] : vector<16x32xf32> to vector<16xf32>
    %108 = vector.shape_cast %107 : vector<16xf32> to vector<16x1xf32>
    %cst_62 = arith.constant 3.200000e+01 : f32
    %109 = vector.broadcast %cst_62 : f32 to vector<16x1xf32>
    %110 = arith.divf %108, %109 : vector<16x1xf32>
    %cst_63 = arith.constant 9.99999974E-6 : f32
    %111 = vector.broadcast %cst_63 : f32 to vector<16x1xf32>
    %112 = arith.addf %110, %111 : vector<16x1xf32>
    %113 = math.rsqrt %112 : vector<16x1xf32>
    %114 = vector.broadcast %113 : vector<16x1xf32> to vector<16x32xf32>
    %115 = arith.mulf %105, %114 : vector<16x32xf32>
    %116 = vector.broadcast %98 : vector<1x32xf32> to vector<16x32xf32>
    %117 = arith.mulf %115, %116 : vector<16x32xf32>
    %118 = vector.broadcast %99 : vector<1x32xf32> to vector<16x32xf32>
    %119 = arith.addf %117, %118 : vector<16x32xf32>
    %c224 = arith.constant 224 : index
    %c0_64 = arith.constant 0 : index
    %120 = vector.load %arg3[%c224, %c0_64] : memref<672x32xf32, #tpu.memory_space<vmem>>, vector<32x32xf32>
    %cst_65 = arith.constant dense<0.000000e+00> : vector<16x32xf32>
    %121 = tpu.matmul %119, %120, %cst_65 {dimension_numbers = #tpu.dot_dimension_numbers<[1], [0], [0], [1], [0, 0, 1, 1], [], []>} : vector<16x32xf32>, vector<32x32xf32>, vector<16x32xf32> -> vector<16x32xf32>
    %122 = arith.negf %121 : vector<16x32xf32>
    %123 = math.exp %122 : vector<16x32xf32>
    %cst_66 = arith.constant 1.000000e+00 : f32
    %124 = vector.broadcast %cst_66 : f32 to vector<16x32xf32>
    %125 = arith.addf %124, %123 : vector<16x32xf32>
    %126 = arith.divf %124, %125 : vector<16x32xf32>
    %c256 = arith.constant 256 : index
    %c0_67 = arith.constant 0 : index
    %127 = vector.load %arg3[%c256, %c0_67] : memref<672x32xf32, #tpu.memory_space<vmem>>, vector<32x32xf32>
    %cst_68 = arith.constant dense<0.000000e+00> : vector<16x32xf32>
    %128 = tpu.matmul %126, %127, %cst_68 {dimension_numbers = #tpu.dot_dimension_numbers<[1], [0], [0], [1], [0, 0, 1, 1], [], []>} : vector<16x32xf32>, vector<32x32xf32>, vector<16x32xf32> -> vector<16x32xf32>
    %129 = arith.addf %119, %128 : vector<16x32xf32>
    %c208 = arith.constant 208 : index
    %c0_69 = arith.constant 0 : index
    %130 = vector.load %arg3[%c208, %c0_69] : memref<672x32xf32, #tpu.memory_space<vmem>>, vector<1x32xf32>
    %c216 = arith.constant 216 : index
    %c0_70 = arith.constant 0 : index
    %131 = vector.load %arg3[%c216, %c0_70] : memref<672x32xf32, #tpu.memory_space<vmem>>, vector<1x32xf32>
    %cst_71 = arith.constant dense<0.000000e+00> : vector<16xf32>
    %132 = vector.multi_reduction <add>, %129, %cst_71 [1] : vector<16x32xf32> to vector<16xf32>
    %133 = vector.shape_cast %132 : vector<16xf32> to vector<16x1xf32>
    %cst_72 = arith.constant 3.200000e+01 : f32
    %134 = vector.broadcast %cst_72 : f32 to vector<16x1xf32>
    %135 = arith.divf %133, %134 : vector<16x1xf32>
    %136 = vector.broadcast %135 : vector<16x1xf32> to vector<16x32xf32>
    %137 = arith.subf %129, %136 : vector<16x32xf32>
    %138 = arith.mulf %137, %137 : vector<16x32xf32>
    %cst_73 = arith.constant dense<0.000000e+00> : vector<16xf32>
    %139 = vector.multi_reduction <add>, %138, %cst_73 [1] : vector<16x32xf32> to vector<16xf32>
    %140 = vector.shape_cast %139 : vector<16xf32> to vector<16x1xf32>
    %cst_74 = arith.constant 3.200000e+01 : f32
    %141 = vector.broadcast %cst_74 : f32 to vector<16x1xf32>
    %142 = arith.divf %140, %141 : vector<16x1xf32>
    %cst_75 = arith.constant 9.99999974E-6 : f32
    %143 = vector.broadcast %cst_75 : f32 to vector<16x1xf32>
    %144 = arith.addf %142, %143 : vector<16x1xf32>
    %145 = math.rsqrt %144 : vector<16x1xf32>
    %146 = vector.broadcast %145 : vector<16x1xf32> to vector<16x32xf32>
    %147 = arith.mulf %137, %146 : vector<16x32xf32>
    %148 = vector.broadcast %130 : vector<1x32xf32> to vector<16x32xf32>
    %149 = arith.mulf %147, %148 : vector<16x32xf32>
    %150 = vector.broadcast %131 : vector<1x32xf32> to vector<16x32xf32>
    %151 = arith.addf %149, %150 : vector<16x32xf32>
    %c48_76 = arith.constant 48 : index
    %c0_77 = arith.constant 0 : index
    %152 = vector.load %arg5[%c48_76, %c0_77] : memref<208x4xf32, #tpu.memory_space<vmem>>, vector<32x4xf32>
    %cst_78 = arith.constant dense<0.000000e+00> : vector<16x4xf32>
    %153 = tpu.matmul %74, %152, %cst_78 {dimension_numbers = #tpu.dot_dimension_numbers<[1], [0], [0], [1], [0, 0, 1, 1], [], []>} : vector<16x32xf32>, vector<32x4xf32>, vector<16x4xf32> -> vector<16x4xf32>
    %c80_79 = arith.constant 80 : index
    %c0_80 = arith.constant 0 : index
    %154 = vector.load %arg5[%c80_79, %c0_80] : memref<208x4xf32, #tpu.memory_space<vmem>>, vector<32x4xf32>
    %cst_81 = arith.constant dense<0.000000e+00> : vector<16x4xf32>
    %155 = tpu.matmul %96, %154, %cst_81 {dimension_numbers = #tpu.dot_dimension_numbers<[1], [0], [0], [1], [0, 0, 1, 1], [], []>} : vector<16x32xf32>, vector<32x4xf32>, vector<16x4xf32> -> vector<16x4xf32>
    %156 = arith.subf %13, %153 : vector<16x4xf32>
    %157 = tpu.concatenate %156, %155 in 0 : vector<16x4xf32>, vector<16x4xf32> -> vector<32x4xf32>
    %c112_82 = arith.constant 112 : index
    %c0_83 = arith.constant 0 : index
    %158 = vector.load %arg5[%c112_82, %c0_83] : memref<208x4xf32, #tpu.memory_space<vmem>>, vector<16x4xf32>
    %c288 = arith.constant 288 : index
    %c0_84 = arith.constant 0 : index
    %159 = vector.load %arg3[%c288, %c0_84] : memref<672x32xf32, #tpu.memory_space<vmem>>, vector<16x32xf32>
    %cst_85 = arith.constant dense<0.000000e+00> : vector<16x4xf32>
    %160 = tpu.matmul %159, %157, %cst_85 {dimension_numbers = #tpu.dot_dimension_numbers<[1], [0], [0], [1], [0, 0, 1, 1], [], []>} : vector<16x32xf32>, vector<32x4xf32>, vector<16x4xf32> -> vector<16x4xf32>
    %161 = vector.extract_strided_slice %11 {offsets = [0, 0], sizes = [1, 4], strides = [1, 1]} : vector<4x4xf32> to vector<1x4xf32>
    %162 = vector.broadcast %161 : vector<1x4xf32> to vector<16x4xf32>
    %163 = arith.mulf %160, %162 : vector<16x4xf32>
    %164 = arith.addf %158, %163 : vector<16x4xf32>
    %c304 = arith.constant 304 : index
    %c0_86 = arith.constant 0 : index
    %165 = vector.load %arg3[%c304, %c0_86] : memref<672x32xf32, #tpu.memory_space<vmem>>, vector<16x32xf32>
    %cst_87 = arith.constant dense<0.000000e+00> : vector<16x4xf32>
    %166 = tpu.matmul %165, %157, %cst_87 {dimension_numbers = #tpu.dot_dimension_numbers<[1], [0], [0], [1], [0, 0, 1, 1], [], []>} : vector<16x32xf32>, vector<32x4xf32>, vector<16x4xf32> -> vector<16x4xf32>
    %167 = vector.extract_strided_slice %11 {offsets = [1, 0], sizes = [1, 4], strides = [1, 1]} : vector<4x4xf32> to vector<1x4xf32>
    %168 = vector.broadcast %167 : vector<1x4xf32> to vector<16x4xf32>
    %169 = arith.mulf %166, %168 : vector<16x4xf32>
    %170 = arith.addf %164, %169 : vector<16x4xf32>
    %c320 = arith.constant 320 : index
    %c0_88 = arith.constant 0 : index
    %171 = vector.load %arg3[%c320, %c0_88] : memref<672x32xf32, #tpu.memory_space<vmem>>, vector<16x32xf32>
    %cst_89 = arith.constant dense<0.000000e+00> : vector<16x4xf32>
    %172 = tpu.matmul %171, %157, %cst_89 {dimension_numbers = #tpu.dot_dimension_numbers<[1], [0], [0], [1], [0, 0, 1, 1], [], []>} : vector<16x32xf32>, vector<32x4xf32>, vector<16x4xf32> -> vector<16x4xf32>
    %173 = vector.extract_strided_slice %11 {offsets = [2, 0], sizes = [1, 4], strides = [1, 1]} : vector<4x4xf32> to vector<1x4xf32>
    %174 = vector.broadcast %173 : vector<1x4xf32> to vector<16x4xf32>
    %175 = arith.mulf %172, %174 : vector<16x4xf32>
    %176 = arith.addf %170, %175 : vector<16x4xf32>
    %c336 = arith.constant 336 : index
    %c0_90 = arith.constant 0 : index
    %177 = vector.load %arg3[%c336, %c0_90] : memref<672x32xf32, #tpu.memory_space<vmem>>, vector<16x32xf32>
    %cst_91 = arith.constant dense<0.000000e+00> : vector<16x4xf32>
    %178 = tpu.matmul %177, %157, %cst_91 {dimension_numbers = #tpu.dot_dimension_numbers<[1], [0], [0], [1], [0, 0, 1, 1], [], []>} : vector<16x32xf32>, vector<32x4xf32>, vector<16x4xf32> -> vector<16x4xf32>
    %179 = vector.extract_strided_slice %11 {offsets = [3, 0], sizes = [1, 4], strides = [1, 1]} : vector<4x4xf32> to vector<1x4xf32>
    %180 = vector.broadcast %179 : vector<1x4xf32> to vector<16x4xf32>
    %181 = arith.mulf %178, %180 : vector<16x4xf32>
    %182 = arith.addf %176, %181 : vector<16x4xf32>
    %183 = vector.extract_strided_slice %96 {offsets = [15, 0], sizes = [1, 32], strides = [1, 1]} : vector<16x32xf32> to vector<1x32xf32>
    %c352 = arith.constant 352 : index
    %c0_92 = arith.constant 0 : index
    %184 = vector.load %arg3[%c352, %c0_92] : memref<672x32xf32, #tpu.memory_space<vmem>>, vector<8x32xf32>
    %185 = vector.broadcast %183 : vector<1x32xf32> to vector<8x32xf32>
    %186 = arith.mulf %185, %184 : vector<8x32xf32>
    %187 = vector.extract_strided_slice %73 {offsets = [16, 0], sizes = [8, 32], strides = [1, 1]} : vector<24x32xf32> to vector<8x32xf32>
    %cst_93 = arith.constant dense<0.000000e+00> : vector<16x32xf32>
    %188 = tpu.matmul %2, %151, %cst_93 {dimension_numbers = #tpu.dot_dimension_numbers<[1], [0], [0], [1], [0, 0, 1, 1], [], []>} : vector<16x16xf32>, vector<16x32xf32>, vector<16x32xf32> -> vector<16x32xf32>
    %189 = vector.extract_strided_slice %188 {offsets = [0, 0], sizes = [8, 32], strides = [1, 1]} : vector<16x32xf32> to vector<8x32xf32>
    %190 = vector.extract_strided_slice %188 {offsets = [8, 0], sizes = [8, 32], strides = [1, 1]} : vector<16x32xf32> to vector<8x32xf32>
    %191 = arith.mulf %189, %189 : vector<8x32xf32>
    %192 = arith.mulf %190, %190 : vector<8x32xf32>
    %193 = arith.addf %191, %192 : vector<8x32xf32>
    %194 = tpu.iota {dimensions = array<i32: 0>} : vector<8x32xi32>
    %195 = arith.sitofp %194 : vector<8x32xi32> to vector<8x32xf32>
    %c7_i32_94 = arith.constant 7 : i32
    %196 = vector.broadcast %c7_i32_94 : i32 to vector<8x32xi32>
    %197 = arith.cmpi slt, %194, %196 : vector<8x32xi32>
    %cst_95 = arith.constant -1.000000e+30 : f32
    %198 = vector.broadcast %cst_95 : f32 to vector<8x32xf32>
    %199 = arith.select %197, %193, %198 : vector<8x32xi1>, vector<8x32xf32>
    %cst_96 = arith.constant 0.000000e+00 : f32
    %200 = vector.broadcast %cst_96 : f32 to vector<8x32xf32>
    %cst_97 = arith.constant dense<0xFF800000> : vector<32xf32>
    %201 = vector.multi_reduction <maximumf>, %199, %cst_97 [0] : vector<8x32xf32> to vector<32xf32>
    %202 = vector.shape_cast %201 : vector<32xf32> to vector<1x32xf32>
    %203 = vector.broadcast %202 : vector<1x32xf32> to vector<8x32xf32>
    %204 = arith.cmpf oge, %199, %203 : vector<8x32xf32>
    %cst_98 = arith.constant 8.000000e+00 : f32
    %205 = vector.broadcast %cst_98 : f32 to vector<8x32xf32>
    %206 = arith.select %204, %195, %205 : vector<8x32xi1>, vector<8x32xf32>
    %cst_99 = arith.constant dense<0x7F800000> : vector<32xf32>
    %207 = vector.multi_reduction <minimumf>, %206, %cst_99 [0] : vector<8x32xf32> to vector<32xf32>
    %208 = vector.shape_cast %207 : vector<32xf32> to vector<1x32xf32>
    %209 = vector.broadcast %208 : vector<1x32xf32> to vector<8x32xf32>
    %210 = arith.cmpf oeq, %195, %209 : vector<8x32xf32>
    %211 = arith.extui %210 : vector<8x32xi1> to vector<8x32xi32>
    %212 = arith.sitofp %211 : vector<8x32xi32> to vector<8x32xf32>
    %213 = arith.addf %200, %212 : vector<8x32xf32>
    %cst_100 = arith.constant -1.000000e+30 : f32
    %214 = vector.broadcast %cst_100 : f32 to vector<8x32xf32>
    %215 = arith.select %210, %214, %199 : vector<8x32xi1>, vector<8x32xf32>
    %cst_101 = arith.constant dense<0xFF800000> : vector<32xf32>
    %216 = vector.multi_reduction <maximumf>, %215, %cst_101 [0] : vector<8x32xf32> to vector<32xf32>
    %217 = vector.shape_cast %216 : vector<32xf32> to vector<1x32xf32>
    %218 = vector.broadcast %217 : vector<1x32xf32> to vector<8x32xf32>
    %219 = arith.cmpf oge, %215, %218 : vector<8x32xf32>
    %cst_102 = arith.constant 8.000000e+00 : f32
    %220 = vector.broadcast %cst_102 : f32 to vector<8x32xf32>
    %221 = arith.select %219, %195, %220 : vector<8x32xi1>, vector<8x32xf32>
    %cst_103 = arith.constant dense<0x7F800000> : vector<32xf32>
    %222 = vector.multi_reduction <minimumf>, %221, %cst_103 [0] : vector<8x32xf32> to vector<32xf32>
    %223 = vector.shape_cast %222 : vector<32xf32> to vector<1x32xf32>
    %224 = vector.broadcast %223 : vector<1x32xf32> to vector<8x32xf32>
    %225 = arith.cmpf oeq, %195, %224 : vector<8x32xf32>
    %226 = arith.extui %225 : vector<8x32xi1> to vector<8x32xi32>
    %227 = arith.sitofp %226 : vector<8x32xi32> to vector<8x32xf32>
    %228 = arith.addf %213, %227 : vector<8x32xf32>
    %229 = tpu.concatenate %228, %228 in 0 : vector<8x32xf32>, vector<8x32xf32> -> vector<16x32xf32>
    %230 = arith.mulf %188, %229 : vector<16x32xf32>
    %cst_104 = arith.constant dense<0.000000e+00> : vector<24x32xf32>
    %231 = tpu.matmul %3, %230, %cst_104 {dimension_numbers = #tpu.dot_dimension_numbers<[1], [0], [0], [1], [0, 0, 1, 1], [], []>} : vector<24x16xf32>, vector<16x32xf32>, vector<24x32xf32> -> vector<24x32xf32>
    %cst_105 = arith.constant 1.250000e-01 : f32
    %232 = vector.broadcast %cst_105 : f32 to vector<24x32xf32>
    %233 = arith.mulf %231, %232 : vector<24x32xf32>
    %234 = vector.extract_strided_slice %233 {offsets = [0, 0], sizes = [16, 32], strides = [1, 1]} : vector<24x32xf32> to vector<16x32xf32>
    %235 = arith.subf %151, %234 : vector<16x32xf32>
    %c488 = arith.constant 488 : index
    %c0_106 = arith.constant 0 : index
    %236 = vector.load %arg3[%c488, %c0_106] : memref<672x32xf32, #tpu.memory_space<vmem>>, vector<16x32xf32>
    %c360 = arith.constant 360 : index
    %c0_107 = arith.constant 0 : index
    %237 = vector.load %arg3[%c360, %c0_107] : memref<672x32xf32, #tpu.memory_space<vmem>>, vector<32x32xf32>
    %cst_108 = arith.constant dense<0.000000e+00> : vector<16x32xf32>
    %238 = tpu.matmul %235, %237, %cst_108 {dimension_numbers = #tpu.dot_dimension_numbers<[1], [0], [0], [1], [0, 0, 1, 1], [], []>} : vector<16x32xf32>, vector<32x32xf32>, vector<16x32xf32> -> vector<16x32xf32>
    %c136 = arith.constant 136 : index
    %c0_109 = arith.constant 0 : index
    %239 = vector.load %arg4[%c136, %c0_109] : memref<200x16xf32, #tpu.memory_space<vmem>>, vector<16x16xf32>
    %cst_110 = arith.constant dense<0.000000e+00> : vector<16x32xf32>
    %240 = tpu.matmul %239, %238, %cst_110 {dimension_numbers = #tpu.dot_dimension_numbers<[1], [0], [0], [1], [0, 0, 1, 1], [], []>} : vector<16x16xf32>, vector<16x32xf32>, vector<16x32xf32> -> vector<16x32xf32>
    %241 = arith.addf %236, %240 : vector<16x32xf32>
    %c392 = arith.constant 392 : index
    %c0_111 = arith.constant 0 : index
    %242 = vector.load %arg3[%c392, %c0_111] : memref<672x32xf32, #tpu.memory_space<vmem>>, vector<32x32xf32>
    %cst_112 = arith.constant dense<0.000000e+00> : vector<16x32xf32>
    %243 = tpu.matmul %235, %242, %cst_112 {dimension_numbers = #tpu.dot_dimension_numbers<[1], [0], [0], [1], [0, 0, 1, 1], [], []>} : vector<16x32xf32>, vector<32x32xf32>, vector<16x32xf32> -> vector<16x32xf32>
    %c152 = arith.constant 152 : index
    %c0_113 = arith.constant 0 : index
    %244 = vector.load %arg4[%c152, %c0_113] : memref<200x16xf32, #tpu.memory_space<vmem>>, vector<16x16xf32>
    %cst_114 = arith.constant dense<0.000000e+00> : vector<16x32xf32>
    %245 = tpu.matmul %244, %243, %cst_114 {dimension_numbers = #tpu.dot_dimension_numbers<[1], [0], [0], [1], [0, 0, 1, 1], [], []>} : vector<16x16xf32>, vector<16x32xf32>, vector<16x32xf32> -> vector<16x32xf32>
    %246 = arith.addf %241, %245 : vector<16x32xf32>
    %c424 = arith.constant 424 : index
    %c0_115 = arith.constant 0 : index
    %247 = vector.load %arg3[%c424, %c0_115] : memref<672x32xf32, #tpu.memory_space<vmem>>, vector<32x32xf32>
    %cst_116 = arith.constant dense<0.000000e+00> : vector<16x32xf32>
    %248 = tpu.matmul %235, %247, %cst_116 {dimension_numbers = #tpu.dot_dimension_numbers<[1], [0], [0], [1], [0, 0, 1, 1], [], []>} : vector<16x32xf32>, vector<32x32xf32>, vector<16x32xf32> -> vector<16x32xf32>
    %c168 = arith.constant 168 : index
    %c0_117 = arith.constant 0 : index
    %249 = vector.load %arg4[%c168, %c0_117] : memref<200x16xf32, #tpu.memory_space<vmem>>, vector<16x16xf32>
    %cst_118 = arith.constant dense<0.000000e+00> : vector<16x32xf32>
    %250 = tpu.matmul %249, %248, %cst_118 {dimension_numbers = #tpu.dot_dimension_numbers<[1], [0], [0], [1], [0, 0, 1, 1], [], []>} : vector<16x16xf32>, vector<16x32xf32>, vector<16x32xf32> -> vector<16x32xf32>
    %251 = arith.addf %246, %250 : vector<16x32xf32>
    %c456 = arith.constant 456 : index
    %c0_119 = arith.constant 0 : index
    %252 = vector.load %arg3[%c456, %c0_119] : memref<672x32xf32, #tpu.memory_space<vmem>>, vector<32x32xf32>
    %cst_120 = arith.constant dense<0.000000e+00> : vector<16x32xf32>
    %253 = tpu.matmul %235, %252, %cst_120 {dimension_numbers = #tpu.dot_dimension_numbers<[1], [0], [0], [1], [0, 0, 1, 1], [], []>} : vector<16x32xf32>, vector<32x32xf32>, vector<16x32xf32> -> vector<16x32xf32>
    %c184 = arith.constant 184 : index
    %c0_121 = arith.constant 0 : index
    %254 = vector.load %arg4[%c184, %c0_121] : memref<200x16xf32, #tpu.memory_space<vmem>>, vector<16x16xf32>
    %cst_122 = arith.constant dense<0.000000e+00> : vector<16x32xf32>
    %255 = tpu.matmul %254, %253, %cst_122 {dimension_numbers = #tpu.dot_dimension_numbers<[1], [0], [0], [1], [0, 0, 1, 1], [], []>} : vector<16x16xf32>, vector<16x32xf32>, vector<16x32xf32> -> vector<16x32xf32>
    %256 = arith.addf %251, %255 : vector<16x32xf32>
    %c128 = arith.constant 128 : index
    %c0_123 = arith.constant 0 : index
    %257 = vector.load %arg5[%c128, %c0_123] : memref<208x4xf32, #tpu.memory_space<vmem>>, vector<32x4xf32>
    %cst_124 = arith.constant dense<0.000000e+00> : vector<16x4xf32>
    %258 = tpu.matmul %234, %257, %cst_124 {dimension_numbers = #tpu.dot_dimension_numbers<[1], [0], [0], [1], [0, 0, 1, 1], [], []>} : vector<16x32xf32>, vector<32x4xf32>, vector<16x4xf32> -> vector<16x4xf32>
    %c160 = arith.constant 160 : index
    %c0_125 = arith.constant 0 : index
    %259 = vector.load %arg5[%c160, %c0_125] : memref<208x4xf32, #tpu.memory_space<vmem>>, vector<32x4xf32>
    %cst_126 = arith.constant dense<0.000000e+00> : vector<16x4xf32>
    %260 = tpu.matmul %256, %259, %cst_126 {dimension_numbers = #tpu.dot_dimension_numbers<[1], [0], [0], [1], [0, 0, 1, 1], [], []>} : vector<16x32xf32>, vector<32x4xf32>, vector<16x4xf32> -> vector<16x4xf32>
    %261 = arith.subf %182, %258 : vector<16x4xf32>
    %262 = tpu.concatenate %261, %260 in 0 : vector<16x4xf32>, vector<16x4xf32> -> vector<32x4xf32>
    %c192_127 = arith.constant 192 : index
    %c0_128 = arith.constant 0 : index
    %263 = vector.load %arg5[%c192_127, %c0_128] : memref<208x4xf32, #tpu.memory_space<vmem>>, vector<16x4xf32>
    %c600 = arith.constant 600 : index
    %c0_129 = arith.constant 0 : index
    %264 = vector.load %arg3[%c600, %c0_129] : memref<672x32xf32, #tpu.memory_space<vmem>>, vector<16x32xf32>
    %cst_130 = arith.constant dense<0.000000e+00> : vector<16x4xf32>
    %265 = tpu.matmul %264, %262, %cst_130 {dimension_numbers = #tpu.dot_dimension_numbers<[1], [0], [0], [1], [0, 0, 1, 1], [], []>} : vector<16x32xf32>, vector<32x4xf32>, vector<16x4xf32> -> vector<16x4xf32>
    %266 = vector.extract_strided_slice %11 {offsets = [0, 0], sizes = [1, 4], strides = [1, 1]} : vector<4x4xf32> to vector<1x4xf32>
    %267 = vector.broadcast %266 : vector<1x4xf32> to vector<16x4xf32>
    %268 = arith.mulf %265, %267 : vector<16x4xf32>
    %269 = arith.addf %263, %268 : vector<16x4xf32>
    %c616 = arith.constant 616 : index
    %c0_131 = arith.constant 0 : index
    %270 = vector.load %arg3[%c616, %c0_131] : memref<672x32xf32, #tpu.memory_space<vmem>>, vector<16x32xf32>
    %cst_132 = arith.constant dense<0.000000e+00> : vector<16x4xf32>
    %271 = tpu.matmul %270, %262, %cst_132 {dimension_numbers = #tpu.dot_dimension_numbers<[1], [0], [0], [1], [0, 0, 1, 1], [], []>} : vector<16x32xf32>, vector<32x4xf32>, vector<16x4xf32> -> vector<16x4xf32>
    %272 = vector.extract_strided_slice %11 {offsets = [1, 0], sizes = [1, 4], strides = [1, 1]} : vector<4x4xf32> to vector<1x4xf32>
    %273 = vector.broadcast %272 : vector<1x4xf32> to vector<16x4xf32>
    %274 = arith.mulf %271, %273 : vector<16x4xf32>
    %275 = arith.addf %269, %274 : vector<16x4xf32>
    %c632 = arith.constant 632 : index
    %c0_133 = arith.constant 0 : index
    %276 = vector.load %arg3[%c632, %c0_133] : memref<672x32xf32, #tpu.memory_space<vmem>>, vector<16x32xf32>
    %cst_134 = arith.constant dense<0.000000e+00> : vector<16x4xf32>
    %277 = tpu.matmul %276, %262, %cst_134 {dimension_numbers = #tpu.dot_dimension_numbers<[1], [0], [0], [1], [0, 0, 1, 1], [], []>} : vector<16x32xf32>, vector<32x4xf32>, vector<16x4xf32> -> vector<16x4xf32>
    %278 = vector.extract_strided_slice %11 {offsets = [2, 0], sizes = [1, 4], strides = [1, 1]} : vector<4x4xf32> to vector<1x4xf32>
    %279 = vector.broadcast %278 : vector<1x4xf32> to vector<16x4xf32>
    %280 = arith.mulf %277, %279 : vector<16x4xf32>
    %281 = arith.addf %275, %280 : vector<16x4xf32>
    %c648 = arith.constant 648 : index
    %c0_135 = arith.constant 0 : index
    %282 = vector.load %arg3[%c648, %c0_135] : memref<672x32xf32, #tpu.memory_space<vmem>>, vector<16x32xf32>
    %cst_136 = arith.constant dense<0.000000e+00> : vector<16x4xf32>
    %283 = tpu.matmul %282, %262, %cst_136 {dimension_numbers = #tpu.dot_dimension_numbers<[1], [0], [0], [1], [0, 0, 1, 1], [], []>} : vector<16x32xf32>, vector<32x4xf32>, vector<16x4xf32> -> vector<16x4xf32>
    %284 = vector.extract_strided_slice %11 {offsets = [3, 0], sizes = [1, 4], strides = [1, 1]} : vector<4x4xf32> to vector<1x4xf32>
    %285 = vector.broadcast %284 : vector<1x4xf32> to vector<16x4xf32>
    %286 = arith.mulf %283, %285 : vector<16x4xf32>
    %287 = arith.addf %281, %286 : vector<16x4xf32>
    %288 = vector.extract_strided_slice %256 {offsets = [15, 0], sizes = [1, 32], strides = [1, 1]} : vector<16x32xf32> to vector<1x32xf32>
    %c664 = arith.constant 664 : index
    %c0_137 = arith.constant 0 : index
    %289 = vector.load %arg3[%c664, %c0_137] : memref<672x32xf32, #tpu.memory_space<vmem>>, vector<8x32xf32>
    %290 = vector.broadcast %288 : vector<1x32xf32> to vector<8x32xf32>
    %291 = arith.mulf %290, %289 : vector<8x32xf32>
    %292 = vector.extract_strided_slice %233 {offsets = [16, 0], sizes = [8, 32], strides = [1, 1]} : vector<24x32xf32> to vector<8x32xf32>
    %293 = arith.addf %186, %291 : vector<8x32xf32>
    %294 = arith.addf %187, %292 : vector<8x32xf32>
    %cst_138 = arith.constant dense<0.000000e+00> : vector<8x4xf32>
    %295 = tpu.matmul %293, %9, %cst_138 {dimension_numbers = #tpu.dot_dimension_numbers<[1], [0], [0], [1], [0, 0, 1, 1], [], []>} : vector<8x32xf32>, vector<32x4xf32>, vector<8x4xf32> -> vector<8x4xf32>
    %296 = vector.broadcast %10 : vector<1x4xf32> to vector<8x4xf32>
    %297 = arith.addf %295, %296 : vector<8x4xf32>
    %cst_139 = arith.constant dense<0.000000e+00> : vector<8x4xf32>
    %298 = tpu.matmul %294, %9, %cst_139 {dimension_numbers = #tpu.dot_dimension_numbers<[1], [0], [0], [1], [0, 0, 1, 1], [], []>} : vector<8x32xf32>, vector<32x4xf32>, vector<8x4xf32> -> vector<8x4xf32>
    %299 = vector.broadcast %10 : vector<1x4xf32> to vector<8x4xf32>
    %300 = arith.addf %298, %299 : vector<8x4xf32>
    %301 = vector.extract_strided_slice %287 {offsets = [15, 0], sizes = [1, 4], strides = [1, 1]} : vector<16x4xf32> to vector<1x4xf32>
    %302 = vector.broadcast %301 : vector<1x4xf32> to vector<8x4xf32>
    %303 = arith.addf %302, %297 : vector<8x4xf32>
    %304 = arith.addf %303, %300 : vector<8x4xf32>
    %c0_140 = arith.constant 0 : index
    %c0_141 = arith.constant 0 : index
    %c0_142 = arith.constant 0 : index
    %305 = vector.load %arg6[%c0_140, %c0_141, %c0_142] : memref<2x8x4xf32, #tpu.memory_space<vmem>>, vector<1x8x4xf32>
    %306 = vector.shape_cast %305 : vector<1x8x4xf32> to vector<8x4xf32>
    %307 = vector.shape_cast %304 : vector<8x4xf32> to vector<1x8x4xf32>
    tpu.vector_store %arg6[%c0_140, %c0_141, %c0_142], %307 {strides = array<i32>} : memref<2x8x4xf32, #tpu.memory_space<vmem>>, vector<1x8x4xf32>,
    %c1 = arith.constant 1 : index
    %c0_143 = arith.constant 0 : index
    %c0_144 = arith.constant 0 : index
    %308 = vector.load %arg1[%c1, %c0_143, %c0_144] : memref<2x16x4xf32, #tpu.memory_space<vmem>>, vector<1x16x4xf32>
    %309 = vector.shape_cast %308 : vector<1x16x4xf32> to vector<16x4xf32>
    %c1_145 = arith.constant 1 : index
    %c0_146 = arith.constant 0 : index
    %c0_147 = arith.constant 0 : index
    %310 = vector.load %arg2[%c1_145, %c0_146, %c0_147] : memref<2x16x1xf32, #tpu.memory_space<vmem>>, vector<1x16x1xf32>
    %311 = vector.shape_cast %310 : vector<1x16x1xf32> to vector<16x1xf32>
    %cst_148 = arith.constant dense<0.000000e+00> : vector<16x4xf32>
    %312 = tpu.matmul %0, %309, %cst_148 {dimension_numbers = #tpu.dot_dimension_numbers<[1], [0], [0], [1], [0, 0, 1, 1], [], []>} : vector<16x16xf32>, vector<16x4xf32>, vector<16x4xf32> -> vector<16x4xf32>
    %cst_149 = arith.constant dense<0.000000e+00> : vector<16x4xf32>
    %313 = tpu.matmul %1, %309, %cst_149 {dimension_numbers = #tpu.dot_dimension_numbers<[1], [0], [0], [1], [0, 0, 1, 1], [], []>} : vector<16x16xf32>, vector<16x4xf32>, vector<16x4xf32> -> vector<16x4xf32>
    %cst_150 = arith.constant dense<0.000000e+00> : vector<16x32xf32>
    %314 = tpu.matmul %312, %4, %cst_150 {dimension_numbers = #tpu.dot_dimension_numbers<[1], [0], [0], [1], [0, 0, 1, 1], [], []>} : vector<16x4xf32>, vector<4x32xf32>, vector<16x32xf32> -> vector<16x32xf32>
    %cst_151 = arith.constant dense<0.000000e+00> : vector<16x32xf32>
    %315 = tpu.matmul %309, %5, %cst_151 {dimension_numbers = #tpu.dot_dimension_numbers<[1], [0], [0], [1], [0, 0, 1, 1], [], []>} : vector<16x4xf32>, vector<4x32xf32>, vector<16x32xf32> -> vector<16x32xf32>
    %316 = arith.addf %314, %315 : vector<16x32xf32>
    %cst_152 = arith.constant dense<0.000000e+00> : vector<16x32xf32>
    %317 = tpu.matmul %313, %6, %cst_152 {dimension_numbers = #tpu.dot_dimension_numbers<[1], [0], [0], [1], [0, 0, 1, 1], [], []>} : vector<16x4xf32>, vector<4x32xf32>, vector<16x32xf32> -> vector<16x32xf32>
    %318 = arith.addf %316, %317 : vector<16x32xf32>
    %319 = vector.broadcast %311 : vector<16x1xf32> to vector<16x32xf32>
    %320 = vector.broadcast %7 : vector<1x32xf32> to vector<16x32xf32>
    %321 = arith.mulf %319, %320 : vector<16x32xf32>
    %322 = arith.addf %318, %321 : vector<16x32xf32>
    %323 = arith.addf %322, %8 : vector<16x32xf32>
    %cst_153 = arith.constant dense<0.000000e+00> : vector<16x32xf32>
    %324 = tpu.matmul %2, %323, %cst_153 {dimension_numbers = #tpu.dot_dimension_numbers<[1], [0], [0], [1], [0, 0, 1, 1], [], []>} : vector<16x16xf32>, vector<16x32xf32>, vector<16x32xf32> -> vector<16x32xf32>
    %325 = vector.extract_strided_slice %324 {offsets = [0, 0], sizes = [8, 32], strides = [1, 1]} : vector<16x32xf32> to vector<8x32xf32>
    %326 = vector.extract_strided_slice %324 {offsets = [8, 0], sizes = [8, 32], strides = [1, 1]} : vector<16x32xf32> to vector<8x32xf32>
    %327 = arith.mulf %325, %325 : vector<8x32xf32>
    %328 = arith.mulf %326, %326 : vector<8x32xf32>
    %329 = arith.addf %327, %328 : vector<8x32xf32>
    %330 = tpu.iota {dimensions = array<i32: 0>} : vector<8x32xi32>
    %331 = arith.sitofp %330 : vector<8x32xi32> to vector<8x32xf32>
    %c7_i32_154 = arith.constant 7 : i32
    %332 = vector.broadcast %c7_i32_154 : i32 to vector<8x32xi32>
    %333 = arith.cmpi slt, %330, %332 : vector<8x32xi32>
    %cst_155 = arith.constant -1.000000e+30 : f32
    %334 = vector.broadcast %cst_155 : f32 to vector<8x32xf32>
    %335 = arith.select %333, %329, %334 : vector<8x32xi1>, vector<8x32xf32>
    %cst_156 = arith.constant 0.000000e+00 : f32
    %336 = vector.broadcast %cst_156 : f32 to vector<8x32xf32>
    %cst_157 = arith.constant dense<0xFF800000> : vector<32xf32>
    %337 = vector.multi_reduction <maximumf>, %335, %cst_157 [0] : vector<8x32xf32> to vector<32xf32>
    %338 = vector.shape_cast %337 : vector<32xf32> to vector<1x32xf32>
    %339 = vector.broadcast %338 : vector<1x32xf32> to vector<8x32xf32>
    %340 = arith.cmpf oge, %335, %339 : vector<8x32xf32>
    %cst_158 = arith.constant 8.000000e+00 : f32
    %341 = vector.broadcast %cst_158 : f32 to vector<8x32xf32>
    %342 = arith.select %340, %331, %341 : vector<8x32xi1>, vector<8x32xf32>
    %cst_159 = arith.constant dense<0x7F800000> : vector<32xf32>
    %343 = vector.multi_reduction <minimumf>, %342, %cst_159 [0] : vector<8x32xf32> to vector<32xf32>
    %344 = vector.shape_cast %343 : vector<32xf32> to vector<1x32xf32>
    %345 = vector.broadcast %344 : vector<1x32xf32> to vector<8x32xf32>
    %346 = arith.cmpf oeq, %331, %345 : vector<8x32xf32>
    %347 = arith.extui %346 : vector<8x32xi1> to vector<8x32xi32>
    %348 = arith.sitofp %347 : vector<8x32xi32> to vector<8x32xf32>
    %349 = arith.addf %336, %348 : vector<8x32xf32>
    %cst_160 = arith.constant -1.000000e+30 : f32
    %350 = vector.broadcast %cst_160 : f32 to vector<8x32xf32>
    %351 = arith.select %346, %350, %335 : vector<8x32xi1>, vector<8x32xf32>
    %cst_161 = arith.constant dense<0xFF800000> : vector<32xf32>
    %352 = vector.multi_reduction <maximumf>, %351, %cst_161 [0] : vector<8x32xf32> to vector<32xf32>
    %353 = vector.shape_cast %352 : vector<32xf32> to vector<1x32xf32>
    %354 = vector.broadcast %353 : vector<1x32xf32> to vector<8x32xf32>
    %355 = arith.cmpf oge, %351, %354 : vector<8x32xf32>
    %cst_162 = arith.constant 8.000000e+00 : f32
    %356 = vector.broadcast %cst_162 : f32 to vector<8x32xf32>
    %357 = arith.select %355, %331, %356 : vector<8x32xi1>, vector<8x32xf32>
    %cst_163 = arith.constant dense<0x7F800000> : vector<32xf32>
    %358 = vector.multi_reduction <minimumf>, %357, %cst_163 [0] : vector<8x32xf32> to vector<32xf32>
    %359 = vector.shape_cast %358 : vector<32xf32> to vector<1x32xf32>
    %360 = vector.broadcast %359 : vector<1x32xf32> to vector<8x32xf32>
    %361 = arith.cmpf oeq, %331, %360 : vector<8x32xf32>
    %362 = arith.extui %361 : vector<8x32xi1> to vector<8x32xi32>
    %363 = arith.sitofp %362 : vector<8x32xi32> to vector<8x32xf32>
    %364 = arith.addf %349, %363 : vector<8x32xf32>
    %365 = tpu.concatenate %364, %364 in 0 : vector<8x32xf32>, vector<8x32xf32> -> vector<16x32xf32>
    %366 = arith.mulf %324, %365 : vector<16x32xf32>
    %cst_164 = arith.constant dense<0.000000e+00> : vector<24x32xf32>
    %367 = tpu.matmul %3, %366, %cst_164 {dimension_numbers = #tpu.dot_dimension_numbers<[1], [0], [0], [1], [0, 0, 1, 1], [], []>} : vector<24x16xf32>, vector<16x32xf32>, vector<24x32xf32> -> vector<24x32xf32>
    %cst_165 = arith.constant 1.250000e-01 : f32
    %368 = vector.broadcast %cst_165 : f32 to vector<24x32xf32>
    %369 = arith.mulf %367, %368 : vector<24x32xf32>
    %370 = vector.extract_strided_slice %369 {offsets = [0, 0], sizes = [16, 32], strides = [1, 1]} : vector<24x32xf32> to vector<16x32xf32>
    %371 = arith.subf %323, %370 : vector<16x32xf32>
    %c176_166 = arith.constant 176 : index
    %c0_167 = arith.constant 0 : index
    %372 = vector.load %arg3[%c176_166, %c0_167] : memref<672x32xf32, #tpu.memory_space<vmem>>, vector<16x32xf32>
    %c48_168 = arith.constant 48 : index
    %c0_169 = arith.constant 0 : index
    %373 = vector.load %arg3[%c48_168, %c0_169] : memref<672x32xf32, #tpu.memory_space<vmem>>, vector<32x32xf32>
    %cst_170 = arith.constant dense<0.000000e+00> : vector<16x32xf32>
    %374 = tpu.matmul %371, %373, %cst_170 {dimension_numbers = #tpu.dot_dimension_numbers<[1], [0], [0], [1], [0, 0, 1, 1], [], []>} : vector<16x32xf32>, vector<32x32xf32>, vector<16x32xf32> -> vector<16x32xf32>
    %c72_171 = arith.constant 72 : index
    %c0_172 = arith.constant 0 : index
    %375 = vector.load %arg4[%c72_171, %c0_172] : memref<200x16xf32, #tpu.memory_space<vmem>>, vector<16x16xf32>
    %cst_173 = arith.constant dense<0.000000e+00> : vector<16x32xf32>
    %376 = tpu.matmul %375, %374, %cst_173 {dimension_numbers = #tpu.dot_dimension_numbers<[1], [0], [0], [1], [0, 0, 1, 1], [], []>} : vector<16x16xf32>, vector<16x32xf32>, vector<16x32xf32> -> vector<16x32xf32>
    %377 = arith.addf %372, %376 : vector<16x32xf32>
    %c80_174 = arith.constant 80 : index
    %c0_175 = arith.constant 0 : index
    %378 = vector.load %arg3[%c80_174, %c0_175] : memref<672x32xf32, #tpu.memory_space<vmem>>, vector<32x32xf32>
    %cst_176 = arith.constant dense<0.000000e+00> : vector<16x32xf32>
    %379 = tpu.matmul %371, %378, %cst_176 {dimension_numbers = #tpu.dot_dimension_numbers<[1], [0], [0], [1], [0, 0, 1, 1], [], []>} : vector<16x32xf32>, vector<32x32xf32>, vector<16x32xf32> -> vector<16x32xf32>
    %c88_177 = arith.constant 88 : index
    %c0_178 = arith.constant 0 : index
    %380 = vector.load %arg4[%c88_177, %c0_178] : memref<200x16xf32, #tpu.memory_space<vmem>>, vector<16x16xf32>
    %cst_179 = arith.constant dense<0.000000e+00> : vector<16x32xf32>
    %381 = tpu.matmul %380, %379, %cst_179 {dimension_numbers = #tpu.dot_dimension_numbers<[1], [0], [0], [1], [0, 0, 1, 1], [], []>} : vector<16x16xf32>, vector<16x32xf32>, vector<16x32xf32> -> vector<16x32xf32>
    %382 = arith.addf %377, %381 : vector<16x32xf32>
    %c112_180 = arith.constant 112 : index
    %c0_181 = arith.constant 0 : index
    %383 = vector.load %arg3[%c112_180, %c0_181] : memref<672x32xf32, #tpu.memory_space<vmem>>, vector<32x32xf32>
    %cst_182 = arith.constant dense<0.000000e+00> : vector<16x32xf32>
    %384 = tpu.matmul %371, %383, %cst_182 {dimension_numbers = #tpu.dot_dimension_numbers<[1], [0], [0], [1], [0, 0, 1, 1], [], []>} : vector<16x32xf32>, vector<32x32xf32>, vector<16x32xf32> -> vector<16x32xf32>
    %c104_183 = arith.constant 104 : index
    %c0_184 = arith.constant 0 : index
    %385 = vector.load %arg4[%c104_183, %c0_184] : memref<200x16xf32, #tpu.memory_space<vmem>>, vector<16x16xf32>
    %cst_185 = arith.constant dense<0.000000e+00> : vector<16x32xf32>
    %386 = tpu.matmul %385, %384, %cst_185 {dimension_numbers = #tpu.dot_dimension_numbers<[1], [0], [0], [1], [0, 0, 1, 1], [], []>} : vector<16x16xf32>, vector<16x32xf32>, vector<16x32xf32> -> vector<16x32xf32>
    %387 = arith.addf %382, %386 : vector<16x32xf32>
    %c144_186 = arith.constant 144 : index
    %c0_187 = arith.constant 0 : index
    %388 = vector.load %arg3[%c144_186, %c0_187] : memref<672x32xf32, #tpu.memory_space<vmem>>, vector<32x32xf32>
    %cst_188 = arith.constant dense<0.000000e+00> : vector<16x32xf32>
    %389 = tpu.matmul %371, %388, %cst_188 {dimension_numbers = #tpu.dot_dimension_numbers<[1], [0], [0], [1], [0, 0, 1, 1], [], []>} : vector<16x32xf32>, vector<32x32xf32>, vector<16x32xf32> -> vector<16x32xf32>
    %c120_189 = arith.constant 120 : index
    %c0_190 = arith.constant 0 : index
    %390 = vector.load %arg4[%c120_189, %c0_190] : memref<200x16xf32, #tpu.memory_space<vmem>>, vector<16x16xf32>
    %cst_191 = arith.constant dense<0.000000e+00> : vector<16x32xf32>
    %391 = tpu.matmul %390, %389, %cst_191 {dimension_numbers = #tpu.dot_dimension_numbers<[1], [0], [0], [1], [0, 0, 1, 1], [], []>} : vector<16x16xf32>, vector<16x32xf32>, vector<16x32xf32> -> vector<16x32xf32>
    %392 = arith.addf %387, %391 : vector<16x32xf32>
    %393 = arith.subf %371, %392 : vector<16x32xf32>
    %c192_192 = arith.constant 192 : index
    %c0_193 = arith.constant 0 : index
    %394 = vector.load %arg3[%c192_192, %c0_193] : memref<672x32xf32, #tpu.memory_space<vmem>>, vector<1x32xf32>
    %c200_194 = arith.constant 200 : index
    %c0_195 = arith.constant 0 : index
    %395 = vector.load %arg3[%c200_194, %c0_195] : memref<672x32xf32, #tpu.memory_space<vmem>>, vector<1x32xf32>
    %cst_196 = arith.constant dense<0.000000e+00> : vector<16xf32>
    %396 = vector.multi_reduction <add>, %393, %cst_196 [1] : vector<16x32xf32> to vector<16xf32>
    %397 = vector.shape_cast %396 : vector<16xf32> to vector<16x1xf32>
    %cst_197 = arith.constant 3.200000e+01 : f32
    %398 = vector.broadcast %cst_197 : f32 to vector<16x1xf32>
    %399 = arith.divf %397, %398 : vector<16x1xf32>
    %400 = vector.broadcast %399 : vector<16x1xf32> to vector<16x32xf32>
    %401 = arith.subf %393, %400 : vector<16x32xf32>
    %402 = arith.mulf %401, %401 : vector<16x32xf32>
    %cst_198 = arith.constant dense<0.000000e+00> : vector<16xf32>
    %403 = vector.multi_reduction <add>, %402, %cst_198 [1] : vector<16x32xf32> to vector<16xf32>
    %404 = vector.shape_cast %403 : vector<16xf32> to vector<16x1xf32>
    %cst_199 = arith.constant 3.200000e+01 : f32
    %405 = vector.broadcast %cst_199 : f32 to vector<16x1xf32>
    %406 = arith.divf %404, %405 : vector<16x1xf32>
    %cst_200 = arith.constant 9.99999974E-6 : f32
    %407 = vector.broadcast %cst_200 : f32 to vector<16x1xf32>
    %408 = arith.addf %406, %407 : vector<16x1xf32>
    %409 = math.rsqrt %408 : vector<16x1xf32>
    %410 = vector.broadcast %409 : vector<16x1xf32> to vector<16x32xf32>
    %411 = arith.mulf %401, %410 : vector<16x32xf32>
    %412 = vector.broadcast %394 : vector<1x32xf32> to vector<16x32xf32>
    %413 = arith.mulf %411, %412 : vector<16x32xf32>
    %414 = vector.broadcast %395 : vector<1x32xf32> to vector<16x32xf32>
    %415 = arith.addf %413, %414 : vector<16x32xf32>
    %c224_201 = arith.constant 224 : index
    %c0_202 = arith.constant 0 : index
    %416 = vector.load %arg3[%c224_201, %c0_202] : memref<672x32xf32, #tpu.memory_space<vmem>>, vector<32x32xf32>
    %cst_203 = arith.constant dense<0.000000e+00> : vector<16x32xf32>
    %417 = tpu.matmul %415, %416, %cst_203 {dimension_numbers = #tpu.dot_dimension_numbers<[1], [0], [0], [1], [0, 0, 1, 1], [], []>} : vector<16x32xf32>, vector<32x32xf32>, vector<16x32xf32> -> vector<16x32xf32>
    %418 = arith.negf %417 : vector<16x32xf32>
    %419 = math.exp %418 : vector<16x32xf32>
    %cst_204 = arith.constant 1.000000e+00 : f32
    %420 = vector.broadcast %cst_204 : f32 to vector<16x32xf32>
    %421 = arith.addf %420, %419 : vector<16x32xf32>
    %422 = arith.divf %420, %421 : vector<16x32xf32>
    %c256_205 = arith.constant 256 : index
    %c0_206 = arith.constant 0 : index
    %423 = vector.load %arg3[%c256_205, %c0_206] : memref<672x32xf32, #tpu.memory_space<vmem>>, vector<32x32xf32>
    %cst_207 = arith.constant dense<0.000000e+00> : vector<16x32xf32>
    %424 = tpu.matmul %422, %423, %cst_207 {dimension_numbers = #tpu.dot_dimension_numbers<[1], [0], [0], [1], [0, 0, 1, 1], [], []>} : vector<16x32xf32>, vector<32x32xf32>, vector<16x32xf32> -> vector<16x32xf32>
    %425 = arith.addf %415, %424 : vector<16x32xf32>
    %c208_208 = arith.constant 208 : index
    %c0_209 = arith.constant 0 : index
    %426 = vector.load %arg3[%c208_208, %c0_209] : memref<672x32xf32, #tpu.memory_space<vmem>>, vector<1x32xf32>
    %c216_210 = arith.constant 216 : index
    %c0_211 = arith.constant 0 : index
    %427 = vector.load %arg3[%c216_210, %c0_211] : memref<672x32xf32, #tpu.memory_space<vmem>>, vector<1x32xf32>
    %cst_212 = arith.constant dense<0.000000e+00> : vector<16xf32>
    %428 = vector.multi_reduction <add>, %425, %cst_212 [1] : vector<16x32xf32> to vector<16xf32>
    %429 = vector.shape_cast %428 : vector<16xf32> to vector<16x1xf32>
    %cst_213 = arith.constant 3.200000e+01 : f32
    %430 = vector.broadcast %cst_213 : f32 to vector<16x1xf32>
    %431 = arith.divf %429, %430 : vector<16x1xf32>
    %432 = vector.broadcast %431 : vector<16x1xf32> to vector<16x32xf32>
    %433 = arith.subf %425, %432 : vector<16x32xf32>
    %434 = arith.mulf %433, %433 : vector<16x32xf32>
    %cst_214 = arith.constant dense<0.000000e+00> : vector<16xf32>
    %435 = vector.multi_reduction <add>, %434, %cst_214 [1] : vector<16x32xf32> to vector<16xf32>
    %436 = vector.shape_cast %435 : vector<16xf32> to vector<16x1xf32>
    %cst_215 = arith.constant 3.200000e+01 : f32
    %437 = vector.broadcast %cst_215 : f32 to vector<16x1xf32>
    %438 = arith.divf %436, %437 : vector<16x1xf32>
    %cst_216 = arith.constant 9.99999974E-6 : f32
    %439 = vector.broadcast %cst_216 : f32 to vector<16x1xf32>
    %440 = arith.addf %438, %439 : vector<16x1xf32>
    %441 = math.rsqrt %440 : vector<16x1xf32>
    %442 = vector.broadcast %441 : vector<16x1xf32> to vector<16x32xf32>
    %443 = arith.mulf %433, %442 : vector<16x32xf32>
    %444 = vector.broadcast %426 : vector<1x32xf32> to vector<16x32xf32>
    %445 = arith.mulf %443, %444 : vector<16x32xf32>
    %446 = vector.broadcast %427 : vector<1x32xf32> to vector<16x32xf32>
    %447 = arith.addf %445, %446 : vector<16x32xf32>
    %c48_217 = arith.constant 48 : index
    %c0_218 = arith.constant 0 : index
    %448 = vector.load %arg5[%c48_217, %c0_218] : memref<208x4xf32, #tpu.memory_space<vmem>>, vector<32x4xf32>
    %cst_219 = arith.constant dense<0.000000e+00> : vector<16x4xf32>
    %449 = tpu.matmul %370, %448, %cst_219 {dimension_numbers = #tpu.dot_dimension_numbers<[1], [0], [0], [1], [0, 0, 1, 1], [], []>} : vector<16x32xf32>, vector<32x4xf32>, vector<16x4xf32> -> vector<16x4xf32>
    %c80_220 = arith.constant 80 : index
    %c0_221 = arith.constant 0 : index
    %450 = vector.load %arg5[%c80_220, %c0_221] : memref<208x4xf32, #tpu.memory_space<vmem>>, vector<32x4xf32>
    %cst_222 = arith.constant dense<0.000000e+00> : vector<16x4xf32>
    %451 = tpu.matmul %392, %450, %cst_222 {dimension_numbers = #tpu.dot_dimension_numbers<[1], [0], [0], [1], [0, 0, 1, 1], [], []>} : vector<16x32xf32>, vector<32x4xf32>, vector<16x4xf32> -> vector<16x4xf32>
    %452 = arith.subf %309, %449 : vector<16x4xf32>
    %453 = tpu.concatenate %452, %451 in 0 : vector<16x4xf32>, vector<16x4xf32> -> vector<32x4xf32>
    %c112_223 = arith.constant 112 : index
    %c0_224 = arith.constant 0 : index
    %454 = vector.load %arg5[%c112_223, %c0_224] : memref<208x4xf32, #tpu.memory_space<vmem>>, vector<16x4xf32>
    %c288_225 = arith.constant 288 : index
    %c0_226 = arith.constant 0 : index
    %455 = vector.load %arg3[%c288_225, %c0_226] : memref<672x32xf32, #tpu.memory_space<vmem>>, vector<16x32xf32>
    %cst_227 = arith.constant dense<0.000000e+00> : vector<16x4xf32>
    %456 = tpu.matmul %455, %453, %cst_227 {dimension_numbers = #tpu.dot_dimension_numbers<[1], [0], [0], [1], [0, 0, 1, 1], [], []>} : vector<16x32xf32>, vector<32x4xf32>, vector<16x4xf32> -> vector<16x4xf32>
    %457 = vector.extract_strided_slice %11 {offsets = [0, 0], sizes = [1, 4], strides = [1, 1]} : vector<4x4xf32> to vector<1x4xf32>
    %458 = vector.broadcast %457 : vector<1x4xf32> to vector<16x4xf32>
    %459 = arith.mulf %456, %458 : vector<16x4xf32>
    %460 = arith.addf %454, %459 : vector<16x4xf32>
    %c304_228 = arith.constant 304 : index
    %c0_229 = arith.constant 0 : index
    %461 = vector.load %arg3[%c304_228, %c0_229] : memref<672x32xf32, #tpu.memory_space<vmem>>, vector<16x32xf32>
    %cst_230 = arith.constant dense<0.000000e+00> : vector<16x4xf32>
    %462 = tpu.matmul %461, %453, %cst_230 {dimension_numbers = #tpu.dot_dimension_numbers<[1], [0], [0], [1], [0, 0, 1, 1], [], []>} : vector<16x32xf32>, vector<32x4xf32>, vector<16x4xf32> -> vector<16x4xf32>
    %463 = vector.extract_strided_slice %11 {offsets = [1, 0], sizes = [1, 4], strides = [1, 1]} : vector<4x4xf32> to vector<1x4xf32>
    %464 = vector.broadcast %463 : vector<1x4xf32> to vector<16x4xf32>
    %465 = arith.mulf %462, %464 : vector<16x4xf32>
    %466 = arith.addf %460, %465 : vector<16x4xf32>
    %c320_231 = arith.constant 320 : index
    %c0_232 = arith.constant 0 : index
    %467 = vector.load %arg3[%c320_231, %c0_232] : memref<672x32xf32, #tpu.memory_space<vmem>>, vector<16x32xf32>
    %cst_233 = arith.constant dense<0.000000e+00> : vector<16x4xf32>
    %468 = tpu.matmul %467, %453, %cst_233 {dimension_numbers = #tpu.dot_dimension_numbers<[1], [0], [0], [1], [0, 0, 1, 1], [], []>} : vector<16x32xf32>, vector<32x4xf32>, vector<16x4xf32> -> vector<16x4xf32>
    %469 = vector.extract_strided_slice %11 {offsets = [2, 0], sizes = [1, 4], strides = [1, 1]} : vector<4x4xf32> to vector<1x4xf32>
    %470 = vector.broadcast %469 : vector<1x4xf32> to vector<16x4xf32>
    %471 = arith.mulf %468, %470 : vector<16x4xf32>
    %472 = arith.addf %466, %471 : vector<16x4xf32>
    %c336_234 = arith.constant 336 : index
    %c0_235 = arith.constant 0 : index
    %473 = vector.load %arg3[%c336_234, %c0_235] : memref<672x32xf32, #tpu.memory_space<vmem>>, vector<16x32xf32>
    %cst_236 = arith.constant dense<0.000000e+00> : vector<16x4xf32>
    %474 = tpu.matmul %473, %453, %cst_236 {dimension_numbers = #tpu.dot_dimension_numbers<[1], [0], [0], [1], [0, 0, 1, 1], [], []>} : vector<16x32xf32>, vector<32x4xf32>, vector<16x4xf32> -> vector<16x4xf32>
    %475 = vector.extract_strided_slice %11 {offsets = [3, 0], sizes = [1, 4], strides = [1, 1]} : vector<4x4xf32> to vector<1x4xf32>
    %476 = vector.broadcast %475 : vector<1x4xf32> to vector<16x4xf32>
    %477 = arith.mulf %474, %476 : vector<16x4xf32>
    %478 = arith.addf %472, %477 : vector<16x4xf32>
    %479 = vector.extract_strided_slice %392 {offsets = [15, 0], sizes = [1, 32], strides = [1, 1]} : vector<16x32xf32> to vector<1x32xf32>
    %c352_237 = arith.constant 352 : index
    %c0_238 = arith.constant 0 : index
    %480 = vector.load %arg3[%c352_237, %c0_238] : memref<672x32xf32, #tpu.memory_space<vmem>>, vector<8x32xf32>
    %481 = vector.broadcast %479 : vector<1x32xf32> to vector<8x32xf32>
    %482 = arith.mulf %481, %480 : vector<8x32xf32>
    %483 = vector.extract_strided_slice %369 {offsets = [16, 0], sizes = [8, 32], strides = [1, 1]} : vector<24x32xf32> to vector<8x32xf32>
    %cst_239 = arith.constant dense<0.000000e+00> : vector<16x32xf32>
    %484 = tpu.matmul %2, %447, %cst_239 {dimension_numbers = #tpu.dot_dimension_numbers<[1], [0], [0], [1], [0, 0, 1, 1], [], []>} : vector<16x16xf32>, vector<16x32xf32>, vector<16x32xf32> -> vector<16x32xf32>
    %485 = vector.extract_strided_slice %484 {offsets = [0, 0], sizes = [8, 32], strides = [1, 1]} : vector<16x32xf32> to vector<8x32xf32>
    %486 = vector.extract_strided_slice %484 {offsets = [8, 0], sizes = [8, 32], strides = [1, 1]} : vector<16x32xf32> to vector<8x32xf32>
    %487 = arith.mulf %485, %485 : vector<8x32xf32>
    %488 = arith.mulf %486, %486 : vector<8x32xf32>
    %489 = arith.addf %487, %488 : vector<8x32xf32>
    %490 = tpu.iota {dimensions = array<i32: 0>} : vector<8x32xi32>
    %491 = arith.sitofp %490 : vector<8x32xi32> to vector<8x32xf32>
    %c7_i32_240 = arith.constant 7 : i32
    %492 = vector.broadcast %c7_i32_240 : i32 to vector<8x32xi32>
    %493 = arith.cmpi slt, %490, %492 : vector<8x32xi32>
    %cst_241 = arith.constant -1.000000e+30 : f32
    %494 = vector.broadcast %cst_241 : f32 to vector<8x32xf32>
    %495 = arith.select %493, %489, %494 : vector<8x32xi1>, vector<8x32xf32>
    %cst_242 = arith.constant 0.000000e+00 : f32
    %496 = vector.broadcast %cst_242 : f32 to vector<8x32xf32>
    %cst_243 = arith.constant dense<0xFF800000> : vector<32xf32>
    %497 = vector.multi_reduction <maximumf>, %495, %cst_243 [0] : vector<8x32xf32> to vector<32xf32>
    %498 = vector.shape_cast %497 : vector<32xf32> to vector<1x32xf32>
    %499 = vector.broadcast %498 : vector<1x32xf32> to vector<8x32xf32>
    %500 = arith.cmpf oge, %495, %499 : vector<8x32xf32>
    %cst_244 = arith.constant 8.000000e+00 : f32
    %501 = vector.broadcast %cst_244 : f32 to vector<8x32xf32>
    %502 = arith.select %500, %491, %501 : vector<8x32xi1>, vector<8x32xf32>
    %cst_245 = arith.constant dense<0x7F800000> : vector<32xf32>
    %503 = vector.multi_reduction <minimumf>, %502, %cst_245 [0] : vector<8x32xf32> to vector<32xf32>
    %504 = vector.shape_cast %503 : vector<32xf32> to vector<1x32xf32>
    %505 = vector.broadcast %504 : vector<1x32xf32> to vector<8x32xf32>
    %506 = arith.cmpf oeq, %491, %505 : vector<8x32xf32>
    %507 = arith.extui %506 : vector<8x32xi1> to vector<8x32xi32>
    %508 = arith.sitofp %507 : vector<8x32xi32> to vector<8x32xf32>
    %509 = arith.addf %496, %508 : vector<8x32xf32>
    %cst_246 = arith.constant -1.000000e+30 : f32
    %510 = vector.broadcast %cst_246 : f32 to vector<8x32xf32>
    %511 = arith.select %506, %510, %495 : vector<8x32xi1>, vector<8x32xf32>
    %cst_247 = arith.constant dense<0xFF800000> : vector<32xf32>
    %512 = vector.multi_reduction <maximumf>, %511, %cst_247 [0] : vector<8x32xf32> to vector<32xf32>
    %513 = vector.shape_cast %512 : vector<32xf32> to vector<1x32xf32>
    %514 = vector.broadcast %513 : vector<1x32xf32> to vector<8x32xf32>
    %515 = arith.cmpf oge, %511, %514 : vector<8x32xf32>
    %cst_248 = arith.constant 8.000000e+00 : f32
    %516 = vector.broadcast %cst_248 : f32 to vector<8x32xf32>
    %517 = arith.select %515, %491, %516 : vector<8x32xi1>, vector<8x32xf32>
    %cst_249 = arith.constant dense<0x7F800000> : vector<32xf32>
    %518 = vector.multi_reduction <minimumf>, %517, %cst_249 [0] : vector<8x32xf32> to vector<32xf32>
    %519 = vector.shape_cast %518 : vector<32xf32> to vector<1x32xf32>
    %520 = vector.broadcast %519 : vector<1x32xf32> to vector<8x32xf32>
    %521 = arith.cmpf oeq, %491, %520 : vector<8x32xf32>
    %522 = arith.extui %521 : vector<8x32xi1> to vector<8x32xi32>
    %523 = arith.sitofp %522 : vector<8x32xi32> to vector<8x32xf32>
    %524 = arith.addf %509, %523 : vector<8x32xf32>
    %525 = tpu.concatenate %524, %524 in 0 : vector<8x32xf32>, vector<8x32xf32> -> vector<16x32xf32>
    %526 = arith.mulf %484, %525 : vector<16x32xf32>
    %cst_250 = arith.constant dense<0.000000e+00> : vector<24x32xf32>
    %527 = tpu.matmul %3, %526, %cst_250 {dimension_numbers = #tpu.dot_dimension_numbers<[1], [0], [0], [1], [0, 0, 1, 1], [], []>} : vector<24x16xf32>, vector<16x32xf32>, vector<24x32xf32> -> vector<24x32xf32>
    %cst_251 = arith.constant 1.250000e-01 : f32
    %528 = vector.broadcast %cst_251 : f32 to vector<24x32xf32>
    %529 = arith.mulf %527, %528 : vector<24x32xf32>
    %530 = vector.extract_strided_slice %529 {offsets = [0, 0], sizes = [16, 32], strides = [1, 1]} : vector<24x32xf32> to vector<16x32xf32>
    %531 = arith.subf %447, %530 : vector<16x32xf32>
    %c488_252 = arith.constant 488 : index
    %c0_253 = arith.constant 0 : index
    %532 = vector.load %arg3[%c488_252, %c0_253] : memref<672x32xf32, #tpu.memory_space<vmem>>, vector<16x32xf32>
    %c360_254 = arith.constant 360 : index
    %c0_255 = arith.constant 0 : index
    %533 = vector.load %arg3[%c360_254, %c0_255] : memref<672x32xf32, #tpu.memory_space<vmem>>, vector<32x32xf32>
    %cst_256 = arith.constant dense<0.000000e+00> : vector<16x32xf32>
    %534 = tpu.matmul %531, %533, %cst_256 {dimension_numbers = #tpu.dot_dimension_numbers<[1], [0], [0], [1], [0, 0, 1, 1], [], []>} : vector<16x32xf32>, vector<32x32xf32>, vector<16x32xf32> -> vector<16x32xf32>
    %c136_257 = arith.constant 136 : index
    %c0_258 = arith.constant 0 : index
    %535 = vector.load %arg4[%c136_257, %c0_258] : memref<200x16xf32, #tpu.memory_space<vmem>>, vector<16x16xf32>
    %cst_259 = arith.constant dense<0.000000e+00> : vector<16x32xf32>
    %536 = tpu.matmul %535, %534, %cst_259 {dimension_numbers = #tpu.dot_dimension_numbers<[1], [0], [0], [1], [0, 0, 1, 1], [], []>} : vector<16x16xf32>, vector<16x32xf32>, vector<16x32xf32> -> vector<16x32xf32>
    %537 = arith.addf %532, %536 : vector<16x32xf32>
    %c392_260 = arith.constant 392 : index
    %c0_261 = arith.constant 0 : index
    %538 = vector.load %arg3[%c392_260, %c0_261] : memref<672x32xf32, #tpu.memory_space<vmem>>, vector<32x32xf32>
    %cst_262 = arith.constant dense<0.000000e+00> : vector<16x32xf32>
    %539 = tpu.matmul %531, %538, %cst_262 {dimension_numbers = #tpu.dot_dimension_numbers<[1], [0], [0], [1], [0, 0, 1, 1], [], []>} : vector<16x32xf32>, vector<32x32xf32>, vector<16x32xf32> -> vector<16x32xf32>
    %c152_263 = arith.constant 152 : index
    %c0_264 = arith.constant 0 : index
    %540 = vector.load %arg4[%c152_263, %c0_264] : memref<200x16xf32, #tpu.memory_space<vmem>>, vector<16x16xf32>
    %cst_265 = arith.constant dense<0.000000e+00> : vector<16x32xf32>
    %541 = tpu.matmul %540, %539, %cst_265 {dimension_numbers = #tpu.dot_dimension_numbers<[1], [0], [0], [1], [0, 0, 1, 1], [], []>} : vector<16x16xf32>, vector<16x32xf32>, vector<16x32xf32> -> vector<16x32xf32>
    %542 = arith.addf %537, %541 : vector<16x32xf32>
    %c424_266 = arith.constant 424 : index
    %c0_267 = arith.constant 0 : index
    %543 = vector.load %arg3[%c424_266, %c0_267] : memref<672x32xf32, #tpu.memory_space<vmem>>, vector<32x32xf32>
    %cst_268 = arith.constant dense<0.000000e+00> : vector<16x32xf32>
    %544 = tpu.matmul %531, %543, %cst_268 {dimension_numbers = #tpu.dot_dimension_numbers<[1], [0], [0], [1], [0, 0, 1, 1], [], []>} : vector<16x32xf32>, vector<32x32xf32>, vector<16x32xf32> -> vector<16x32xf32>
    %c168_269 = arith.constant 168 : index
    %c0_270 = arith.constant 0 : index
    %545 = vector.load %arg4[%c168_269, %c0_270] : memref<200x16xf32, #tpu.memory_space<vmem>>, vector<16x16xf32>
    %cst_271 = arith.constant dense<0.000000e+00> : vector<16x32xf32>
    %546 = tpu.matmul %545, %544, %cst_271 {dimension_numbers = #tpu.dot_dimension_numbers<[1], [0], [0], [1], [0, 0, 1, 1], [], []>} : vector<16x16xf32>, vector<16x32xf32>, vector<16x32xf32> -> vector<16x32xf32>
    %547 = arith.addf %542, %546 : vector<16x32xf32>
    %c456_272 = arith.constant 456 : index
    %c0_273 = arith.constant 0 : index
    %548 = vector.load %arg3[%c456_272, %c0_273] : memref<672x32xf32, #tpu.memory_space<vmem>>, vector<32x32xf32>
    %cst_274 = arith.constant dense<0.000000e+00> : vector<16x32xf32>
    %549 = tpu.matmul %531, %548, %cst_274 {dimension_numbers = #tpu.dot_dimension_numbers<[1], [0], [0], [1], [0, 0, 1, 1], [], []>} : vector<16x32xf32>, vector<32x32xf32>, vector<16x32xf32> -> vector<16x32xf32>
    %c184_275 = arith.constant 184 : index
    %c0_276 = arith.constant 0 : index
    %550 = vector.load %arg4[%c184_275, %c0_276] : memref<200x16xf32, #tpu.memory_space<vmem>>, vector<16x16xf32>
    %cst_277 = arith.constant dense<0.000000e+00> : vector<16x32xf32>
    %551 = tpu.matmul %550, %549, %cst_277 {dimension_numbers = #tpu.dot_dimension_numbers<[1], [0], [0], [1], [0, 0, 1, 1], [], []>} : vector<16x16xf32>, vector<16x32xf32>, vector<16x32xf32> -> vector<16x32xf32>
    %552 = arith.addf %547, %551 : vector<16x32xf32>
    %c128_278 = arith.constant 128 : index
    %c0_279 = arith.constant 0 : index
    %553 = vector.load %arg5[%c128_278, %c0_279] : memref<208x4xf32, #tpu.memory_space<vmem>>, vector<32x4xf32>
    %cst_280 = arith.constant dense<0.000000e+00> : vector<16x4xf32>
    %554 = tpu.matmul %530, %553, %cst_280 {dimension_numbers = #tpu.dot_dimension_numbers<[1], [0], [0], [1], [0, 0, 1, 1], [], []>} : vector<16x32xf32>, vector<32x4xf32>, vector<16x4xf32> -> vector<16x4xf32>
    %c160_281 = arith.constant 160 : index
    %c0_282 = arith.constant 0 : index
    %555 = vector.load %arg5[%c160_281, %c0_282] : memref<208x4xf32, #tpu.memory_space<vmem>>, vector<32x4xf32>
    %cst_283 = arith.constant dense<0.000000e+00> : vector<16x4xf32>
    %556 = tpu.matmul %552, %555, %cst_283 {dimension_numbers = #tpu.dot_dimension_numbers<[1], [0], [0], [1], [0, 0, 1, 1], [], []>} : vector<16x32xf32>, vector<32x4xf32>, vector<16x4xf32> -> vector<16x4xf32>
    %557 = arith.subf %478, %554 : vector<16x4xf32>
    %558 = tpu.concatenate %557, %556 in 0 : vector<16x4xf32>, vector<16x4xf32> -> vector<32x4xf32>
    %c192_284 = arith.constant 192 : index
    %c0_285 = arith.constant 0 : index
    %559 = vector.load %arg5[%c192_284, %c0_285] : memref<208x4xf32, #tpu.memory_space<vmem>>, vector<16x4xf32>
    %c600_286 = arith.constant 600 : index
    %c0_287 = arith.constant 0 : index
    %560 = vector.load %arg3[%c600_286, %c0_287] : memref<672x32xf32, #tpu.memory_space<vmem>>, vector<16x32xf32>
    %cst_288 = arith.constant dense<0.000000e+00> : vector<16x4xf32>
    %561 = tpu.matmul %560, %558, %cst_288 {dimension_numbers = #tpu.dot_dimension_numbers<[1], [0], [0], [1], [0, 0, 1, 1], [], []>} : vector<16x32xf32>, vector<32x4xf32>, vector<16x4xf32> -> vector<16x4xf32>
    %562 = vector.extract_strided_slice %11 {offsets = [0, 0], sizes = [1, 4], strides = [1, 1]} : vector<4x4xf32> to vector<1x4xf32>
    %563 = vector.broadcast %562 : vector<1x4xf32> to vector<16x4xf32>
    %564 = arith.mulf %561, %563 : vector<16x4xf32>
    %565 = arith.addf %559, %564 : vector<16x4xf32>
    %c616_289 = arith.constant 616 : index
    %c0_290 = arith.constant 0 : index
    %566 = vector.load %arg3[%c616_289, %c0_290] : memref<672x32xf32, #tpu.memory_space<vmem>>, vector<16x32xf32>
    %cst_291 = arith.constant dense<0.000000e+00> : vector<16x4xf32>
    %567 = tpu.matmul %566, %558, %cst_291 {dimension_numbers = #tpu.dot_dimension_numbers<[1], [0], [0], [1], [0, 0, 1, 1], [], []>} : vector<16x32xf32>, vector<32x4xf32>, vector<16x4xf32> -> vector<16x4xf32>
    %568 = vector.extract_strided_slice %11 {offsets = [1, 0], sizes = [1, 4], strides = [1, 1]} : vector<4x4xf32> to vector<1x4xf32>
    %569 = vector.broadcast %568 : vector<1x4xf32> to vector<16x4xf32>
    %570 = arith.mulf %567, %569 : vector<16x4xf32>
    %571 = arith.addf %565, %570 : vector<16x4xf32>
    %c632_292 = arith.constant 632 : index
    %c0_293 = arith.constant 0 : index
    %572 = vector.load %arg3[%c632_292, %c0_293] : memref<672x32xf32, #tpu.memory_space<vmem>>, vector<16x32xf32>
    %cst_294 = arith.constant dense<0.000000e+00> : vector<16x4xf32>
    %573 = tpu.matmul %572, %558, %cst_294 {dimension_numbers = #tpu.dot_dimension_numbers<[1], [0], [0], [1], [0, 0, 1, 1], [], []>} : vector<16x32xf32>, vector<32x4xf32>, vector<16x4xf32> -> vector<16x4xf32>
    %574 = vector.extract_strided_slice %11 {offsets = [2, 0], sizes = [1, 4], strides = [1, 1]} : vector<4x4xf32> to vector<1x4xf32>
    %575 = vector.broadcast %574 : vector<1x4xf32> to vector<16x4xf32>
    %576 = arith.mulf %573, %575 : vector<16x4xf32>
    %577 = arith.addf %571, %576 : vector<16x4xf32>
    %c648_295 = arith.constant 648 : index
    %c0_296 = arith.constant 0 : index
    %578 = vector.load %arg3[%c648_295, %c0_296] : memref<672x32xf32, #tpu.memory_space<vmem>>, vector<16x32xf32>
    %cst_297 = arith.constant dense<0.000000e+00> : vector<16x4xf32>
    %579 = tpu.matmul %578, %558, %cst_297 {dimension_numbers = #tpu.dot_dimension_numbers<[1], [0], [0], [1], [0, 0, 1, 1], [], []>} : vector<16x32xf32>, vector<32x4xf32>, vector<16x4xf32> -> vector<16x4xf32>
    %580 = vector.extract_strided_slice %11 {offsets = [3, 0], sizes = [1, 4], strides = [1, 1]} : vector<4x4xf32> to vector<1x4xf32>
    %581 = vector.broadcast %580 : vector<1x4xf32> to vector<16x4xf32>
    %582 = arith.mulf %579, %581 : vector<16x4xf32>
    %583 = arith.addf %577, %582 : vector<16x4xf32>
    %584 = vector.extract_strided_slice %552 {offsets = [15, 0], sizes = [1, 32], strides = [1, 1]} : vector<16x32xf32> to vector<1x32xf32>
    %c664_298 = arith.constant 664 : index
    %c0_299 = arith.constant 0 : index
    %585 = vector.load %arg3[%c664_298, %c0_299] : memref<672x32xf32, #tpu.memory_space<vmem>>, vector<8x32xf32>
    %586 = vector.broadcast %584 : vector<1x32xf32> to vector<8x32xf32>
    %587 = arith.mulf %586, %585 : vector<8x32xf32>
    %588 = vector.extract_strided_slice %529 {offsets = [16, 0], sizes = [8, 32], strides = [1, 1]} : vector<24x32xf32> to vector<8x32xf32>
    %589 = arith.addf %482, %587 : vector<8x32xf32>
    %590 = arith.addf %483, %588 : vector<8x32xf32>
    %cst_300 = arith.constant dense<0.000000e+00> : vector<8x4xf32>
    %591 = tpu.matmul %589, %9, %cst_300 {dimension_numbers = #tpu.dot_dimension_numbers<[1], [0], [0], [1], [0, 0, 1, 1], [], []>} : vector<8x32xf32>, vector<32x4xf32>, vector<8x4xf32> -> vector<8x4xf32>
    %592 = vector.broadcast %10 : vector<1x4xf32> to vector<8x4xf32>
    %593 = arith.addf %591, %592 : vector<8x4xf32>
    %cst_301 = arith.constant dense<0.000000e+00> : vector<8x4xf32>
    %594 = tpu.matmul %590, %9, %cst_301 {dimension_numbers = #tpu.dot_dimension_numbers<[1], [0], [0], [1], [0, 0, 1, 1], [], []>} : vector<8x32xf32>, vector<32x4xf32>, vector<8x4xf32> -> vector<8x4xf32>
    %595 = vector.broadcast %10 : vector<1x4xf32> to vector<8x4xf32>
    %596 = arith.addf %594, %595 : vector<8x4xf32>
    %597 = vector.extract_strided_slice %583 {offsets = [15, 0], sizes = [1, 4], strides = [1, 1]} : vector<16x4xf32> to vector<1x4xf32>
    %598 = vector.broadcast %597 : vector<1x4xf32> to vector<8x4xf32>
    %599 = arith.addf %598, %593 : vector<8x4xf32>
    %600 = arith.addf %599, %596 : vector<8x4xf32>
    %c1_302 = arith.constant 1 : index
    %c0_303 = arith.constant 0 : index
    %c0_304 = arith.constant 0 : index
    %601 = vector.load %arg6[%c1_302, %c0_303, %c0_304] : memref<2x8x4xf32, #tpu.memory_space<vmem>>, vector<1x8x4xf32>
    %602 = vector.shape_cast %601 : vector<1x8x4xf32> to vector<8x4xf32>
    %603 = vector.shape_cast %600 : vector<8x4xf32> to vector<1x8x4xf32>
    tpu.vector_store %arg6[%c1_302, %c0_303, %c0_304], %603 {strides = array<i32>} : memref<2x8x4xf32, #tpu.memory_space<vmem>>, vector<1x8x4xf32>,
    return
  }
  func.func @transform_0(%arg0: i32) -> (i32, i32, i32) {
    %c0_i32 = arith.constant 0 : i32
    %c0_i32_0 = arith.constant 0 : i32
    %c0_i32_1 = arith.constant 0 : i32
    %c0_i32_2 = arith.constant 0 : i32
    return %c0_i32, %c0_i32_0, %c0_i32_1 : i32, i32, i32
  }
  func.func @transform_1(%arg0: i32) -> (i32, i32, i32) {
    %c0_i32 = arith.constant 0 : i32
    %c0_i32_0 = arith.constant 0 : i32
    %c0_i32_1 = arith.constant 0 : i32
    %c0_i32_2 = arith.constant 0 : i32
    return %c0_i32, %c0_i32_0, %c0_i32_1 : i32, i32, i32
  }
  func.func @transform_2(%arg0: i32) -> (i32, i32) {
    %c0_i32 = arith.constant 0 : i32
    %c0_i32_0 = arith.constant 0 : i32
    %c0_i32_1 = arith.constant 0 : i32
    return %c0_i32, %c0_i32_0 : i32, i32
  }
  func.func @transform_3(%arg0: i32) -> (i32, i32) {
    %c0_i32 = arith.constant 0 : i32
    %c0_i32_0 = arith.constant 0 : i32
    %c0_i32_1 = arith.constant 0 : i32
    return %c0_i32, %c0_i32_0 : i32, i32
  }
  func.func @transform_4(%arg0: i32) -> (i32, i32) {
    %c0_i32 = arith.constant 0 : i32
    %c0_i32_0 = arith.constant 0 : i32
    %c0_i32_1 = arith.constant 0 : i32
    return %c0_i32, %c0_i32_0 : i32, i32
  }
  func.func @transform_5(%arg0: i32) -> (i32, i32, i32) {
    %c0_i32 = arith.constant 0 : i32
    %c0_i32_0 = arith.constant 0 : i32
    %c0_i32_1 = arith.constant 0 : i32
    %c0_i32_2 = arith.constant 0 : i32
    return %c0_i32, %c0_i32_0, %c0_i32_1 : i32, i32, i32
  }
}

</mosaic_0001>

<bundles_post_ra>
// kernel: forward.1
= control target key start
LH: loop header
LB: loop body
LE: loop exit
PB: predicated region body
PF: predicated region fallthrough
CT: control target
= control target key end

     0   :  { %vm45_vm0 = vcmask 130048   ;;  %vm215_vm1 = vcmask 1043456   ;;  %vm208_vm2 = vcmask 31744   ;;  %v9339_v10 = vmov 0   ;;  %s10696_s0 = inlined_call_operand.vmem [shape: f32[2,16,4], index: 0, kind: input, shape index: {}]   ;;  %s10697_s3 = inlined_call_operand.vmem [shape: f32[200,16], index: 3, kind: input, shape index: {}]   ;;  %s10698_s2 = inlined_call_operand.vmem [shape: f32[672,32], index: 2, kind: input, shape index: {}]   ;;  %s10699_s1 = inlined_call_operand.vmem [shape: f32[2,16,1], index: 1, kind: input, shape index: {}]   ;;  %s10700_s4 = inlined_call_operand.vmem [shape: f32[208,4], index: 4, kind: input, shape index: {}]   ;;  %s10701_s5 = inlined_call_operand.vmem [shape: f32[2,8,4], index: 5, kind: output, shape index: {}]  }
   0x1   :  { %v9376_v0 = vld [vmem:[%s10696_s0] sm:$0xff]  ;;  %v9381_v1 = vld [vmem:[%s10696_s0 + $0x8] sm:$0xff]  ;;  %v22_v5 = vld [vmem:[%s10697_s3 + $0x10] sm:$0xff]  ;;  %9290 = vset.pattern.permute.xlu0 %v9339_v10  ;;  %9291 = vset.pattern.permute.xlu1 %v9339_v10  ;;  %v9340_v33 = vmov 0.0|0.0   ;;  %vm9341_vm3 = vmmov 0   ;;  %v9342_v34 = vmov 0.0   ;;  %v568_v35 = vlaneseq }
   0x2   :  { %v20_v2 = vld [vmem:[%s10697_s3] sm:$0xff]  ;;  %v8752_v3 = vpack.c.bf16 %v9381_v1, %v9376_v0  ;;  %v21_v4 = vld [vmem:[%s10697_s3 + $0x8] sm:$0xff]  ;;  %v23_v7 = vld [vmem:[%s10697_s3 + $0x18] sm:$0xff]  ;;  %vm573_vm5 = vcmask 261120  }
   0x3   :  { %7978 = vmatprep.mubr.msk.f32.mxu0 %vm45_vm0, %v20_v2  ;;  %v30_v6 = vld [vmem:[%s10698_s2 + $0x8] sm:$0xf]  ;;  %v29_v8 = vld [vmem:[%s10698_s2] sm:$0xf]  ;;  %v31_v9 = vld [vmem:[%s10698_s2 + $0x10] sm:$0xf] }
   0x4   :  { %8753 = vmatprep.subr.bf16.mxu0 %v8752_v3  ;;  %v43_v11 = vld [vmem:[%s10699_s1] sm:$0xff]  ;;  %v44_v12 = vld [vmem:[%s10699_s1 + $0x8] sm:$0xff]  ;;  %v7372_v19 = vld [vmem:[%s10698_s2 + $0x18] ss:$0 sm:$0xff]  ;;  %v9462_v36 = vshrl.u32 %v568_v35, 7 }
   0x5   :  { %8755 = vmatpush3.bf16.msra.mxu0 %v8752_v3  ;;  %466 = vperm.xlu0 %9290, %v43_v11   ;;  %v9433_v17 = vld [vmem:[%s10697_s3 + $0x20] sm:$0xff]  ;;  %v34_v23 = vld [vmem:[%s10698_s2 + $0x28] sm:$0xff] }
   0x6   :  { %8757 = vmatprep.subr.bf16.mxu0 %v8752_v3  ;;  %8007 = vmatprep.mubr.msk.f32.mxu1 %vm45_vm0, %v9433_v17  ;;  %v33_v26 = vld [vmem:[%s10698_s2 + $0x20] sm:$0xff]  ;;  %v9455_v32 = vld [vmem:[%s10697_s3 + $0x28] sm:$0xff]  ;;  %vm571_vm4 = vcmp.lt.s32.totalorder %v9462_v36, 7  ;;  %v9469_v49 = vcvt.s32.f32 %v9462_v36 }
   0x8   :  { %7979 = vmatmul.mubr.msk.f32.vlgmr.msra.gmra.mrb[0].mxu0 %vm45_vm0, %v21_v4 }
   0x9   :  { %8759 = vmatpush3.bf16.msra.mxu0 %v8752_v3  ;;  %7985 = vmatprep.mubr.msk.f32.mxu0 %vm45_vm0, %v22_v5 }
   0xa   :  { %7988 = vmatprep.subr.msk.mxu0 %vm215_vm1, %v30_v6  ;;  %471 = vperm.xlu0 %9290, %v44_v12  }
   0xc   :  { %7986 = vmatmul.mubr.msk.f32.vlgmr.msra.gmra.mrb[2].mxu0 %vm45_vm0, %v23_v7 }
   0xd   :  { %7989 = vmatpush3.msk.msra.mxu0 %vm215_vm1, %v30_v6  ;;  %7990 = vmatprep.mubr.msk.f32.mxu0 %vm208_vm2, %v9376_v0 }
   0xe   :  { %7993 = vmatprep.subr.msk.mxu0 %vm215_vm1, %v29_v8 }
  0x10   :  { %7991 = vmatmul.mubr.msk.f32.vlgmr.msra.gmra.mrb[4].mxu0 %vm208_vm2, %v9381_v1 }
  0x11   :  { %7994 = vmatpush3.msk.msra.mxu0 %vm215_vm1, %v29_v8 }
  0x12   :  { %7998 = vmatprep.subr.msk.mxu0 %vm215_vm1, %v31_v9 }
  0x84   :  { %v467_v18 = vpop.permute.xlu0 %466 }
  0x85   :  { %v478_v22 = vmul.f32 %v7372_v19, %v467_v18 }
  0x89   :  { %v472_v20 = vpop.permute.xlu0 %471 }
  0x8a   :  { %v479_v21 = vmul.f32 %v7372_v19, %v472_v20  ;;  %v9487_v20 = vld [vmem:[%s10697_s3 + $0x30] sm:$0xff] }
  0xdb   :  { %v7980_v13 = vpop.f32.mrb[0].mxu0 }
  0xdc   :  { %v118_v14 = vpop.f32.mrb[1].mxu0 }
  0xdd   :  { %7995 = vmatprep.mubr.msk.f32.mxu0 %vm208_vm2, %v118_v14 }
  0xde   :  { %7996 = vmatmul.mubr.msk.f32.vlgmr.msra.gmra.mrb[4].mxu0 %vm208_vm2, %v7980_v13 }
  0xdf   :  { %v7987_v15 = vpop.f32.mrb[2].mxu0  ;;  %7999 = vmatpush3.msk.msra.mxu0 %vm215_vm1, %v31_v9 }
  0xe0   :  { %v199_v16 = vpop.f32.mrb[3].mxu0 }
  0xe1   :  { %8000 = vmatprep.mubr.msk.f32.mxu0 %vm208_vm2, %v199_v16 }
  0xe6   :  { %8001 = vmatmul.mubr.msk.f32.vlgmr.msra.gmra.mrb[4].mxu0 %vm208_vm2, %v7987_v15 }
 0x1b9   :  { %v8002_v24 = vpop.f32.mrb[4].mxu0 }
 0x1ba   :  { %v481_v25 = vadd.f32 %v8002_v24, %v479_v21  ;;  %v453_v27 = vpop.f32.mrb[5].mxu0  ;;  %v9496_v21 = vld [vmem:[%s10697_s3 + $0x38] sm:$0xff] }
 0x1bb   :  { %v480_v28 = vadd.f32 %v478_v22, %v453_v27  ;;  %v713_v22 = vld [vmem:[%s10698_s2 + $0x30] sm:$0xff] }
 0x1bc   :  { %v9446_v29 = vadd.f32 %v481_v25, %v34_v23  ;;  %v714_v23 = vld [vmem:[%s10698_s2 + $0x38] sm:$0xff]  ;;  %v715_v25 = vld [vmem:[%s10698_s2 + $0x40] sm:$0xff] }
 0x1bd   :  { %v9448_v30 = vadd.f32 %v480_v28, %v33_v26  ;;  %v8767_v24 = vpack.c.bf16 %v714_v23, %v713_v22  ;;  %v716_v26 = vld [vmem:[%s10698_s2 + $0x48] sm:$0xff]  ;;  %v883_v28 = vld [vmem:[%s10698_s2 + $0x50] sm:$0xff]  ;;  %v1291_v22 = vld [vmem:[%s10697_s3 + $0x80] sm:$0xff] }
 0x1be   :  { %v8771_v27 = vpack.c.bf16 %v716_v26, %v715_v25  ;;  %v712_v23 = vld [vmem:[%s10698_s2 + $0xb8] sm:$0xff] }
 0x1bf   :  { %v8760_v31 = vpack.c.bf16 %v9446_v29, %v9448_v30  ;;  %8768 = vmatprep.subr.bf16.mxu0 %v8767_v24 }
 0x1c0   :  { %8770 = vmatpush3.bf16.msra.mxu0 %v8767_v24  ;;  %v711_v24 = vld [vmem:[%s10698_s2 + $0xb0] sm:$0xff] }
 0x1c1   :  { %8761 = vmatprep.subr.bf16.mxu1 %v8760_v31  ;;  %8772 = vmatprep.subr.bf16.mxu0 %v8771_v27 }
 0x1c2   :  { %8763 = vmatpush3.bf16.msra.mxu1 %v8760_v31  ;;  %v884_v31 = vld [vmem:[%s10698_s2 + $0x58] sm:$0xff] }
 0x1c3   :  { %8764 = vmatprep.subr.bf16.mxu1 %v9340_v33  ;;  %v8779_v35 = vpack.c.bf16 %v884_v31, %v883_v28 }
 0x1c4   :  { %8774 = vmatpush3.bf16.msra.mxu0 %v8771_v27 }
 0x1c5   :  { %8008 = vmatmul.mubr.msk.f32.vlgmr.msra.gmra.mrb[0].mxu1 %vm45_vm0, %v9455_v32  ;;  %8780 = vmatprep.subr.bf16.mxu0 %v8779_v35 }
 0x1c6   :  { %8014 = vmatprep.mubr.msk.f32.mxu1 %vm9341_vm3, %v9342_v34 }
 0x298   :  { %v8009_v37 = vpop.f32.mrb[0].mxu1 }
 0x299   :  { %v566_v38 = vmul.f32 %v8009_v37, %v8009_v37  ;;  %v556_v39 = vpop.f32.mrb[1].mxu1 }
 0x29a   :  { %v565_v40 = vmul.f32 %v556_v39, %v556_v39 }
 0x29c   :  { %v567_v41 = vadd.f32 %v566_v38, %v565_v40 }
 0x29e   :  { %v572_v42 = vsel %vm571_vm4, %v567_v41, -1e+30 }
 0x29f   :  { %v574_v43 = vsel %vm573_vm5, %v572_v42, -inf }
 0x2a0   :  { %v575_v44 = vrot.slane %v574_v43, 4 }
 0x2a2   :  { %v576_v45 = vmax.f32 %v574_v43, %v575_v44  ;;  %v886_v43 = vld [vmem:[%s10698_s2 + $0x68] sm:$0xff] }
 0x2a4   :  { %v577_v46 = vrot.slane %v576_v45, 2 }
 0x2a6   :  { %v578_v47 = vmax.f32 %v576_v45, %v577_v46 }
 0x2a8   :  { %v579_v48 = vrot.slane %v578_v47, 1 }
 0x2aa   :  { %v580_v50 = vmax.f32 %v578_v47, %v579_v48  ;;  %v1211_v47 = vld [vmem:[%s10698_s2 + $0x90] sm:$0xff]  ;;  %v1212_v48 = vld [vmem:[%s10698_s2 + $0x98] sm:$0xff] }
 0x2ac   :  { %vm581_vm6 = vcmp.ge.f32.partialorder %v572_v42, %v580_v50  ;;  %v8803_v50 = vpack.c.bf16 %v1212_v48, %v1211_v47 }
 0x2ad   :  { %v582_v51 = vsel %vm581_vm6, %v9469_v49, 8.0 }
 0x2ae   :  { %v583_v52 = vsel %vm573_vm5, %v582_v51, inf  ;;  %v1214_v51 = vld [vmem:[%s10698_s2 + $0xa8] sm:$0xff] }
 0x2af   :  { %v584_v53 = vrot.slane %v583_v52, 4 }
 0x2b1   :  { %v585_v54 = vmin.f32 %v583_v52, %v584_v53  ;;  %v9565_v53 = vld [vmem:[%s10697_s3 + $0x40] sm:$0xff] }
 0x2b3   :  { %v586_v55 = vrot.slane %v585_v54, 2 }
 0x2b5   :  { %v587_v56 = vmin.f32 %v585_v54, %v586_v55  ;;  %v798_v54 = vld [vmem:[%s10697_s3 + $0x48] sm:$0xff] }
 0x2b7   :  { %v588_v57 = vrot.slane %v587_v56, 1 }
 0x2b9   :  { %v589_v58 = vmin.f32 %v587_v56, %v588_v57 }
 0x2bb   :  { %vm590_vm7 = vcmp.eq.f32.partialorder %v9469_v49, %v589_v58  ;;  %v799_v58 = vld [vmem:[%s10697_s3 + $0x50] sm:$0xff] }
 0x2bc   :  { %v594_v59 = vsel %vm590_vm7, -1e+30, %v572_v42  ;;  %v7375_v13 = vsel %vm590_vm7, 1.0, %v9342_v34  ;;  %v885_v42 = vld [vmem:[%s10698_s2 + $0x60] sm:$0xff] }
 0x2bd   :  { %v595_v60 = vsel %vm573_vm5, %v594_v59, -inf }
 0x2be   :  { %v596_v61 = vrot.slane %v595_v60, 4 }
 0x2c0   :  { %v597_v62 = vmax.f32 %v595_v60, %v596_v61  ;;  %v1047_v60 = vld [vmem:[%s10698_s2 + $0x70] sm:$0xff]  ;;  %v1048_v61 = vld [vmem:[%s10698_s2 + $0x78] sm:$0xff] }
 0x2c2   :  { %v598_v63 = vrot.slane %v597_v62, 2 }
 0x2c4   :  { %v599_v2 = vmax.f32 %v597_v62, %v598_v63 }
 0x2c6   :  { %v600_v3 = vrot.slane %v599_v2, 1 }
 0x2c8   :  { %v601_v4 = vmax.f32 %v599_v2, %v600_v3  ;;  %v8791_v3 = vpack.c.bf16 %v1048_v61, %v1047_v60 }
 0x2ca   :  { %vm602_vm8 = vcmp.ge.f32.partialorder %v594_v59, %v601_v4  ;;  %v962_v59 = vld [vmem:[%s10697_s3 + $0x58] sm:$0xff]  ;;  %v1049_v4 = vld [vmem:[%s10698_s2 + $0x80] sm:$0xff] }
 0x2cb   :  { %v603_v5 = vsel %vm602_vm8, %v9469_v49, 8.0 }
 0x2cc   :  { %v604_v6 = vsel %vm573_vm5, %v603_v5, inf  ;;  %v1050_v5 = vld [vmem:[%s10698_s2 + $0x88] sm:$0xff] }
 0x2cd   :  { %v605_v7 = vrot.slane %v604_v6, 4 }
 0x2cf   :  { %v606_v8 = vmin.f32 %v604_v6, %v605_v7  ;;  %v963_v6 = vld [vmem:[%s10697_s3 + $0x60] sm:$0xff]  ;;  %v8795_v7 = vpack.c.bf16 %v1050_v5, %v1049_v4 }
 0x2d1   :  { %v607_v9 = vrot.slane %v606_v8, 2 }
 0x2d3   :  { %v608_v10 = vmin.f32 %v606_v8, %v607_v9 }
 0x2d5   :  { %v609_v11 = vrot.slane %v608_v10, 1 }
 0x2d7   :  { %v610_v12 = vmin.f32 %v608_v10, %v609_v11 }
 0x2d9   :  { %vm611_vm9 = vcmp.eq.f32.partialorder %v9469_v49, %v610_v12 }
 0x2da   :  { %v7376_v14 = vsel %vm611_vm9, 1.0, %v9342_v34 }
 0x2db   :  { %v614_v15 = vadd.f32 %v7376_v14, %v7375_v13  ;;  %v1126_v13 = vld [vmem:[%s10697_s3 + $0x68] sm:$0xff] }
 0x2dd   :  { %v615_v16 = vmul.f32 %v614_v15, %v556_v39  ;;  %v616_v18 = vmul.f32 %v8009_v37, %v614_v15 }
 0x2df   :  { %v8765_v19 = vpack.c.bf16 %v616_v18, %v615_v16  ;;  %v1127_v18 = vld [vmem:[%s10697_s3 + $0x70] sm:$0xff] }
 0x2e1   :  { %8766 = vmatpush3.bf16.msra.mxu1 %v8765_v19  ;;  %v1290_v19 = vld [vmem:[%s10697_s3 + $0x78] sm:$0xff] }
 0x2e4   :  { %8015 = vmatmul.mubr.msk.f32.vlgmr.msra.gmra.mrb[2].mxu1 %vm45_vm0, %v9487_v20 }
 0x2e5   :  { %8017 = vmatprep.mubr.msk.f32.mxu1 %vm9341_vm3, %v9342_v34 }
 0x2e8   :  { %8018 = vmatmul.mubr.msk.f32.gmra.mrb[4].mxu1 %vm45_vm0, %v9496_v21 }
 0x2e9   :  { %8020 = vmatprep.mubr.msk.f32.mxu1 %vm9341_vm3, %v9342_v34 }
 0x2ec   :  { %8021 = vmatmul.mubr.msk.f32.gmra.mrb[6].mxu1 %vm45_vm0, %v9565_v53 }
 0x2ed   :  { %8038 = vmatprep.mubr.msk.f32.mxu1 %vm45_vm0, %v798_v54 }
 0x3b7   :  { %v692_v37 = vpop.f32.mrb[2].mxu1 }
 0x3b8   :  { %v9520_v38 = vmul.f32 0.125, %v692_v37  ;;  %v8016_v39 = vpop.f32.mrb[3].mxu1 }
 0x3ba   :  { %v9524_v40 = vsub.f32 %v9448_v30, %v9520_v38  ;;  %v8783_v30 = vpack.c.bf16 %v886_v43, %v885_v42 }
 0x3bb   :  { %v697_v41 = vpop.f32.mrb[4].mxu1 }
 0x3bc   :  { %v9532_v44 = vmul.f32 0.125, %v697_v41  ;;  %v8019_v45 = vpop.f32.mrb[5].mxu1  ;;  %8031 = vmatprep.mubr.msk.f32.mxu0 %vm573_vm5, %v9524_v40 }
 0x3be   :  { %v9538_v46 = vsub.f32 %v9446_v29, %v9532_v44  ;;  %v1213_v29 = vld [vmem:[%s10698_s2 + $0xa0] sm:$0xff] }
 0x3bf   :  { %v8807_v52 = vpack.c.bf16 %v1214_v51, %v1213_v29  ;;  %v9601_v11 = vpop.f32.mrb[6].mxu1  ;;  %v1418_v51 = vld [vmem:[%s10698_s2 + $0xe0] sm:$0xff] }
 0x3c0   :  { %8032 = vmatmul.mubr.msk.f32.vlgmr.msra.gmra.mrb[6].mxu0 %vm573_vm5, %v9538_v46  ;;  %v8022_v12 = vpop.f32.mrb[7].mxu1 }
 0x3c1   :  { %8782 = vmatpush3.bf16.msra.mxu0 %v8779_v35  ;;  %8049 = vmatprep.mubr.msk.f32.mxu0 %vm573_vm5, %v9524_v40 }
 0x3c2   :  { %8784 = vmatprep.subr.bf16.mxu0 %v8783_v30 }
 0x3c5   :  { %8786 = vmatpush3.bf16.msra.mxu0 %v8783_v30 }
 0x3c6   :  { %8804 = vmatprep.subr.bf16.mxu0 %v8803_v50 }
 0x3c8   :  { %8050 = vmatmul.mubr.msk.f32.vlgmr.msra.gmra.mrb[8].mxu0 %vm573_vm5, %v9538_v46 }
 0x3c9   :  { %8806 = vmatpush3.bf16.msra.mxu0 %v8803_v50  ;;  %8085 = vmatprep.mubr.msk.f32.mxu0 %vm573_vm5, %v9524_v40 }
 0x3ca   :  { %8808 = vmatprep.subr.bf16.mxu0 %v8807_v52 }
 0x3cd   :  { %8810 = vmatpush3.bf16.msra.mxu0 %v8807_v52  ;;  %v1419_v52 = vld [vmem:[%s10698_s2 + $0xe8] sm:$0xff] }
 0x3ce   :  { %v8815_v54 = vpack.c.bf16 %v1419_v52, %v1418_v51  ;;  %v1729_v51 = vld [vmem:[%s10700_s4 + $0x60] sm:$0xff] }
 0x3d0   :  { %8086 = vmatmul.mubr.msk.f32.vlgmr.msra.gmra.mrb[10].mxu0 %vm573_vm5, %v9538_v46  ;;  %8816 = vmatprep.subr.bf16.mxu0 %v8815_v54 }
 0x3d1   :  { %8818 = vmatpush3.bf16.msra.mxu0 %v8815_v54 }
 0x493   :  { %v8033_v55 = vpop.f32.mrb[6].mxu0 }
 0x494   :  { %v789_v56 = vpop.f32.mrb[7].mxu0 }
 0x495   :  { %v8775_v57 = vpack.c.bf16 %v8033_v55, %v789_v56  ;;  %v1420_v55 = vld [vmem:[%s10698_s2 + $0xf0] sm:$0xff]  ;;  %v1421_v56 = vld [vmem:[%s10698_s2 + $0xf8] sm:$0xff] }
 0x497   :  { %8776 = vmatprep.subr.bf16.mxu1 %v8775_v57 }
 0x498   :  { %8778 = vmatpush3.bf16.msra.mxu1 %v8775_v57  ;;  %v8819_v57 = vpack.c.bf16 %v1421_v56, %v1420_v55  ;;  %v1816_v55 = vld [vmem:[%s10698_s2 + $0x120] sm:$0xff]  ;;  %v1907_v56 = vld [vmem:[%s10698_s2 + $0x130] sm:$0xff] }
 0x49a   :  { %8820 = vmatprep.subr.bf16.mxu0 %v8819_v57 }
 0x49b   :  { %v8051_v62 = vpop.f32.mrb[8].mxu0  ;;  %8039 = vmatmul.mubr.msk.f32.vlgmr.msra.gmra.mrb[8].mxu1 %vm45_vm0, %v799_v58  ;;  %8822 = vmatpush3.bf16.msra.mxu0 %v8819_v57  ;;  %v1642_v58 = vld [vmem:[%s10700_s4 + $0x30] sm:$0xff] }
 0x49c   :  { %v953_v63 = vpop.f32.mrb[9].mxu0  ;;  %8056 = vmatprep.mubr.msk.f32.mxu1 %vm45_vm0, %v962_v59  ;;  %v1643_v59 = vld [vmem:[%s10700_s4 + $0x38] sm:$0xff] }
 0x49d   :  { %v8787_v2 = vpack.c.bf16 %v8051_v62, %v953_v63  ;;  %v8831_v60 = vpack.c.bf16 %v1643_v59, %v1642_v58 }
 0x49f   :  { %8788 = vmatprep.subr.bf16.mxu1 %v8787_v2  ;;  %8832 = vmatprep.subr.bf16.mxu0 %v8831_v60 }
 0x4a0   :  { %8790 = vmatpush3.bf16.msra.mxu1 %v8787_v2 }
 0x4a1   :  { %8792 = vmatprep.subr.bf16.mxu1 %v8791_v3 }
 0x4a3   :  { %v8087_v8 = vpop.f32.mrb[10].mxu0  ;;  %8057 = vmatmul.mubr.msk.f32.vlgmr.msra.gmra.mrb[8].mxu1 %vm45_vm0, %v963_v6  ;;  %v7396_v6 = vld [vmem:[%s10698_s2 + $0xc0] ss:$0 sm:$0xff] }
 0x4a4   :  { %8794 = vmatpush3.bf16.msra.mxu1 %v8791_v3  ;;  %v1281_v9 = vpop.f32.mrb[11].mxu0  ;;  %8067 = vmatprep.mubr.msk.f32.mxu1 %vm573_vm5, %v9524_v40 }
 0x4a5   :  { %v8811_v10 = vpack.c.bf16 %v8087_v8, %v1281_v9  ;;  %8796 = vmatprep.subr.bf16.mxu1 %v8795_v7  ;;  %v7397_v8 = vld [vmem:[%s10698_s2 + $0xc8] ss:$0 sm:$0xff] }
 0x4a8   :  { %8798 = vmatpush3.bf16.msra.mxu1 %v8795_v7 }
 0x4ab   :  { %8068 = vmatmul.mubr.msk.f32.vlgmr.msra.gmra.mrb[10].mxu1 %vm573_vm5, %v9538_v46 }
 0x4ac   :  { %8074 = vmatprep.mubr.msk.f32.mxu1 %vm45_vm0, %v1126_v13 }
 0x57e   :  { %v8069_v14 = vpop.f32.mrb[10].mxu1 }
 0x57f   :  { %v1117_v15 = vpop.f32.mrb[11].mxu1 }
 0x580   :  { %v8799_v16 = vpack.c.bf16 %v8069_v14, %v1117_v15  ;;  %v1644_v14 = vld [vmem:[%s10700_s4 + $0x40] sm:$0xff]  ;;  %v1645_v15 = vld [vmem:[%s10700_s4 + $0x48] sm:$0xff] }
 0x582   :  { %8800 = vmatprep.subr.bf16.mxu1 %v8799_v16 }
 0x583   :  { %8802 = vmatpush3.bf16.msra.mxu1 %v8799_v16 }
 0x584   :  { %8812 = vmatprep.subr.bf16.mxu1 %v8811_v10 }
 0x586   :  { %8075 = vmatmul.mubr.msk.f32.vlgmr.msra.gmra.mrb[8].mxu1 %vm45_vm0, %v1127_v18 }
 0x587   :  { %8814 = vmatpush3.bf16.msra.mxu1 %v8811_v10  ;;  %8092 = vmatprep.mubr.msk.f32.mxu1 %vm45_vm0, %v1290_v19  ;;  %v8835_v19 = vpack.c.bf16 %v1645_v15, %v1644_v14 }
 0x58e   :  { %8093 = vmatmul.mubr.msk.f32.vlgmr.msra.gmra.mrb[8].mxu1 %vm45_vm0, %v1291_v22  ;;  %v1515_v22 = vld [vmem:[%s10698_s2 + $0x100] sm:$0xff] }
 0x661   :  { %v8094_v25 = vpop.f32.mrb[8].mxu1 }
 0x662   :  { %v1364_v26 = vpop.f32.mrb[9].mxu1  ;;  %v9625_v27 = vadd.f32 %v8094_v25, %v712_v23  ;;  %v1516_v23 = vld [vmem:[%s10698_s2 + $0x108] sm:$0xff] }
 0x663   :  { %v9627_v28 = vadd.f32 %v1364_v26, %v711_v24  ;;  %v1517_v24 = vld [vmem:[%s10698_s2 + $0x110] sm:$0xff]  ;;  %v8823_v25 = vpack.c.bf16 %v1516_v23, %v1515_v22  ;;  %v2090_v22 = vld [vmem:[%s10698_s2 + $0x158] sm:$0xff]  ;;  %v1901_v23 = vsub.s32 0, %v9462_v36 }
 0x664   :  { %v1376_v37 = vsub.f32 %v9538_v46, %v9625_v27  ;;  %v7459_v46 = vld [vmem:[%s10699_s1 + $0x18] sm:$0xff] }
 0x665   :  { %v1375_v31 = vsub.f32 %v9524_v40, %v9627_v28  ;;  %8824 = vmatprep.subr.bf16.mxu1 %v8823_v25 }
 0x666   :  { %v1382_v39 = vsel %vm573_vm5, %v1376_v37, 0.0  ;;  %8826 = vmatpush3.bf16.msra.mxu1 %v8823_v25  ;;  %v40_v25 = vld [vmem:[%s10700_s4 + $0x28] sm:$0xf] }
 0x667   :  { %v1379_v35 = vsel %vm573_vm5, %v1375_v31, 0.0 }
 0x668   :  { %1380 = vadd.xlane.f32.xlu1 %v1379_v35 }
 0x66c   :  { %1383 = vadd.xlane.f32.xlu1 %v1382_v39 }
 0x6f5   :  { %v1381_v41 = vpop.xlane.xlu1 %1380 }
 0x6f6   :  { %v1386_v42 = vmul.f32 0.03125, %v1381_v41 }
 0x6f8   :  { %v1388_v43 = vsub.f32 %v1375_v31, %v1386_v42  ;;  %v1728_v31 = vld [vmem:[%s10700_s4 + $0x58] sm:$0xff] }
 0x6f9   :  { %v1384_v45 = vpop.xlane.xlu1 %1383 }
 0x6fa   :  { %v1387_v30 = vmul.f32 0.03125, %v1384_v45  ;;  %v1390_v47 = vmul.f32 %v1388_v43, %v1388_v43 }
 0x6fc   :  { %v1389_v48 = vsub.f32 %v1376_v37, %v1387_v30  ;;  %v1392_v50 = vsel %vm573_vm5, %v1390_v47, 0.0 }
 0x6fd   :  { %1393 = vadd.xlane.f32.xlu0 %v1392_v50 }
 0x6fe   :  { %v1391_v40 = vmul.f32 %v1389_v48, %v1389_v48 }
 0x700   :  { %v1395_v29 = vsel %vm573_vm5, %v1391_v40, 0.0 }
 0x701   :  { %1396 = vadd.xlane.f32.xlu1 %v1395_v29 }
 0x713   :  { %4139 = vperm.xlu0 %9290, %v7459_v46  }
 0x78a   :  { %v1394_v61 = vpop.xlane.xlu0 %1393 }
 0x78b   :  { %v1398_v62 = vmul.f32 0.03125, %v1394_v61 }
 0x78d   :  { %v1400_v63 = vadd.f32 1e-05, %v1398_v62 }
 0x78e   :  { %v1397_v2 = vpop.xlane.xlu1 %1396 }
 0x78f   :  { %9292 = vrsqrt.f32 %v1400_v63  ;;  %v1399_v3 = vmul.f32 0.03125, %v1397_v2 }
 0x791   :  { %v1401_v4 = vadd.f32 1e-05, %v1399_v3  ;;  %v1817_v3 = vld [vmem:[%s10698_s2 + $0x128] sm:$0xff] }
 0x793   :  { %9294 = vrsqrt.f32 %v1401_v4  ;;  %v1908_v4 = vld [vmem:[%s10698_s2 + $0x138] sm:$0xff] }
 0x799   :  { %v9293_v5 = vpop.eup %9292 }
 0x79a   :  { %v1404_v7 = vmul.f32 %v9293_v5, %v1388_v43 }
 0x79c   :  { %v1410_v9 = vmul.f32 %v7396_v6, %v1404_v7 }
 0x79d   :  { %v9295_v10 = vpop.eup %9294 }
 0x79e   :  { %v1405_v12 = vmul.f32 %v9295_v10, %v1389_v48  ;;  %v9664_v13 = vadd.f32 %v7397_v8, %v1410_v9 }
 0x7a0   :  { %v1411_v16 = vmul.f32 %v7396_v6, %v1405_v12  ;;  %8103 = vmatprep.mubr.msk.f32.mxu0 %vm573_vm5, %v9664_v13 }
 0x7a2   :  { %v1417_v18 = vadd.f32 %v7397_v8, %v1411_v16  ;;  %v1998_v16 = vld [vmem:[%s10698_s2 + $0x140] sm:$0xff] }
 0x7a4   :  { %8104 = vmatmul.mubr.msk.f32.vlgmr.msra.gmra.mrb[12].mxu0 %vm573_vm5, %v1417_v18 }
 0x7a5   :  { %8834 = vmatpush3.bf16.msra.mxu0 %v8831_v60  ;;  %8125 = vmatprep.mubr.msk.f32.mxu0 %vm573_vm5, %v9520_v38  ;;  %v1518_v38 = vld [vmem:[%s10698_s2 + $0x118] sm:$0xff] }
 0x7a6   :  { %8836 = vmatprep.subr.bf16.mxu0 %v8835_v19  ;;  %v8827_v26 = vpack.c.bf16 %v1518_v38, %v1517_v24  ;;  %v1992_v24 = vsub.s32 1, %v9462_v36  ;;  %v9755_v38 = vrot.slane %v40_v25, %v1901_v23 }
 0x7a8   :  { %8828 = vmatprep.subr.bf16.mxu1 %v8827_v26 }
 0x7a9   :  { %8838 = vmatpush3.bf16.msra.mxu0 %v8835_v19  ;;  %8830 = vmatpush3.bf16.msra.mxu1 %v8827_v26  ;;  %v2089_v19 = vld [vmem:[%s10698_s2 + $0x150] sm:$0xff]  ;;  %v9757_v26 = vrot.slane %v40_v25, %v1992_v24 }
 0x7ac   :  { %8126 = vmatmul.mubr.msk.f32.vlgmr.msra.gmra.mrb[14].mxu0 %vm573_vm5, %v9532_v44  ;;  %v1727_v44 = vld [vmem:[%s10700_s4 + $0x50] sm:$0xff] }
 0x7ad   :  { %v8839_v35 = vpack.c.bf16 %v1728_v31, %v1727_v44  ;;  %8147 = vmatprep.mubr.msk.f32.mxu0 %vm573_vm5, %v1816_v55  ;;  %v1815_v44 = vld [vmem:[%s10700_s4 + $0x78] sm:$0xff]  ;;  %v7404_v55 = vld [vmem:[%s10698_s2 + $0xd0] ss:$0 sm:$0xff] }
 0x7af   :  { %8840 = vmatprep.subr.bf16.mxu1 %v8839_v35 }
 0x877   :  { %v8105_v37 = vpop.f32.mrb[12].mxu0 }
 0x878   :  { %v7401_v39 = vmul.f32 -1.442695, %v8105_v37  ;;  %v1494_v41 = vpop.f32.mrb[13].mxu0  ;;  %v1814_v37 = vld [vmem:[%s10700_s4 + $0x70] sm:$0xff] }
 0x879   :  { %v7400_v42 = vmul.f32 -1.442695, %v1494_v41 }
 0x87a   :  { %9296 = vpow2.f32 %v7401_v39 }
 0x87b   :  { %9298 = vpow2.f32 %v7400_v42 }
 0x87f   :  { %v8127_v43 = vpop.f32.mrb[14].mxu0 }
 0x880   :  { %v1813_v45 = vsub.f32 %v9381_v1, %v8127_v43  ;;  %v1718_v30 = vpop.f32.mrb[15].mxu0  ;;  %v1730_v1 = vld [vmem:[%s10700_s4 + $0x68] sm:$0xff] }
 0x881   :  { %v1812_v47 = vsub.f32 %v9376_v0, %v1718_v30  ;;  %v8843_v54 = vpack.c.bf16 %v1730_v1, %v1729_v51 }
 0x883   :  { %v8847_v48 = vpack.c.bf16 %v1813_v45, %v1812_v47 }
 0x884   :  { %v9297_v50 = vpop.eup %9296 }
 0x885   :  { %v9299_v40 = vpop.eup %9298  ;;  %v1510_v29 = vadd.f32 1.0, %v9297_v50  ;;  %8848 = vmatprep.subr.bf16.mxu0 %v8847_v48 }
 0x886   :  { %v1509_v46 = vadd.f32 1.0, %v9299_v40  ;;  %8850 = vmatpush3.bf16.msra.mxu0 %v8847_v48 }
 0x888   :  { %9300 = vrcp.f32 %v1509_v46 }
 0x889   :  { %9302 = vrcp.f32 %v1510_v29 }
 0x892   :  { %v9301_v52 = vpop.eup %9300 }
 0x893   :  { %v9303_v0 = vpop.eup %9302  ;;  %8114 = vmatprep.mubr.msk.f32.mxu1 %vm573_vm5, %v9301_v52 }
 0x894   :  { %8115 = vmatmul.mubr.msk.f32.vlgmr.msra.gmra.mrb[12].mxu1 %vm573_vm5, %v9303_v0 }
 0x895   :  { %8842 = vmatpush3.bf16.msra.mxu1 %v8839_v35  ;;  %8136 = vmatprep.mubr.msk.f32.mxu1 %vm573_vm5, %v9627_v28 }
 0x896   :  { %8844 = vmatprep.subr.bf16.mxu1 %v8843_v54 }
 0x899   :  { %8846 = vmatpush3.bf16.msra.mxu1 %v8843_v54 }
 0x89a   :  { %8856 = vmatprep.subr.bf16.mxu1 %v8847_v48 }
 0x89c   :  { %8137 = vmatmul.mubr.msk.f32.vlgmr.msra.gmra.mrb[14].mxu1 %vm573_vm5, %v9625_v27 }
 0x89d   :  { %8858 = vmatpush3.bf16.msra.mxu1 %v8847_v48  ;;  %8158 = vmatprep.mubr.msk.f32.mxu1 %vm573_vm5, %v1907_v56 }
 0x967   :  { %v8116_v28 = vpop.f32.mrb[12].mxu1 }
 0x968   :  { %v1591_v57 = vpop.f32.mrb[13].mxu1  ;;  %v1601_v59 = vadd.f32 %v8116_v28, %v1417_v18  ;;  %v1999_v18 = vld [vmem:[%s10698_s2 + $0x148] sm:$0xff] }
 0x969   :  { %v1600_v58 = vadd.f32 %v1591_v57, %v9664_v13 }
 0x96a   :  { %v1607_v62 = vsel %vm573_vm5, %v1601_v59, 0.0 }
 0x96b   :  { %v1604_v60 = vsel %vm573_vm5, %v1600_v58, 0.0 }
 0x96c   :  { %1605 = vadd.xlane.f32.xlu1 %v1604_v60 }
 0x96f   :  { %v8138_v61 = vpop.f32.mrb[14].mxu1 }
 0x970   :  { %v1803_v63 = vpop.f32.mrb[15].mxu1  ;;  %1608 = vadd.xlane.f32.xlu1 %v1607_v62 }
 0x971   :  { %v8851_v2 = vpack.c.bf16 %v8138_v61, %v1803_v63  ;;  %v2083_v63 = vsub.s32 2, %v9462_v36 }
 0x973   :  { %8852 = vmatprep.subr.bf16.mxu0 %v8851_v2  ;;  %8860 = vmatprep.subr.bf16.mxu1 %v8851_v2 }
 0x974   :  { %8854 = vmatpush3.bf16.msra.mxu0 %v8851_v2  ;;  %8862 = vmatpush3.bf16.msra.mxu1 %v8851_v2 }
 0x975   :  { %8864 = vmatprep.subr.bf16.mxu0 %v8847_v48  ;;  %8872 = vmatprep.subr.bf16.mxu1 %v8847_v48 }
 0x977   :  { %8148 = vmatmul.mubr.msk.f32.vlgmr.msra.gmra.mrb[16].mxu0 %vm573_vm5, %v1817_v3  ;;  %8159 = vmatmul.mubr.msk.f32.vlgmr.msra.gmra.mrb[16].mxu1 %vm573_vm5, %v1908_v4 }
 0x978   :  { %8866 = vmatpush3.bf16.msra.mxu0 %v8847_v48  ;;  %8874 = vmatpush3.bf16.msra.mxu1 %v8847_v48 }
 0x979   :  { %8868 = vmatprep.subr.bf16.mxu0 %v8851_v2  ;;  %8876 = vmatprep.subr.bf16.mxu1 %v8851_v2 }
 0x97a   :  { %8169 = vmatprep.mubr.msk.f32.mxu0 %vm573_vm5, %v1998_v16  ;;  %8180 = vmatprep.mubr.msk.f32.mxu1 %vm573_vm5, %v2089_v19 }
 0x97c   :  { %8870 = vmatpush3.bf16.msra.mxu0 %v8851_v2  ;;  %8878 = vmatpush3.bf16.msra.mxu1 %v8851_v2  ;;  %v9787_v2 = vrot.slane %v40_v25, %v2083_v63 }
 0x97f   :  { %8170 = vmatmul.mubr.msk.f32.vlgmr.msra.gmra.mrb[18].mxu0 %vm573_vm5, %v1999_v18  ;;  %8181 = vmatmul.mubr.msk.f32.vlgmr.msra.gmra.mrb[18].mxu1 %vm573_vm5, %v2090_v22 }
 0x980   :  { %8187 = vmatprep.mubr.msk.f32.mxu0 %vm45_vm0, %v9433_v17 }
 0x9f9   :  { %v1606_v5 = vpop.xlane.xlu1 %1605 }
 0x9fa   :  { %v1610_v6 = vmul.f32 0.03125, %v1606_v5 }
 0x9fc   :  { %v1612_v7 = vsub.f32 %v1600_v58, %v1610_v6  ;;  %v7405_v58 = vld [vmem:[%s10698_s2 + $0xd8] ss:$0 sm:$0xff] }
 0x9fd   :  { %v1609_v8 = vpop.xlane.xlu1 %1608 }
 0x9fe   :  { %v1611_v9 = vmul.f32 0.03125, %v1609_v8  ;;  %v1614_v10 = vmul.f32 %v1612_v7, %v1612_v7 }
 0xa00   :  { %v1613_v12 = vsub.f32 %v1601_v59, %v1611_v9  ;;  %v1616_v13 = vsel %vm573_vm5, %v1614_v10, 0.0 }
 0xa01   :  { %1617 = vadd.xlane.f32.xlu1 %v1616_v13 }
 0xa02   :  { %v1615_v14 = vmul.f32 %v1613_v12, %v1613_v12 }
 0xa04   :  { %v1619_v15 = vsel %vm573_vm5, %v1615_v14, 0.0 }
 0xa05   :  { %1620 = vadd.xlane.f32.xlu1 %v1619_v15 }
 0xa4a   :  { %v8149_v31 = vpop.f32.mrb[16].mxu0  ;;  %v8160_v35 = vpop.f32.mrb[16].mxu1 }
 0xa4b   :  { %v1904_v17 = vmul.f32 %v8149_v31, %v9755_v38  ;;  %v1890_v39 = vpop.f32.mrb[17].mxu0  ;;  %v1995_v41 = vmul.f32 %v8160_v35, %v9757_v26  ;;  %v1981_v42 = vpop.f32.mrb[17].mxu1 }
 0xa4c   :  { %v1903_v43 = vmul.f32 %v9755_v38, %v1890_v39  ;;  %v1994_v45 = vmul.f32 %v9757_v26, %v1981_v42 }
 0xa4d   :  { %v1906_v30 = vadd.f32 %v1904_v17, %v1815_v44 }
 0xa4e   :  { %v1905_v47 = vadd.f32 %v1903_v43, %v1814_v37 }
 0xa4f   :  { %v1997_v48 = vadd.f32 %v1995_v41, %v1906_v30 }
 0xa50   :  { %v1996_v50 = vadd.f32 %v1994_v45, %v1905_v47 }
 0xa52   :  { %v8171_v3 = vpop.f32.mrb[18].mxu0  ;;  %v8182_v4 = vpop.f32.mrb[18].mxu1 }
 0xa53   :  { %v2086_v5 = vmul.f32 %v8171_v3, %v9787_v2  ;;  %v2072_v6 = vpop.f32.mrb[19].mxu0 }
 0xa54   :  { %v2085_v8 = vmul.f32 %v9787_v2, %v2072_v6 }
 0xa55   :  { %v2088_v9 = vadd.f32 %v2086_v5, %v1997_v48 }
 0xa56   :  { %v2087_v10 = vadd.f32 %v2085_v8, %v1996_v50 }
 0xa8e   :  { %v1618_v40 = vpop.xlane.xlu1 %1617 }
 0xa8f   :  { %v1622_v29 = vmul.f32 0.03125, %v1618_v40 }
 0xa91   :  { %v1624_v46 = vadd.f32 1e-05, %v1622_v29 }
 0xa92   :  { %v1621_v51 = vpop.xlane.xlu1 %1620 }
 0xa93   :  { %9304 = vrsqrt.f32 %v1624_v46  ;;  %v1623_v1 = vmul.f32 0.03125, %v1621_v51 }
 0xa95   :  { %v1625_v52 = vadd.f32 1e-05, %v1623_v1 }
 0xa97   :  { %9306 = vrsqrt.f32 %v1625_v52 }
 0xa9d   :  { %v9305_v54 = vpop.eup %9304 }
 0xa9e   :  { %v1628_v0 = vmul.f32 %v9305_v54, %v1612_v7  ;;  %v2163_v7 = vpop.f32.mrb[19].mxu1 }
 0xaa0   :  { %v1634_v57 = vmul.f32 %v7404_v55, %v1628_v0 }
 0xaa1   :  { %v9307_v56 = vpop.eup %9306 }
 0xaa2   :  { %v1629_v28 = vmul.f32 %v9307_v56, %v1613_v12  ;;  %v9775_v60 = vadd.f32 %v7405_v58, %v1634_v57  ;;  %v2174_v12 = vsub.s32 3, %v9462_v36 }
 0xaa4   :  { %v1635_v59 = vmul.f32 %v7404_v55, %v1629_v28 }
 0xaa6   :  { %v9777_v61 = vadd.f32 %v7405_v58, %v1635_v59 }
 0xaa8   :  { %v8879_v62 = vpack.c.bf16 %v9777_v61, %v9775_v60 }
 0xaaa   :  { %8880 = vmatprep.subr.bf16.mxu0 %v8879_v62 }
 0xaab   :  { %8882 = vmatpush3.bf16.msra.mxu0 %v8879_v62 }
 0xaac   :  { %8883 = vmatprep.subr.bf16.mxu0 %v9340_v33 }
 0xaae   :  { %8188 = vmatmul.mubr.msk.f32.vlgmr.msra.gmra.mrb[20].mxu0 %vm45_vm0, %v9455_v32  ;;  %v9792_v32 = vrot.slane %v40_v25, %v2174_v12 }
 0xaaf   :  { %8194 = vmatprep.mubr.msk.f32.mxu0 %vm9341_vm3, %v9342_v34 }
 0xab0   :  { %v2177_v13 = vmul.f32 %v8182_v4, %v9792_v32  ;;  %v2176_v14 = vmul.f32 %v9792_v32, %v2163_v7 }
 0xab2   :  { %v9796_v15 = vadd.f32 %v2177_v13, %v2088_v9  ;;  %v9798_v16 = vadd.f32 %v2176_v14, %v2087_v10  ;;  %v2565_v10 = vld [vmem:[%s10698_s2 + $0x188] sm:$0xff] }
 0xab3   :  { %v2395_v13 = vld [vmem:[%s10698_s2 + $0x168] sm:$0xff] }
 0xb81   :  { %v8189_v18 = vpop.f32.mrb[20].mxu0 }
 0xb82   :  { %v2262_v19 = vmul.f32 %v8189_v18, %v8189_v18  ;;  %v2252_v22 = vpop.f32.mrb[21].mxu0 }
 0xb83   :  { %v2261_v23 = vmul.f32 %v2252_v22, %v2252_v22 }
 0xb85   :  { %v2263_v24 = vadd.f32 %v2262_v19, %v2261_v23  ;;  %v2398_v23 = vld [vmem:[%s10698_s2 + $0x180] sm:$0xff] }
 0xb87   :  { %v2264_v44 = vsel %vm571_vm4, %v2263_v24, -1e+30 }
 0xb88   :  { %v2265_v31 = vsel %vm573_vm5, %v2264_v44, -inf }
 0xb89   :  { %v2266_v25 = vrot.slane %v2265_v31, 4 }
 0xb8b   :  { %v2267_v35 = vmax.f32 %v2265_v31, %v2266_v25  ;;  %v2730_v31 = vld [vmem:[%s10698_s2 + $0x1b0] sm:$0xff] }
 0xb8d   :  { %v2268_v17 = vrot.slane %v2267_v35, 2 }
 0xb8f   :  { %v2269_v37 = vmax.f32 %v2267_v35, %v2268_v17 }
 0xb91   :  { %v2270_v39 = vrot.slane %v2269_v37, 1 }
 0xb93   :  { %v2271_v41 = vmax.f32 %v2269_v37, %v2270_v39 }
 0xb95   :  { %vm2272_vm10 = vcmp.ge.f32.partialorder %v2264_v44, %v2271_v41 }
 0xb96   :  { %v2273_v42 = vsel %vm2272_vm10, %v9469_v49, 8.0 }
 0xb97   :  { %v2274_v43 = vsel %vm573_vm5, %v2273_v42, inf  ;;  %v2731_v42 = vld [vmem:[%s10698_s2 + $0x1b8] sm:$0xff] }
 0xb98   :  { %v2275_v45 = vrot.slane %v2274_v43, 4 }
 0xb9a   :  { %v2276_v30 = vmin.f32 %v2274_v43, %v2275_v45  ;;  %v2732_v43 = vld [vmem:[%s10698_s2 + $0x1c0] sm:$0xff] }
 0xb9c   :  { %v2277_v47 = vrot.slane %v2276_v30, 2 }
 0xb9e   :  { %v2278_v48 = vmin.f32 %v2276_v30, %v2277_v47  ;;  %v8914_v47 = vpack.c.bf16 %v2732_v43, %v2731_v42  ;;  %v2394_v42 = vld [vmem:[%s10698_s2 + $0x1f0] sm:$0xff] }
 0xba0   :  { %v2279_v50 = vrot.slane %v2278_v48, 1 }
 0xba2   :  { %v2280_v40 = vmin.f32 %v2278_v48, %v2279_v50  ;;  %v3057_v50 = vld [vmem:[%s10700_s4 + $0x80] sm:$0xff] }
 0xba4   :  { %vm2281_vm11 = vcmp.eq.f32.partialorder %v9469_v49, %v2280_v40  ;;  %v3058_v40 = vld [vmem:[%s10700_s4 + $0x88] sm:$0xff] }
 0xba5   :  { %v2285_v29 = vsel %vm2281_vm11, -1e+30, %v2264_v44  ;;  %v7420_v4 = vsel %vm2281_vm11, 1.0, %v9342_v34  ;;  %v2729_v44 = vld [vmem:[%s10698_s2 + $0x1a8] sm:$0xff] }
 0xba6   :  { %v2286_v46 = vsel %vm573_vm5, %v2285_v29, -inf  ;;  %v8910_v25 = vpack.c.bf16 %v2730_v31, %v2729_v44  ;;  %v2896_v44 = vld [vmem:[%s10698_s2 + $0x1e0] sm:$0xff] }
 0xba7   :  { %v2287_v51 = vrot.slane %v2286_v46, 4 }
 0xba9   :  { %v2288_v1 = vmax.f32 %v2286_v46, %v2287_v51 }
 0xbab   :  { %v2289_v52 = vrot.slane %v2288_v1, 2 }
 0xbad   :  { %v2290_v54 = vmax.f32 %v2288_v1, %v2289_v52  ;;  %v8934_v1 = vpack.c.bf16 %v3058_v40, %v3057_v50  ;;  %v3060_v52 = vld [vmem:[%s10700_s4 + $0x98] sm:$0xff] }
 0xbaf   :  { %v2291_v0 = vrot.slane %v2290_v54, 1 }
 0xbb1   :  { %v2292_v55 = vmax.f32 %v2290_v54, %v2291_v0  ;;  %v2480_v0 = vld [vmem:[%s10697_s3 + $0x88] sm:$0xff] }
 0xbb3   :  { %vm2293_vm12 = vcmp.ge.f32.partialorder %v2285_v29, %v2292_v55  ;;  %v708_v29 = vmul.f32 0.125, %v9601_v11  ;;  %v3059_v11 = vld [vmem:[%s10700_s4 + $0x90] sm:$0xff]  ;;  %v3142_v55 = vld [vmem:[%s10700_s4 + $0xa0] sm:$0xff] }
 0xbb4   :  { %v2294_v56 = vsel %vm2293_vm12, %v9469_v49, 8.0  ;;  %v8938_v54 = vpack.c.bf16 %v3060_v52, %v3059_v11  ;;  %v9989_v11 = vld [vmem:[%s10696_s0 + $0x18] sm:$0xff] }
 0xbb5   :  { %v2295_v28 = vsel %vm573_vm5, %v2294_v56, inf  ;;  %v3143_v56 = vld [vmem:[%s10700_s4 + $0xa8] sm:$0xff]  ;;  %v3398_v52 = vld [vmem:[%s10698_s2 + $0x278] sm:$0xff] }
 0xbb6   :  { %v2296_v57 = vrot.slane %v2295_v28, 4 }
 0xbb8   :  { %v2297_v58 = vmin.f32 %v2295_v28, %v2296_v57  ;;  %v8942_v28 = vpack.c.bf16 %v3143_v56, %v3142_v55  ;;  %v3144_v57 = vld [vmem:[%s10700_s4 + $0xb0] sm:$0xff]  ;;  %v35_v55 = vld [vmem:[%s10700_s4] sm:$0xff]  ;;  %v36_v56 = vld [vmem:[%s10700_s4 + $0x8] sm:$0xff] }
 0xbba   :  { %v2298_v59 = vrot.slane %v2297_v58, 2 }
 0xbbc   :  { %v2299_v62 = vmin.f32 %v2297_v58, %v2298_v59  ;;  %v3145_v58 = vld [vmem:[%s10700_s4 + $0xb8] sm:$0xff] }
 0xbbd   :  { %v8946_v59 = vpack.c.bf16 %v3145_v58, %v3144_v57  ;;  %v3399_v57 = vld [vmem:[%s10698_s2 + $0x280] sm:$0xff]  ;;  %v3483_v58 = vld [vmem:[%s10698_s2 + $0x290] sm:$0xff] }
 0xbbe   :  { %v2300_v63 = vrot.slane %v2299_v62, 1 }
 0xbc0   :  { %v2301_v3 = vmin.f32 %v2299_v62, %v2300_v63 }
 0xbc2   :  { %vm2302_vm13 = vcmp.eq.f32.partialorder %v9469_v49, %v2301_v3 }
 0xbc3   :  { %v7421_v5 = vsel %vm2302_vm13, 1.0, %v9342_v34 }
 0xbc4   :  { %v2305_v6 = vadd.f32 %v7421_v5, %v7420_v4 }
 0xbc6   :  { %v2306_v7 = vmul.f32 %v2305_v6, %v2252_v22  ;;  %v2307_v8 = vmul.f32 %v8189_v18, %v2305_v6  ;;  %v2568_v18 = vld [vmem:[%s10698_s2 + $0x1a0] sm:$0xff]  ;;  %v2397_v22 = vld [vmem:[%s10698_s2 + $0x178] sm:$0xff] }
 0xbc7   :  { %v8890_v24 = vpack.c.bf16 %v2398_v23, %v2397_v22 }
 0xbc8   :  { %v8884_v9 = vpack.c.bf16 %v2307_v8, %v2306_v7  ;;  %v2481_v7 = vld [vmem:[%s10697_s3 + $0x90] sm:$0xff]  ;;  %v2644_v8 = vld [vmem:[%s10697_s3 + $0x98] sm:$0xff] }
 0xbca   :  { %8885 = vmatpush3.bf16.msra.mxu0 %v8884_v9 }
 0xbcd   :  { %8195 = vmatmul.mubr.msk.f32.vlgmr.msra.gmra.mrb[22].mxu0 %vm45_vm0, %v9487_v20  ;;  %v2566_v20 = vld [vmem:[%s10698_s2 + $0x190] sm:$0xff] }
 0xbce   :  { %8197 = vmatprep.mubr.msk.f32.mxu0 %vm9341_vm3, %v9342_v34  ;;  %v8898_v12 = vpack.c.bf16 %v2566_v20, %v2565_v10 }
 0xbd0   :  { %8899 = vmatprep.subr.bf16.mxu0 %v8898_v12 }
 0xbd1   :  { %8198 = vmatmul.mubr.msk.f32.gmra.mrb[24].mxu0 %vm45_vm0, %v9496_v21  ;;  %v2396_v21 = vld [vmem:[%s10698_s2 + $0x170] sm:$0xff] }
 0xbd2   :  { %8200 = vmatprep.mubr.msk.f32.mxu0 %vm9341_vm3, %v9342_v34  ;;  %v8886_v14 = vpack.c.bf16 %v2396_v21, %v2395_v13  ;;  %8901 = vmatpush3.bf16.msra.mxu0 %v8898_v12  ;;  %v2893_v12 = vld [vmem:[%s10698_s2 + $0x1c8] sm:$0xff]  ;;  %v2894_v13 = vld [vmem:[%s10698_s2 + $0x1d0] sm:$0xff]  ;;  %v2645_v21 = vld [vmem:[%s10697_s3 + $0xa0] sm:$0xff] }
 0xbd4   :  { %8887 = vmatprep.subr.bf16.mxu1 %v8886_v14 }
 0xbd5   :  { %8201 = vmatmul.mubr.msk.f32.gmra.mrb[26].mxu0 %vm45_vm0, %v9565_v53  ;;  %v2567_v53 = vld [vmem:[%s10698_s2 + $0x198] sm:$0xff]  ;;  %8889 = vmatpush3.bf16.msra.mxu1 %v8886_v14  ;;  %v2808_v14 = vld [vmem:[%s10697_s3 + $0xa8] sm:$0xff] }
 0xbd6   :  { %v8902_v19 = vpack.c.bf16 %v2568_v18, %v2567_v53  ;;  %8891 = vmatprep.subr.bf16.mxu1 %v8890_v24  ;;  %v8922_v53 = vpack.c.bf16 %v2894_v13, %v2893_v12  ;;  %v9326_v12 = vld [vmem:[%s10697_s3 + $0x10] sm:$0xff]  ;;  %v9327_v13 = vld [vmem:[%s10698_s2 + $0x8] sm:$0xf] }
 0xbd8   :  { %8903 = vmatprep.subr.bf16.mxu0 %v8902_v19 }
 0xbd9   :  { %8905 = vmatpush3.bf16.msra.mxu0 %v8902_v19  ;;  %8893 = vmatpush3.bf16.msra.mxu1 %v8890_v24  ;;  %v2895_v24 = vld [vmem:[%s10698_s2 + $0x1d8] sm:$0xff] }
 0xbda   :  { %8911 = vmatprep.subr.bf16.mxu0 %v8910_v25 }
 0xca0   :  { %v2374_v35 = vpop.f32.mrb[22].mxu0 }
 0xca1   :  { %v2388_v17 = vmul.f32 0.125, %v2374_v35  ;;  %v8196_v37 = vpop.f32.mrb[23].mxu0 }
 0xca3   :  { %v9857_v39 = vsub.f32 %v9775_v60, %v2388_v17 }
 0xca4   :  { %v2379_v41 = vpop.f32.mrb[24].mxu0 }
 0xca5   :  { %v2389_v45 = vmul.f32 0.125, %v2379_v41  ;;  %v8199_v30 = vpop.f32.mrb[25].mxu0  ;;  %8211 = vmatprep.mubr.msk.f32.mxu1 %vm573_vm5, %v9857_v39  ;;  %8229 = vmatprep.mubr.msk.f32.mxu0 %vm573_vm5, %v9857_v39  ;;  %v2393_v41 = vld [vmem:[%s10698_s2 + $0x1e8] sm:$0xff] }
 0xca7   :  { %v9870_v60 = vsub.f32 %v9777_v61, %v2389_v45 }
 0xca8   :  { %v2384_v48 = vpop.f32.mrb[26].mxu0 }
 0xca9   :  { %v2390_v46 = vmul.f32 0.125, %v2384_v48  ;;  %8212 = vmatmul.mubr.msk.f32.vlgmr.msra.gmra.mrb[20].mxu1 %vm573_vm5, %v9870_v60  ;;  %8230 = vmatmul.mubr.msk.f32.vlgmr.msra.gmra.mrb[28].mxu0 %vm573_vm5, %v9870_v60  ;;  %v8202_v61 = vpop.f32.mrb[27].mxu0  ;;  %v3314_v48 = vld [vmem:[%s10698_s2 + $0x268] sm:$0xff] }
 0xcaa   :  { %8913 = vmatpush3.bf16.msra.mxu0 %v8910_v25  ;;  %8247 = vmatprep.mubr.msk.f32.mxu0 %vm573_vm5, %v9857_v39  ;;  %v8926_v25 = vpack.c.bf16 %v2896_v44, %v2895_v24  ;;  %v3315_v61 = vld [vmem:[%s10698_s2 + $0x270] sm:$0xff] }
 0xcab   :  { %v9885_v51 = vadd.f32 %v2390_v46, %v708_v29  ;;  %8915 = vmatprep.subr.bf16.mxu0 %v8914_v47  ;;  %8218 = vmatprep.mubr.msk.f32.mxu1 %vm45_vm0, %v2480_v0  ;;  %v3231_v46 = vld [vmem:[%s10698_s2 + $0x260] sm:$0xff] }
 0xcae   :  { %8917 = vmatpush3.bf16.msra.mxu0 %v8914_v47  ;;  %v3230_v47 = vld [vmem:[%s10698_s2 + $0x258] sm:$0xff] }
 0xcaf   :  { %8935 = vmatprep.subr.bf16.mxu0 %v8934_v1 }
 0xcb1   :  { %8248 = vmatmul.mubr.msk.f32.vlgmr.msra.gmra.mrb[30].mxu0 %vm573_vm5, %v9870_v60 }
 0xcb2   :  { %8937 = vmatpush3.bf16.msra.mxu0 %v8934_v1  ;;  %8283 = vmatprep.mubr.msk.f32.mxu0 %vm573_vm5, %v2388_v17  ;;  %v9984_v1 = vld [vmem:[%s10696_s0 + $0x10] sm:$0xff] }
 0xcb3   :  { %8939 = vmatprep.subr.bf16.mxu0 %v8938_v54  ;;  %v8994_v0 = vpack.c.bf16 %v9989_v11, %v9984_v1 }
 0xcb6   :  { %8941 = vmatpush3.bf16.msra.mxu0 %v8938_v54  ;;  %v3482_v54 = vld [vmem:[%s10698_s2 + $0x288] sm:$0xff] }
 0xcb7   :  { %8943 = vmatprep.subr.bf16.mxu0 %v8942_v28 }
 0xcb9   :  { %8284 = vmatmul.mubr.msk.f32.vlgmr.msra.gmra.mrb[32].mxu0 %vm573_vm5, %v2389_v45 }
 0xcba   :  { %8945 = vmatpush3.bf16.msra.mxu0 %v8942_v28  ;;  %v10010_v28 = vsub.s32 7, %v9462_v36 }
 0xcbb   :  { %8947 = vmatprep.subr.bf16.mxu0 %v8946_v59 }
 0xcbe   :  { %8949 = vmatpush3.bf16.msra.mxu0 %v8946_v59  ;;  %v10018_v59 = vpack.c.bf16 %v36_v56, %v35_v55  ;;  %v4140_v55 = vpop.permute.xlu0 %4139  ;;  %v9332_v56 = vld [vmem:[%s10698_s2 + $0x18] ss:$0 sm:$0xff] }
 0xd7c   :  { %v8213_v62 = vpop.f32.mrb[20].mxu1  ;;  %v8231_v63 = vpop.f32.mrb[28].mxu0 }
 0xd7d   :  { %v2471_v3 = vpop.f32.mrb[21].mxu1  ;;  %v2635_v4 = vpop.f32.mrb[29].mxu0 }
 0xd7e   :  { %v8894_v5 = vpack.c.bf16 %v8213_v62, %v2471_v3  ;;  %v8906_v6 = vpack.c.bf16 %v8231_v63, %v2635_v4  ;;  %v37_v63 = vld [vmem:[%s10700_s4 + $0x10] sm:$0xff]  ;;  %v38_v3 = vld [vmem:[%s10700_s4 + $0x18] sm:$0xff] }
 0xd7f   :  { %v3566_v4 = vld [vmem:[%s10698_s2 + $0x298] sm:$0xff] }
 0xd80   :  { %8895 = vmatprep.subr.bf16.mxu1 %v8894_v5 }
 0xd81   :  { %8897 = vmatpush3.bf16.msra.mxu1 %v8894_v5  ;;  %v2184_v5 = vrot.slane %v9625_v27, %v10010_v28 }
 0xd82   :  { %8907 = vmatprep.subr.bf16.mxu1 %v8906_v6 }
 0xd84   :  { %v8249_v9 = vpop.f32.mrb[30].mxu0  ;;  %8219 = vmatmul.mubr.msk.f32.vlgmr.msra.gmra.mrb[22].mxu1 %vm45_vm0, %v2481_v7  ;;  %v10039_v7 = vpack.c.bf16 %v38_v3, %v37_v63 }
 0xd85   :  { %v2799_v10 = vpop.f32.mrb[31].mxu0  ;;  %8909 = vmatpush3.bf16.msra.mxu1 %v8906_v6  ;;  %8236 = vmatprep.mubr.msk.f32.mxu1 %vm45_vm0, %v2644_v8  ;;  %v2180_v6 = vld [vmem:[%s10698_s2 + $0x160] sm:$0xff] }
 0xd86   :  { %v8918_v20 = vpack.c.bf16 %v8249_v9, %v2799_v10  ;;  %v9324_v9 = vld [vmem:[%s10697_s3] sm:$0xff]  ;;  %v2185_v27 = vmul.f32 %v2184_v5, %v2180_v6  ;;  %v9325_v10 = vld [vmem:[%s10697_s3 + $0x8] sm:$0xff] }
 0xd87   :  { %v9333_v5 = vld [vmem:[%s10698_s2 + $0x28] sm:$0xff] }
 0xd88   :  { %8919 = vmatprep.subr.bf16.mxu1 %v8918_v20 }
 0xd8c   :  { %v8285_v18 = vpop.f32.mrb[32].mxu0  ;;  %8237 = vmatmul.mubr.msk.f32.vlgmr.msra.gmra.mrb[22].mxu1 %vm45_vm0, %v2645_v21  ;;  %v9328_v21 = vld [vmem:[%s10697_s3 + $0x18] sm:$0xff] }
 0xd8d   :  { %v3228_v19 = vsub.f32 %v9796_v15, %v8285_v18  ;;  %8921 = vmatpush3.bf16.msra.mxu1 %v8918_v20  ;;  %v3133_v22 = vpop.f32.mrb[33].mxu0  ;;  %8254 = vmatprep.mubr.msk.f32.mxu1 %vm45_vm0, %v2808_v14  ;;  %v2809_v15 = vld [vmem:[%s10697_s3 + $0xb0] sm:$0xff]  ;;  %v9329_v14 = vld [vmem:[%s10698_s2] sm:$0xf] }
 0xd8e   :  { %v3227_v23 = vsub.f32 %v9798_v16, %v3133_v22  ;;  %8923 = vmatprep.subr.bf16.mxu1 %v8922_v53  ;;  %v2972_v16 = vld [vmem:[%s10697_s3 + $0xb8] sm:$0xff]  ;;  %v10091_v18 = vld [vmem:[%s10697_s3 + $0x20] sm:$0xff]  ;;  %v3229_v22 = vld [vmem:[%s10700_s4 + $0xc8] sm:$0xff] }
 0xd90   :  { %v8950_v31 = vpack.c.bf16 %v3228_v19, %v3227_v23  ;;  %v7458_v19 = vld [vmem:[%s10699_s1 + $0x10] sm:$0xff] }
 0xd91   :  { %4134 = vperm.xlu1 %9291, %v7458_v19  }
 0xd92   :  { %8959 = vmatprep.subr.bf16.mxu0 %v8950_v31 }
 0xd94   :  { %8255 = vmatmul.mubr.msk.f32.vlgmr.msra.gmra.mrb[22].mxu1 %vm45_vm0, %v2809_v15 }
 0xd95   :  { %8925 = vmatpush3.bf16.msra.mxu1 %v8922_v53  ;;  %8265 = vmatprep.mubr.msk.f32.mxu1 %vm573_vm5, %v9857_v39  ;;  %v2973_v39 = vld [vmem:[%s10697_s3 + $0xc0] sm:$0xff]  ;;  %v9330_v53 = vld [vmem:[%s10698_s2 + $0x10] sm:$0xf] }
 0xd96   :  { %8927 = vmatprep.subr.bf16.mxu1 %v8926_v25 }
 0xd99   :  { %8929 = vmatpush3.bf16.msra.mxu1 %v8926_v25 }
 0xd9c   :  { %8266 = vmatmul.mubr.msk.f32.vlgmr.msra.gmra.mrb[24].mxu1 %vm573_vm5, %v9870_v60 }
 0xd9d   :  { %8272 = vmatprep.mubr.msk.f32.mxu1 %vm45_vm0, %v2972_v16 }
 0xe6f   :  { %v8267_v35 = vpop.f32.mrb[24].mxu1 }
 0xe70   :  { %v2963_v17 = vpop.f32.mrb[25].mxu1 }
 0xe71   :  { %v8930_v37 = vpack.c.bf16 %v8267_v35, %v2963_v17 }
 0xe73   :  { %8931 = vmatprep.subr.bf16.mxu1 %v8930_v37 }
 0xe74   :  { %8933 = vmatpush3.bf16.msra.mxu1 %v8930_v37 }
 0xe75   :  { %8951 = vmatprep.subr.bf16.mxu1 %v8950_v31 }
 0xe77   :  { %8273 = vmatmul.mubr.msk.f32.vlgmr.msra.gmra.mrb[22].mxu1 %vm45_vm0, %v2973_v39 }
 0xe78   :  { %8953 = vmatpush3.bf16.msra.mxu1 %v8950_v31  ;;  %8305 = vmatprep.mubr.msk.f32.mxu1 %vm573_vm5, %v3230_v47 }
 0xf4a   :  { %v8274_v43 = vpop.f32.mrb[22].mxu1 }
 0xf4b   :  { %v3046_v45 = vpop.f32.mrb[23].mxu1  ;;  %v9238_v60 = vadd.f32 %v8274_v43, %v2394_v42 }
 0xf4c   :  { %v9239_v30 = vadd.f32 %v3046_v45, %v2393_v41 }
 0xf4d   :  { %v3570_v62 = vrot.slane %v9238_v60, %v10010_v28 }
 0xf4e   :  { %8294 = vmatprep.mubr.msk.f32.mxu0 %vm573_vm5, %v9239_v30 }
 0xf4f   :  { %8295 = vmatmul.mubr.msk.f32.vlgmr.msra.gmra.mrb[34].mxu0 %vm573_vm5, %v9238_v60  ;;  %v3571_v8 = vmul.f32 %v3570_v62, %v3566_v4 }
 0xf50   :  { %8961 = vmatpush3.bf16.msra.mxu0 %v8950_v31  ;;  %8316 = vmatprep.mubr.msk.f32.mxu0 %vm573_vm5, %v3314_v48 }
 0xf51   :  { %v3572_v20 = vadd.f32 %v3571_v8, %v2185_v27  ;;  %v9334_v8 = vld [vmem:[%s10698_s2 + $0x20] sm:$0xff] }
0x1022   :  { %v8296_v50 = vpop.f32.mrb[34].mxu0 }
0x1023   :  { %v3218_v40 = vpop.f32.mrb[35].mxu0 }
0x1024   :  { %v8954_v29 = vpack.c.bf16 %v8296_v50, %v3218_v40  ;;  %v7453_v50 = vld [vmem:[%s10700_s4 + $0x20] ss:$0 sm:$0xff] }
0x1025   :  { %v10112_v40 = vadd.f32 %v7453_v50, %v7453_v50 }
0x1026   :  { %8955 = vmatprep.subr.bf16.mxu1 %v8954_v29  ;;  %8963 = vmatprep.subr.bf16.mxu0 %v8954_v29 }
0x1027   :  { %8957 = vmatpush3.bf16.msra.mxu1 %v8954_v29  ;;  %8965 = vmatpush3.bf16.msra.mxu0 %v8954_v29 }
0x1028   :  { %8967 = vmatprep.subr.bf16.mxu1 %v8950_v31  ;;  %8975 = vmatprep.subr.bf16.mxu0 %v8950_v31 }
0x102a   :  { %8306 = vmatmul.mubr.msk.f32.vlgmr.msra.gmra.mrb[26].mxu1 %vm573_vm5, %v3231_v46  ;;  %8317 = vmatmul.mubr.msk.f32.vlgmr.msra.gmra.mrb[36].mxu0 %vm573_vm5, %v3315_v61 }
0x102b   :  { %8969 = vmatpush3.bf16.msra.mxu1 %v8950_v31  ;;  %8977 = vmatpush3.bf16.msra.mxu0 %v8950_v31 }
0x102c   :  { %8971 = vmatprep.subr.bf16.mxu1 %v8954_v29  ;;  %8979 = vmatprep.subr.bf16.mxu0 %v8954_v29 }
0x102d   :  { %8327 = vmatprep.mubr.msk.f32.mxu1 %vm573_vm5, %v3398_v52  ;;  %8338 = vmatprep.mubr.msk.f32.mxu0 %vm573_vm5, %v3482_v54 }
0x102f   :  { %8973 = vmatpush3.bf16.msra.mxu1 %v8954_v29  ;;  %8981 = vmatpush3.bf16.msra.mxu0 %v8954_v29 }
0x1030   :  { %8982 = vmatprep.subr.bf16.mxu1 %v9340_v33  ;;  %8995 = vmatprep.subr.bf16.mxu0 %v8994_v0 }
0x1032   :  { %8328 = vmatmul.mubr.msk.f32.vlgmr.msra.gmra.mrb[28].mxu1 %vm573_vm5, %v3399_v57  ;;  %8339 = vmatmul.mubr.msk.f32.vlgmr.msra.gmra.mrb[38].mxu0 %vm573_vm5, %v3483_v58  ;;  %v4143_v58 = vmul.f32 %v9332_v56, %v4140_v55 }
0x1033   :  { %8984 = vmatpush3.bf16.msra.mxu1 %v10018_v59  ;;  %8997 = vmatpush3.bf16.msra.mxu0 %v8994_v0 }
0x1034   :  { %8367 = vmatprep.mubr.msk.f32.mxu0 %vm45_vm0, %v9324_v9  ;;  %8985 = vmatprep.subr.bf16.mxu1 %v9340_v33 }
0x1035   :  { %8349 = vmatprep.mubr.msk.f32.mxu1 %vm9341_vm3, %v9342_v34  ;;  %8999 = vmatprep.subr.bf16.mxu0 %v8994_v0 }
0x1036   :  { %8368 = vmatmul.mubr.msk.f32.vlgmr.msra.gmra.mrb[40].mxu0 %vm45_vm0, %v9325_v10  ;;  %v10140_v10 = vld [vmem:[%s10697_s3 + $0x28] sm:$0xff] }
0x1037   :  { %8987 = vmatpush3.bf16.msra.mxu1 %v10039_v7  ;;  %9001 = vmatpush3.bf16.msra.mxu0 %v8994_v0  ;;  %v4135_v0 = vpop.permute.xlu1 %4134 }
0x1038   :  { %8988 = vmatprep.subr.bf16.mxu1 %v9340_v33  ;;  %8374 = vmatprep.mubr.msk.f32.mxu0 %vm45_vm0, %v9326_v12  ;;  %v4142_v57 = vmul.f32 %v9332_v56, %v4135_v0 }
0x1039   :  { %8377 = vmatprep.subr.msk.mxu0 %vm215_vm1, %v9327_v13 }
0x103a   :  { %8350 = vmatmul.mubr.msk.f32.vlgmr.msra.gmra.mrb[30].mxu1 %vm573_vm5, %v3572_v20  ;;  %8375 = vmatmul.mubr.msk.f32.vlgmr.msra.gmra.mrb[42].mxu0 %vm45_vm0, %v9328_v21 }
0x103b   :  { %8990 = vmatpush3.bf16.msra.mxu1 %v10018_v59  ;;  %8360 = vmatprep.mubr.msk.f32.mxu1 %vm9341_vm3, %v9342_v34 }
0x103c   :  { %8991 = vmatprep.subr.bf16.mxu1 %v9340_v33  ;;  %8378 = vmatpush3.msk.msra.mxu0 %vm215_vm1, %v9327_v13 }
0x103d   :  { %8379 = vmatprep.mubr.msk.f32.mxu0 %vm208_vm2, %v9984_v1  ;;  %8382 = vmatprep.subr.msk.mxu0 %vm215_vm1, %v9329_v14 }
0x103e   :  { %8380 = vmatmul.mubr.msk.f32.vlgmr.msra.gmra.mrb[44].mxu0 %vm208_vm2, %v9989_v11 }
0x103f   :  { %8993 = vmatpush3.bf16.msra.mxu1 %v10039_v7  ;;  %8383 = vmatpush3.msk.msra.mxu0 %vm215_vm1, %v9329_v14 }
0x1040   :  { %8387 = vmatprep.subr.msk.mxu0 %vm215_vm1, %v9330_v53 }
0x1042   :  { %8361 = vmatmul.mubr.msk.f32.vlgmr.msra.gmra.mrb[30].mxu1 %vm573_vm5, %v9885_v51 }
0x1043   :  { %8396 = vmatprep.mubr.msk.f32.mxu1 %vm45_vm0, %v10091_v18 }
0x10fd   :  { %v8307_v23 = vpop.f32.mrb[26].mxu1  ;;  %v8318_v24 = vpop.f32.mrb[36].mxu0 }
0x10fe   :  { %v3312_v51 = vmul.f32 %v8307_v23, %v9755_v38  ;;  %v3396_v44 = vmul.f32 %v8318_v24, %v9757_v26  ;;  %v3388_v31 = vpop.f32.mrb[37].mxu0  ;;  %v3304_v15 = vpop.f32.mrb[27].mxu1 }
0x1100   :  { %v3313_v25 = vadd.f32 %v3312_v51, %v3229_v22 }
0x1102   :  { %v3397_v16 = vadd.f32 %v3396_v44, %v3313_v25 }
0x1105   :  { %v8329_v35 = vpop.f32.mrb[28].mxu1  ;;  %v8340_v17 = vpop.f32.mrb[38].mxu0 }
0x1106   :  { %v3480_v37 = vmul.f32 %v8329_v35, %v9787_v2  ;;  %v3556_v39 = vpop.f32.mrb[39].mxu0  ;;  %v3472_v41 = vpop.f32.mrb[29].mxu1  ;;  %v3564_v43 = vmul.f32 %v8340_v17, %v9792_v32 }
0x1108   :  { %v3481_v42 = vadd.f32 %v3480_v37, %v3397_v16 }
0x1109   :  { %v8369_v45 = vpop.f32.mrb[40].mxu0 }
0x110a   :  { %v3565_v30 = vadd.f32 %v3564_v43, %v3481_v42  ;;  %v3803_v60 = vpop.f32.mrb[41].mxu0 }
0x110b   :  { %8384 = vmatprep.mubr.msk.f32.mxu0 %vm208_vm2, %v3803_v60 }
0x110c   :  { %8385 = vmatmul.mubr.msk.f32.vlgmr.msra.gmra.mrb[44].mxu0 %vm208_vm2, %v8369_v45  ;;  %v3727_v46 = vrot.slane %v3565_v30, %v10010_v28 }
0x110d   :  { %v8376_v47 = vpop.f32.mrb[42].mxu0  ;;  %8388 = vmatpush3.msk.msra.mxu0 %vm215_vm1, %v9330_v53 }
0x110e   :  { %v3878_v48 = vpop.f32.mrb[43].mxu0 }
0x110f   :  { %8389 = vmatprep.mubr.msk.f32.mxu0 %vm208_vm2, %v3878_v48 }
0x1114   :  { %8390 = vmatmul.mubr.msk.f32.vlgmr.msra.gmra.mrb[44].mxu0 %vm208_vm2, %v8376_v47 }
0x1115   :  { %v3720_v29 = vpop.f32.mrb[30].mxu1 }
0x1116   :  { %v9241_v61 = vadd.f32 %v10112_v40, %v3720_v29  ;;  %v8362_v52 = vpop.f32.mrb[31].mxu1 }
0x1118   :  { %v9242_v54 = vadd.f32 %v9241_v61, %v3727_v46 }
0x111a   :  { %3730 = vst.msk [vmem:[%s10701_s5] sm:$0xff] %vm208_vm2, %v9242_v54 }
0x11e7   :  { %v8391_v62 = vpop.f32.mrb[44].mxu0 }
0x11e8   :  { %v4145_v63 = vadd.f32 %v8391_v62, %v4143_v58  ;;  %v4121_v3 = vpop.f32.mrb[45].mxu0 }
0x11e9   :  { %v4144_v4 = vadd.f32 %v4142_v57, %v4121_v3 }
0x11ea   :  { %v10127_v6 = vadd.f32 %v9333_v5, %v4145_v63  ;;  %v10165_v5 = vld [vmem:[%s10697_s3 + $0x30] sm:$0xff] }
0x11eb   :  { %v10132_v9 = vadd.f32 %v9334_v8, %v4144_v4  ;;  %v10174_v8 = vld [vmem:[%s10697_s3 + $0x38] sm:$0xff] }
0x11ed   :  { %v9002_v27 = vpack.c.bf16 %v10127_v6, %v10132_v9 }
0x11ef   :  { %9003 = vmatprep.subr.bf16.mxu1 %v9002_v27 }
0x11f0   :  { %9005 = vmatpush3.bf16.msra.mxu1 %v9002_v27  ;;  %v10183_v27 = vld [vmem:[%s10697_s3 + $0x40] sm:$0xff] }
0x11f1   :  { %9006 = vmatprep.subr.bf16.mxu1 %v9340_v33 }
0x11f3   :  { %8397 = vmatmul.mubr.msk.f32.vlgmr.msra.gmra.mrb[32].mxu1 %vm45_vm0, %v10140_v10 }
0x11f4   :  { %8403 = vmatprep.mubr.msk.f32.mxu1 %vm9341_vm3, %v9342_v34 }
0x12c6   :  { %v8398_v20 = vpop.f32.mrb[32].mxu1 }
0x12c7   :  { %v4224_v12 = vmul.f32 %v8398_v20, %v8398_v20  ;;  %v4214_v13 = vpop.f32.mrb[33].mxu1 }
0x12c8   :  { %v4223_v21 = vmul.f32 %v4214_v13, %v4214_v13 }
0x12ca   :  { %v4225_v14 = vadd.f32 %v4224_v12, %v4223_v21  ;;  %v4358_v12 = vld [vmem:[%s10698_s2 + $0x38] sm:$0xff]  ;;  %v4359_v21 = vld [vmem:[%s10698_s2 + $0x40] sm:$0xff] }
0x12cc   :  { %v4226_v53 = vsel %vm571_vm4, %v4225_v14, -1e+30  ;;  %v4360_v14 = vld [vmem:[%s10698_s2 + $0x48] sm:$0xff] }
0x12cd   :  { %v4227_v19 = vsel %vm573_vm5, %v4226_v53, -inf }
0x12ce   :  { %v4228_v22 = vrot.slane %v4227_v19, 4 }
0x12d0   :  { %v4229_v23 = vmax.f32 %v4227_v19, %v4228_v22  ;;  %v4527_v19 = vld [vmem:[%s10698_s2 + $0x50] sm:$0xff]  ;;  %v4528_v22 = vld [vmem:[%s10698_s2 + $0x58] sm:$0xff] }
0x12d2   :  { %v4230_v24 = vrot.slane %v4229_v23, 2 }
0x12d4   :  { %v4231_v51 = vmax.f32 %v4229_v23, %v4230_v24  ;;  %v9021_v23 = vpack.c.bf16 %v4528_v22, %v4527_v19  ;;  %v4771_v19 = vld [vmem:[%s10697_s3 + $0x70] sm:$0xff]  ;;  %v4934_v22 = vld [vmem:[%s10697_s3 + $0x78] sm:$0xff] }
0x12d6   :  { %v4232_v44 = vrot.slane %v4231_v51, 1 }
0x12d8   :  { %v4233_v31 = vmax.f32 %v4231_v51, %v4232_v44 }
0x12da   :  { %vm4234_vm14 = vcmp.ge.f32.partialorder %v4226_v53, %v4233_v31 }
0x12db   :  { %v4235_v15 = vsel %vm4234_vm14, %v9469_v49, 8.0 }
0x12dc   :  { %v4236_v25 = vsel %vm573_vm5, %v4235_v15, inf }
0x12dd   :  { %v4237_v16 = vrot.slane %v4236_v25, 4 }
0x12df   :  { %v4238_v35 = vmin.f32 %v4236_v25, %v4237_v16  ;;  %v4529_v25 = vld [vmem:[%s10698_s2 + $0x60] sm:$0xff]  ;;  %v4530_v16 = vld [vmem:[%s10698_s2 + $0x68] sm:$0xff] }
0x12e1   :  { %v4239_v17 = vrot.slane %v4238_v35, 2 }
0x12e3   :  { %v4240_v37 = vmin.f32 %v4238_v35, %v4239_v17 }
0x12e5   :  { %v4241_v39 = vrot.slane %v4240_v37, 1 }
0x12e7   :  { %v4242_v41 = vmin.f32 %v4240_v37, %v4241_v39  ;;  %v4855_v39 = vld [vmem:[%s10698_s2 + $0x90] sm:$0xff] }
0x12e9   :  { %vm4243_vm15 = vcmp.eq.f32.partialorder %v9469_v49, %v4242_v41  ;;  %v4856_v41 = vld [vmem:[%s10698_s2 + $0x98] sm:$0xff] }
0x12ea   :  { %v4247_v42 = vsel %vm4243_vm15, -1e+30, %v4226_v53  ;;  %v7475_v57 = vsel %vm4243_vm15, 1.0, %v9342_v34  ;;  %v9013_v53 = vpack.c.bf16 %v4360_v14, %v4359_v21 }
0x12eb   :  { %v4248_v43 = vsel %vm573_vm5, %v4247_v42, -inf }
0x12ec   :  { %v4249_v45 = vrot.slane %v4248_v43, 4 }
0x12ee   :  { %v4250_v30 = vmax.f32 %v4248_v43, %v4249_v45  ;;  %v4858_v43 = vld [vmem:[%s10698_s2 + $0xa8] sm:$0xff] }
0x12f0   :  { %v4251_v60 = vrot.slane %v4250_v30, 2 }
0x12f2   :  { %v4252_v47 = vmax.f32 %v4250_v30, %v4251_v60  ;;  %v4442_v30 = vld [vmem:[%s10697_s3 + $0x48] sm:$0xff] }
0x12f4   :  { %v4253_v48 = vrot.slane %v4252_v47, 1 }
0x12f6   :  { %v4254_v50 = vmax.f32 %v4252_v47, %v4253_v48 }
0x12f8   :  { %vm4255_vm1 = vcmp.ge.f32.partialorder %v4247_v42, %v4254_v50  ;;  %v9045_v42 = vpack.c.bf16 %v4856_v41, %v4855_v39 }
0x12f9   :  { %v4256_v29 = vsel %vm4255_vm1, %v9469_v49, 8.0 }
0x12fa   :  { %v4257_v46 = vsel %vm573_vm5, %v4256_v29, inf }
0x12fb   :  { %v4258_v61 = vrot.slane %v4257_v46, 4 }
0x12fd   :  { %v4259_v52 = vmin.f32 %v4257_v46, %v4258_v61  ;;  %v4443_v46 = vld [vmem:[%s10697_s3 + $0x50] sm:$0xff]  ;;  %v4606_v61 = vld [vmem:[%s10697_s3 + $0x58] sm:$0xff] }
0x12ff   :  { %v4260_v54 = vrot.slane %v4259_v52, 2 }
0x1301   :  { %v4261_v0 = vmin.f32 %v4259_v52, %v4260_v54  ;;  %v4691_v52 = vld [vmem:[%s10698_s2 + $0x70] sm:$0xff]  ;;  %v4692_v54 = vld [vmem:[%s10698_s2 + $0x78] sm:$0xff] }
0x1303   :  { %v4262_v55 = vrot.slane %v4261_v0, 1 }
0x1305   :  { %v4263_v56 = vmin.f32 %v4261_v0, %v4262_v55 }
0x1307   :  { %vm4264_vm6 = vcmp.eq.f32.partialorder %v9469_v49, %v4263_v56 }
0x1308   :  { %v7476_v58 = vsel %vm4264_vm6, 1.0, %v9342_v34 }
0x1309   :  { %v4267_v62 = vadd.f32 %v7476_v58, %v7475_v57  ;;  %v9033_v57 = vpack.c.bf16 %v4692_v54, %v4691_v52  ;;  %v4693_v58 = vld [vmem:[%s10698_s2 + $0x80] sm:$0xff]  ;;  %v5063_v54 = vld [vmem:[%s10698_s2 + $0xf0] sm:$0xff] }
0x130b   :  { %v4268_v63 = vmul.f32 %v4267_v62, %v4214_v13  ;;  %v4269_v3 = vmul.f32 %v8398_v20, %v4267_v62  ;;  %v4357_v20 = vld [vmem:[%s10698_s2 + $0x30] sm:$0xff]  ;;  %v4694_v62 = vld [vmem:[%s10698_s2 + $0x88] sm:$0xff] }
0x130c   :  { %v9009_v13 = vpack.c.bf16 %v4358_v12, %v4357_v20 }
0x130d   :  { %v9007_v4 = vpack.c.bf16 %v4269_v3, %v4268_v63  ;;  %v4607_v63 = vld [vmem:[%s10697_s3 + $0x60] sm:$0xff]  ;;  %v9037_v3 = vpack.c.bf16 %v4694_v62, %v4693_v58 }
0x130e   :  { %9010 = vmatprep.subr.bf16.mxu0 %v9009_v13 }
0x130f   :  { %9008 = vmatpush3.bf16.msra.mxu1 %v9007_v4  ;;  %9012 = vmatpush3.bf16.msra.mxu0 %v9009_v13  ;;  %v4770_v13 = vld [vmem:[%s10697_s3 + $0x68] sm:$0xff] }
0x1310   :  { %9014 = vmatprep.subr.bf16.mxu0 %v9013_v53 }
0x1312   :  { %8404 = vmatmul.mubr.msk.f32.vlgmr.msra.gmra.mrb[34].mxu1 %vm45_vm0, %v10165_v5 }
0x1313   :  { %8406 = vmatprep.mubr.msk.f32.mxu1 %vm9341_vm3, %v9342_v34  ;;  %9016 = vmatpush3.bf16.msra.mxu0 %v9013_v53 }
0x1314   :  { %9022 = vmatprep.subr.bf16.mxu0 %v9021_v23 }
0x1316   :  { %8407 = vmatmul.mubr.msk.f32.gmra.mrb[36].mxu1 %vm45_vm0, %v10174_v8 }
0x1317   :  { %8409 = vmatprep.mubr.msk.f32.mxu1 %vm9341_vm3, %v9342_v34 }
0x131a   :  { %8410 = vmatmul.mubr.msk.f32.gmra.mrb[38].mxu1 %vm45_vm0, %v10183_v27 }
0x131b   :  { %8427 = vmatprep.mubr.msk.f32.mxu1 %vm45_vm0, %v4442_v30 }
0x13e5   :  { %v4336_v24 = vpop.f32.mrb[34].mxu1 }
0x13e6   :  { %v10205_v51 = vmul.f32 0.125, %v4336_v24  ;;  %v8405_v44 = vpop.f32.mrb[35].mxu1  ;;  %v4356_v24 = vld [vmem:[%s10698_s2 + $0xb8] sm:$0xff] }
0x13e7   :  { %v4355_v44 = vld [vmem:[%s10698_s2 + $0xb0] sm:$0xff] }
0x13e8   :  { %v10209_v31 = vsub.f32 %v10132_v9, %v10205_v51  ;;  %v9025_v9 = vpack.c.bf16 %v4530_v16, %v4529_v25 }
0x13e9   :  { %v4341_v15 = vpop.f32.mrb[36].mxu1 }
0x13ea   :  { %v10217_v35 = vmul.f32 0.125, %v4341_v15  ;;  %v8408_v17 = vpop.f32.mrb[37].mxu1  ;;  %8420 = vmatprep.mubr.msk.f32.mxu0 %vm573_vm5, %v10209_v31 }
0x13ec   :  { %v10223_v37 = vsub.f32 %v10127_v6, %v10217_v35  ;;  %v4857_v6 = vld [vmem:[%s10698_s2 + $0xa0] sm:$0xff] }
0x13ed   :  { %v9049_v45 = vpack.c.bf16 %v4858_v43, %v4857_v6  ;;  %v10251_v60 = vpop.f32.mrb[38].mxu1 }
0x13ee   :  { %8421 = vmatmul.mubr.msk.f32.vlgmr.msra.gmra.mrb[46].mxu0 %vm573_vm5, %v10223_v37  ;;  %v8411_v47 = vpop.f32.mrb[39].mxu1 }
0x13ef   :  { %9024 = vmatpush3.bf16.msra.mxu0 %v9021_v23  ;;  %8438 = vmatprep.mubr.msk.f32.mxu0 %vm573_vm5, %v10209_v31  ;;  %v4935_v23 = vld [vmem:[%s10697_s3 + $0x80] sm:$0xff] }
0x13f0   :  { %9026 = vmatprep.subr.bf16.mxu0 %v9025_v9 }
0x13f3   :  { %9028 = vmatpush3.bf16.msra.mxu0 %v9025_v9 }
0x13f4   :  { %9046 = vmatprep.subr.bf16.mxu0 %v9045_v42 }
0x13f6   :  { %8439 = vmatmul.mubr.msk.f32.vlgmr.msra.gmra.mrb[48].mxu0 %vm573_vm5, %v10223_v37 }
0x13f7   :  { %9048 = vmatpush3.bf16.msra.mxu0 %v9045_v42  ;;  %8474 = vmatprep.mubr.msk.f32.mxu0 %vm573_vm5, %v10209_v31 }
0x13f8   :  { %9050 = vmatprep.subr.bf16.mxu0 %v9049_v45 }
0x13fb   :  { %9052 = vmatpush3.bf16.msra.mxu0 %v9049_v45 }
0x13fe   :  { %8475 = vmatmul.mubr.msk.f32.vlgmr.msra.gmra.mrb[50].mxu0 %vm573_vm5, %v10223_v37 }
0x14c1   :  { %v8422_v48 = vpop.f32.mrb[46].mxu0 }
0x14c2   :  { %v4433_v50 = vpop.f32.mrb[47].mxu0 }
0x14c3   :  { %v9017_v29 = vpack.c.bf16 %v8422_v48, %v4433_v50 }
0x14c5   :  { %9018 = vmatprep.subr.bf16.mxu1 %v9017_v29 }
0x14c6   :  { %9020 = vmatpush3.bf16.msra.mxu1 %v9017_v29 }
0x14c9   :  { %v8440_v0 = vpop.f32.mrb[48].mxu0  ;;  %8428 = vmatmul.mubr.msk.f32.vlgmr.msra.gmra.mrb[40].mxu1 %vm45_vm0, %v4443_v46 }
0x14ca   :  { %v4597_v55 = vpop.f32.mrb[49].mxu0  ;;  %8445 = vmatprep.mubr.msk.f32.mxu1 %vm45_vm0, %v4606_v61  ;;  %v5062_v61 = vld [vmem:[%s10698_s2 + $0xe8] sm:$0xff] }
0x14cb   :  { %v9029_v56 = vpack.c.bf16 %v8440_v0, %v4597_v55  ;;  %v5064_v0 = vld [vmem:[%s10698_s2 + $0xf8] sm:$0xff] }
0x14cc   :  { %v9061_v55 = vpack.c.bf16 %v5064_v0, %v5063_v54 }
0x14cd   :  { %9030 = vmatprep.subr.bf16.mxu1 %v9029_v56 }
0x14ce   :  { %9032 = vmatpush3.bf16.msra.mxu1 %v9029_v56  ;;  %v5285_v56 = vld [vmem:[%s10700_s4 + $0x30] sm:$0xff] }
0x14cf   :  { %9034 = vmatprep.subr.bf16.mxu1 %v9033_v57 }
0x14d1   :  { %v8476_v4 = vpop.f32.mrb[50].mxu0  ;;  %8446 = vmatmul.mubr.msk.f32.vlgmr.msra.gmra.mrb[40].mxu1 %vm45_vm0, %v4607_v63 }
0x14d2   :  { %9036 = vmatpush3.bf16.msra.mxu1 %v9033_v57  ;;  %v4925_v20 = vpop.f32.mrb[51].mxu0  ;;  %8456 = vmatprep.mubr.msk.f32.mxu1 %vm573_vm5, %v10209_v31  ;;  %v5286_v57 = vld [vmem:[%s10700_s4 + $0x38] sm:$0xff] }
0x14d3   :  { %v9053_v12 = vpack.c.bf16 %v8476_v4, %v4925_v20  ;;  %9038 = vmatprep.subr.bf16.mxu1 %v9037_v3  ;;  %v9073_v58 = vpack.c.bf16 %v5286_v57, %v5285_v56 }
0x14d6   :  { %9040 = vmatpush3.bf16.msra.mxu1 %v9037_v3 }
0x14d9   :  { %8457 = vmatmul.mubr.msk.f32.vlgmr.msra.gmra.mrb[42].mxu1 %vm573_vm5, %v10223_v37 }
0x14da   :  { %8463 = vmatprep.mubr.msk.f32.mxu1 %vm45_vm0, %v4770_v13 }
0x15ac   :  { %v8458_v21 = vpop.f32.mrb[42].mxu1 }
0x15ad   :  { %v4761_v14 = vpop.f32.mrb[43].mxu1 }
0x15ae   :  { %v9041_v53 = vpack.c.bf16 %v8458_v21, %v4761_v14  ;;  %v7496_v21 = vld [vmem:[%s10698_s2 + $0xc0] ss:$0 sm:$0xff] }
0x15b0   :  { %9042 = vmatprep.subr.bf16.mxu1 %v9041_v53 }
0x15b1   :  { %9044 = vmatpush3.bf16.msra.mxu1 %v9041_v53  ;;  %v7497_v53 = vld [vmem:[%s10698_s2 + $0xc8] ss:$0 sm:$0xff] }
0x15b2   :  { %9054 = vmatprep.subr.bf16.mxu1 %v9053_v12 }
0x15b4   :  { %8464 = vmatmul.mubr.msk.f32.vlgmr.msra.gmra.mrb[40].mxu1 %vm45_vm0, %v4771_v19 }
0x15b5   :  { %9056 = vmatpush3.bf16.msra.mxu1 %v9053_v12  ;;  %8481 = vmatprep.mubr.msk.f32.mxu1 %vm45_vm0, %v4934_v22 }
0x15bc   :  { %8482 = vmatmul.mubr.msk.f32.vlgmr.msra.gmra.mrb[40].mxu1 %vm45_vm0, %v4935_v23 }
0x168f   :  { %v8483_v15 = vpop.f32.mrb[40].mxu1 }
0x1690   :  { %v10303_v25 = vadd.f32 %v8483_v15, %v4356_v24  ;;  %v5008_v16 = vpop.f32.mrb[41].mxu1  ;;  %v5288_v15 = vld [vmem:[%s10700_s4 + $0x48] sm:$0xff] }
0x1691   :  { %v10305_v17 = vadd.f32 %v5008_v16, %v4355_v44  ;;  %v5287_v44 = vld [vmem:[%s10700_s4 + $0x40] sm:$0xff] }
0x1692   :  { %v5020_v9 = vsub.f32 %v10223_v37, %v10303_v25 }
0x1693   :  { %v5019_v39 = vsub.f32 %v10209_v31, %v10305_v17  ;;  %v5061_v31 = vld [vmem:[%s10698_s2 + $0xe0] sm:$0xff] }
0x1694   :  { %v5026_v41 = vsel %vm573_vm5, %v5020_v9, 0.0  ;;  %v9057_v52 = vpack.c.bf16 %v5062_v61, %v5061_v31 }
0x1695   :  { %5027 = vadd.xlane.f32.xlu0 %v5026_v41  ;;  %v5023_v42 = vsel %vm573_vm5, %v5019_v39, 0.0  ;;  %v5158_v41 = vld [vmem:[%s10698_s2 + $0x100] sm:$0xff] }
0x1696   :  { %5024 = vadd.xlane.f32.xlu1 %v5023_v42  ;;  %9058 = vmatprep.subr.bf16.mxu0 %v9057_v52  ;;  %v5159_v42 = vld [vmem:[%s10698_s2 + $0x108] sm:$0xff] }
0x1697   :  { %9060 = vmatpush3.bf16.msra.mxu0 %v9057_v52 }
0x1698   :  { %9062 = vmatprep.subr.bf16.mxu0 %v9061_v55 }
0x169b   :  { %9064 = vmatpush3.bf16.msra.mxu0 %v9061_v55 }
0x169c   :  { %9074 = vmatprep.subr.bf16.mxu0 %v9073_v58 }
0x1722   :  { %v5028_v6 = vpop.xlane.xlu0 %5027 }
0x1723   :  { %v5030_v43 = vmul.f32 0.03125, %v5028_v6  ;;  %v5025_v45 = vpop.xlane.xlu1 %5024  ;;  %v5160_v6 = vld [vmem:[%s10698_s2 + $0x110] sm:$0xff] }
0x1724   :  { %v5029_v30 = vmul.f32 0.03125, %v5025_v45 }
0x1725   :  { %v5032_v47 = vsub.f32 %v5020_v9, %v5030_v43  ;;  %v9065_v43 = vpack.c.bf16 %v5159_v42, %v5158_v41 }
0x1726   :  { %v5031_v48 = vsub.f32 %v5019_v39, %v5029_v30  ;;  %v9077_v39 = vpack.c.bf16 %v5288_v15, %v5287_v44  ;;  %v5371_v30 = vld [vmem:[%s10700_s4 + $0x58] sm:$0xff] }
0x1727   :  { %v5034_v46 = vmul.f32 %v5032_v47, %v5032_v47  ;;  %9066 = vmatprep.subr.bf16.mxu1 %v9065_v43 }
0x1728   :  { %v5033_v50 = vmul.f32 %v5031_v48, %v5031_v48  ;;  %9068 = vmatpush3.bf16.msra.mxu1 %v9065_v43 }
0x1729   :  { %v5038_v37 = vsel %vm573_vm5, %v5034_v46, 0.0 }
0x172a   :  { %v5035_v29 = vsel %vm573_vm5, %v5033_v50, 0.0 }
0x172b   :  { %5036 = vadd.xlane.f32.xlu1 %v5035_v29 }
0x172f   :  { %5039 = vadd.xlane.f32.xlu1 %v5038_v37 }
0x17b8   :  { %v5037_v62 = vpop.xlane.xlu1 %5036 }
0x17b9   :  { %v5041_v63 = vmul.f32 0.03125, %v5037_v62 }
0x17bb   :  { %v5043_v3 = vadd.f32 1e-05, %v5041_v63 }
0x17bc   :  { %v5040_v4 = vpop.xlane.xlu1 %5039 }
0x17bd   :  { %9308 = vrsqrt.f32 %v5043_v3  ;;  %v5042_v20 = vmul.f32 0.03125, %v5040_v4  ;;  %v5459_v3 = vld [vmem:[%s10698_s2 + $0x120] sm:$0xff]  ;;  %v5546_v4 = vld [vmem:[%s10698_s2 + $0x130] sm:$0xff] }
0x17bf   :  { %v5044_v12 = vadd.f32 1e-05, %v5042_v20 }
0x17c1   :  { %9310 = vrsqrt.f32 %v5044_v12 }
0x17c7   :  { %v9309_v13 = vpop.eup %9308 }
0x17c8   :  { %v5047_v14 = vmul.f32 %v9309_v13, %v5031_v48 }
0x17ca   :  { %v5053_v19 = vmul.f32 %v7496_v21, %v5047_v14 }
0x17cb   :  { %v9311_v22 = vpop.eup %9310 }
0x17cc   :  { %v5048_v23 = vmul.f32 %v9311_v22, %v5032_v47  ;;  %v10339_v24 = vadd.f32 %v7497_v53, %v5053_v19 }
0x17ce   :  { %v5054_v16 = vmul.f32 %v7496_v21, %v5048_v23  ;;  %8492 = vmatprep.mubr.msk.f32.mxu0 %vm573_vm5, %v10339_v24  ;;  %v5460_v23 = vld [vmem:[%s10698_s2 + $0x128] sm:$0xff] }
0x17d0   :  { %v5060_v9 = vadd.f32 %v7497_v53, %v5054_v16 }
0x17d2   :  { %8493 = vmatmul.mubr.msk.f32.vlgmr.msra.gmra.mrb[52].mxu0 %vm573_vm5, %v5060_v9 }
0x17d3   :  { %9076 = vmatpush3.bf16.msra.mxu0 %v9073_v58  ;;  %8514 = vmatprep.mubr.msk.f32.mxu0 %vm573_vm5, %v10205_v51  ;;  %v5161_v51 = vld [vmem:[%s10698_s2 + $0x118] sm:$0xff]  ;;  %v5372_v58 = vld [vmem:[%s10700_s4 + $0x60] sm:$0xff] }
0x17d4   :  { %9078 = vmatprep.subr.bf16.mxu0 %v9077_v39  ;;  %v9069_v45 = vpack.c.bf16 %v5161_v51, %v5160_v6 }
0x17d6   :  { %9070 = vmatprep.subr.bf16.mxu1 %v9069_v45 }
0x17d7   :  { %9080 = vmatpush3.bf16.msra.mxu0 %v9077_v39  ;;  %9072 = vmatpush3.bf16.msra.mxu1 %v9069_v45  ;;  %v5633_v45 = vld [vmem:[%s10698_s2 + $0x140] sm:$0xff] }
0x17da   :  { %8515 = vmatmul.mubr.msk.f32.vlgmr.msra.gmra.mrb[54].mxu0 %vm573_vm5, %v10217_v35  ;;  %v5370_v35 = vld [vmem:[%s10700_s4 + $0x50] sm:$0xff] }
0x17db   :  { %v9081_v47 = vpack.c.bf16 %v5371_v30, %v5370_v35  ;;  %8536 = vmatprep.mubr.msk.f32.mxu0 %vm573_vm5, %v5459_v3  ;;  %v5634_v35 = vld [vmem:[%s10698_s2 + $0x148] sm:$0xff]  ;;  %v5720_v30 = vld [vmem:[%s10698_s2 + $0x150] sm:$0xff] }
0x17dd   :  { %9082 = vmatprep.subr.bf16.mxu1 %v9081_v47 }
0x18a5   :  { %v8494_v48 = vpop.f32.mrb[52].mxu0 }
0x18a6   :  { %v7501_v50 = vmul.f32 -1.442695, %v8494_v48  ;;  %v5137_v29 = vpop.f32.mrb[53].mxu0  ;;  %v5458_v48 = vld [vmem:[%s10700_s4 + $0x78] sm:$0xff] }
0x18a7   :  { %v7500_v46 = vmul.f32 -1.442695, %v5137_v29 }
0x18a8   :  { %9312 = vpow2.f32 %v7501_v50 }
0x18a9   :  { %9314 = vpow2.f32 %v7500_v46 }
0x18ad   :  { %v8516_v37 = vpop.f32.mrb[54].mxu0 }
0x18ae   :  { %v5456_v31 = vsub.f32 %v9989_v11, %v8516_v37  ;;  %v5361_v61 = vpop.f32.mrb[55].mxu0  ;;  %v5373_v11 = vld [vmem:[%s10700_s4 + $0x68] sm:$0xff] }
0x18af   :  { %v5455_v52 = vsub.f32 %v9984_v1, %v5361_v61  ;;  %v9085_v63 = vpack.c.bf16 %v5373_v11, %v5372_v58 }
0x18b1   :  { %v9089_v54 = vpack.c.bf16 %v5456_v31, %v5455_v52 }
0x18b2   :  { %v9313_v0 = vpop.eup %9312 }
0x18b3   :  { %v9315_v55 = vpop.eup %9314  ;;  %v5153_v56 = vadd.f32 1.0, %v9313_v0  ;;  %9090 = vmatprep.subr.bf16.mxu0 %v9089_v54 }
0x18b4   :  { %v5152_v57 = vadd.f32 1.0, %v9315_v55  ;;  %9092 = vmatpush3.bf16.msra.mxu0 %v9089_v54 }
0x18b6   :  { %9316 = vrcp.f32 %v5152_v57 }
0x18b7   :  { %9318 = vrcp.f32 %v5153_v56 }
0x18c0   :  { %v9317_v62 = vpop.eup %9316 }
0x18c1   :  { %v9319_v1 = vpop.eup %9318  ;;  %8503 = vmatprep.mubr.msk.f32.mxu1 %vm573_vm5, %v9317_v62 }
0x18c2   :  { %8504 = vmatmul.mubr.msk.f32.vlgmr.msra.gmra.mrb[44].mxu1 %vm573_vm5, %v9319_v1 }
0x18c3   :  { %9084 = vmatpush3.bf16.msra.mxu1 %v9081_v47  ;;  %8525 = vmatprep.mubr.msk.f32.mxu1 %vm573_vm5, %v10305_v17  ;;  %v5721_v47 = vld [vmem:[%s10698_s2 + $0x158] sm:$0xff] }
0x18c4   :  { %9086 = vmatprep.subr.bf16.mxu1 %v9085_v63 }
0x18c7   :  { %9088 = vmatpush3.bf16.msra.mxu1 %v9085_v63 }
0x18c8   :  { %9098 = vmatprep.subr.bf16.mxu1 %v9089_v54 }
0x18ca   :  { %8526 = vmatmul.mubr.msk.f32.vlgmr.msra.gmra.mrb[46].mxu1 %vm573_vm5, %v10303_v25 }
0x18cb   :  { %9100 = vmatpush3.bf16.msra.mxu1 %v9089_v54  ;;  %8547 = vmatprep.mubr.msk.f32.mxu1 %vm573_vm5, %v5546_v4 }
0x1995   :  { %v8505_v17 = vpop.f32.mrb[44].mxu1 }
0x1996   :  { %v5244_v20 = vadd.f32 %v8505_v17, %v5060_v9  ;;  %v5234_v12 = vpop.f32.mrb[45].mxu1  ;;  %v7504_v17 = vld [vmem:[%s10698_s2 + $0xd0] ss:$0 sm:$0xff] }
0x1997   :  { %v5243_v13 = vadd.f32 %v5234_v12, %v10339_v24  ;;  %v5547_v24 = vld [vmem:[%s10698_s2 + $0x138] sm:$0xff] }
0x1998   :  { %v5250_v21 = vsel %vm573_vm5, %v5244_v20, 0.0 }
0x1999   :  { %5251 = vadd.xlane.f32.xlu0 %v5250_v21  ;;  %v5247_v14 = vsel %vm573_vm5, %v5243_v13, 0.0 }
0x199a   :  { %5248 = vadd.xlane.f32.xlu1 %v5247_v14 }
0x199d   :  { %v8527_v53 = vpop.f32.mrb[46].mxu1 }
0x199e   :  { %v5446_v19 = vpop.f32.mrb[47].mxu1 }
0x199f   :  { %v9093_v22 = vpack.c.bf16 %v8527_v53, %v5446_v19 }
0x19a1   :  { %9094 = vmatprep.subr.bf16.mxu0 %v9093_v22  ;;  %9102 = vmatprep.subr.bf16.mxu1 %v9093_v22 }
0x19a2   :  { %9096 = vmatpush3.bf16.msra.mxu0 %v9093_v22  ;;  %9104 = vmatpush3.bf16.msra.mxu1 %v9093_v22 }
0x19a3   :  { %9106 = vmatprep.subr.bf16.mxu0 %v9089_v54  ;;  %9114 = vmatprep.subr.bf16.mxu1 %v9089_v54 }
0x19a5   :  { %8537 = vmatmul.mubr.msk.f32.vlgmr.msra.gmra.mrb[56].mxu0 %vm573_vm5, %v5460_v23  ;;  %8548 = vmatmul.mubr.msk.f32.vlgmr.msra.gmra.mrb[48].mxu1 %vm573_vm5, %v5547_v24 }
0x19a6   :  { %9108 = vmatpush3.bf16.msra.mxu0 %v9089_v54  ;;  %9116 = vmatpush3.bf16.msra.mxu1 %v9089_v54  ;;  %v5457_v54 = vld [vmem:[%s10700_s4 + $0x70] sm:$0xff] }
0x19a7   :  { %9110 = vmatprep.subr.bf16.mxu0 %v9093_v22  ;;  %9118 = vmatprep.subr.bf16.mxu1 %v9093_v22 }
0x19a8   :  { %8558 = vmatprep.mubr.msk.f32.mxu0 %vm573_vm5, %v5633_v45  ;;  %8569 = vmatprep.mubr.msk.f32.mxu1 %vm573_vm5, %v5720_v30 }
0x19aa   :  { %9112 = vmatpush3.bf16.msra.mxu0 %v9093_v22  ;;  %9120 = vmatpush3.bf16.msra.mxu1 %v9093_v22 }
0x19ad   :  { %8559 = vmatmul.mubr.msk.f32.vlgmr.msra.gmra.mrb[58].mxu0 %vm573_vm5, %v5634_v35  ;;  %8570 = vmatmul.mubr.msk.f32.vlgmr.msra.gmra.mrb[50].mxu1 %vm573_vm5, %v5721_v47 }
0x19ae   :  { %8576 = vmatprep.mubr.msk.f32.mxu0 %vm45_vm0, %v10091_v18 }
0x1a26   :  { %v5252_v44 = vpop.xlane.xlu0 %5251 }
0x1a27   :  { %v5254_v15 = vmul.f32 0.03125, %v5252_v44  ;;  %v5249_v16 = vpop.xlane.xlu1 %5248 }
0x1a28   :  { %v5253_v9 = vmul.f32 0.03125, %v5249_v16 }
0x1a29   :  { %v5256_v39 = vsub.f32 %v5244_v20, %v5254_v15 }
0x1a2a   :  { %v5255_v41 = vsub.f32 %v5243_v13, %v5253_v9  ;;  %v7505_v13 = vld [vmem:[%s10698_s2 + $0xd8] ss:$0 sm:$0xff] }
0x1a2b   :  { %v5258_v42 = vmul.f32 %v5256_v39, %v5256_v39 }
0x1a2c   :  { %v5257_v6 = vmul.f32 %v5255_v41, %v5255_v41 }
0x1a2d   :  { %v5262_v43 = vsel %vm573_vm5, %v5258_v42, 0.0 }
0x1a2e   :  { %5263 = vadd.xlane.f32.xlu0 %v5262_v43  ;;  %v5259_v51 = vsel %vm573_vm5, %v5257_v6, 0.0 }
0x1a2f   :  { %5260 = vadd.xlane.f32.xlu1 %v5259_v51 }
0x1a78   :  { %v8538_v50 = vpop.f32.mrb[56].mxu0  ;;  %v8549_v29 = vpop.f32.mrb[48].mxu1 }
0x1a79   :  { %v5543_v18 = vmul.f32 %v8538_v50, %v9755_v38  ;;  %v5533_v46 = vpop.f32.mrb[57].mxu0  ;;  %v5630_v37 = vmul.f32 %v8549_v29, %v9757_v26  ;;  %v5620_v55 = vpop.f32.mrb[49].mxu1 }
0x1a7a   :  { %v5542_v52 = vmul.f32 %v5533_v46, %v9755_v38  ;;  %v5629_v56 = vmul.f32 %v5620_v55, %v9757_v26 }
0x1a7b   :  { %v5545_v31 = vadd.f32 %v5543_v18, %v5458_v48 }
0x1a7c   :  { %v5544_v0 = vadd.f32 %v5542_v52, %v5457_v54 }
0x1a7d   :  { %v5632_v61 = vadd.f32 %v5630_v37, %v5545_v31 }
0x1a7e   :  { %v5631_v57 = vadd.f32 %v5629_v56, %v5544_v0 }
0x1a80   :  { %v8560_v24 = vpop.f32.mrb[58].mxu0 }
0x1a81   :  { %v5717_v44 = vmul.f32 %v8560_v24, %v9787_v2  ;;  %v5707_v15 = vpop.f32.mrb[59].mxu0 }
0x1a82   :  { %v5716_v16 = vmul.f32 %v5707_v15, %v9787_v2 }
0x1a83   :  { %v5719_v9 = vadd.f32 %v5717_v44, %v5632_v61 }
0x1abb   :  { %v5264_v58 = vpop.xlane.xlu0 %5263 }
0x1abc   :  { %v5266_v11 = vmul.f32 0.03125, %v5264_v58  ;;  %v5261_v62 = vpop.xlane.xlu1 %5260 }
0x1abd   :  { %v5265_v63 = vmul.f32 0.03125, %v5261_v62 }
0x1abe   :  { %v5268_v1 = vadd.f32 1e-05, %v5266_v11 }
0x1abf   :  { %v5267_v3 = vadd.f32 1e-05, %v5265_v63 }
0x1ac0   :  { %9320 = vrsqrt.f32 %v5268_v1 }
0x1ac1   :  { %9322 = vrsqrt.f32 %v5267_v3 }
0x1aca   :  { %v9321_v4 = vpop.eup %9320 }
0x1acb   :  { %v9323_v20 = vpop.eup %9322  ;;  %v5272_v12 = vmul.f32 %v9321_v4, %v5256_v39  ;;  %v5718_v39 = vadd.f32 %v5716_v16, %v5631_v57 }
0x1acc   :  { %v5271_v21 = vmul.f32 %v9323_v20, %v5255_v41  ;;  %v8571_v41 = vpop.f32.mrb[50].mxu1 }
0x1acd   :  { %v5278_v14 = vmul.f32 %v7504_v17, %v5272_v12  ;;  %v5794_v42 = vpop.f32.mrb[51].mxu1  ;;  %v5804_v6 = vmul.f32 %v8571_v41, %v9792_v32 }
0x1ace   :  { %v5277_v53 = vmul.f32 %v7504_v17, %v5271_v21  ;;  %v5803_v43 = vmul.f32 %v5794_v42, %v9792_v32 }
0x1acf   :  { %v10441_v19 = vadd.f32 %v7505_v13, %v5278_v14  ;;  %v10456_v51 = vadd.f32 %v5804_v6, %v5719_v9 }
0x1ad0   :  { %v10443_v22 = vadd.f32 %v7505_v13, %v5277_v53 }
0x1ad2   :  { %v9121_v23 = vpack.c.bf16 %v10441_v19, %v10443_v22 }
0x1ad4   :  { %9122 = vmatprep.subr.bf16.mxu0 %v9121_v23 }
0x1ad5   :  { %9124 = vmatpush3.bf16.msra.mxu0 %v9121_v23 }
0x1ad6   :  { %9125 = vmatprep.subr.bf16.mxu0 %v9340_v33 }
0x1ad8   :  { %8577 = vmatmul.mubr.msk.f32.vlgmr.msra.gmra.mrb[60].mxu0 %vm45_vm0, %v10140_v10  ;;  %v10458_v10 = vadd.f32 %v5803_v43, %v5718_v39 }
0x1ad9   :  { %8583 = vmatprep.mubr.msk.f32.mxu0 %vm9341_vm3, %v9342_v34 }
0x1bab   :  { %v8578_v45 = vpop.f32.mrb[60].mxu0 }
0x1bac   :  { %v5889_v35 = vmul.f32 %v8578_v45, %v8578_v45  ;;  %v5879_v30 = vpop.f32.mrb[61].mxu0 }
0x1bad   :  { %v5888_v47 = vmul.f32 %v5879_v30, %v5879_v30 }
0x1baf   :  { %v5890_v48 = vadd.f32 %v5889_v35, %v5888_v47 }
0x1bb1   :  { %v5891_v50 = vsel %vm571_vm4, %v5890_v48, -1e+30  ;;  %v6024_v48 = vld [vmem:[%s10698_s2 + $0x178] sm:$0xff] }
0x1bb2   :  { %v5892_v29 = vsel %vm573_vm5, %v5891_v50, -inf }
0x1bb3   :  { %v5893_v18 = vrot.slane %v5892_v29, 4 }
0x1bb5   :  { %v5894_v46 = vmax.f32 %v5892_v29, %v5893_v18  ;;  %v6356_v18 = vld [vmem:[%s10698_s2 + $0x1a8] sm:$0xff] }
0x1bb7   :  { %v5895_v37 = vrot.slane %v5894_v46, 2 }
0x1bb9   :  { %v5896_v31 = vmax.f32 %v5894_v46, %v5895_v37  ;;  %v6357_v46 = vld [vmem:[%s10698_s2 + $0x1b0] sm:$0xff] }
0x1bba   :  { %v9152_v37 = vpack.c.bf16 %v6357_v46, %v6356_v18  ;;  %v6522_v46 = vld [vmem:[%s10698_s2 + $0x1d8] sm:$0xff] }
0x1bbb   :  { %v5897_v61 = vrot.slane %v5896_v31, 1 }
0x1bbd   :  { %v5898_v52 = vmax.f32 %v5896_v31, %v5897_v61 }
0x1bbf   :  { %vm5899_vm7 = vcmp.ge.f32.partialorder %v5891_v50, %v5898_v52 }
0x1bc0   :  { %v5900_v54 = vsel %vm5899_vm7, %v9469_v49, 8.0 }
0x1bc1   :  { %v5901_v0 = vsel %vm573_vm5, %v5900_v54, inf }
0x1bc2   :  { %v5902_v55 = vrot.slane %v5901_v0, 4 }
0x1bc4   :  { %v5903_v56 = vmin.f32 %v5901_v0, %v5902_v55  ;;  %v6358_v55 = vld [vmem:[%s10698_s2 + $0x1b8] sm:$0xff] }
0x1bc6   :  { %v5904_v57 = vrot.slane %v5903_v56, 2 }
0x1bc8   :  { %v5905_v58 = vmin.f32 %v5903_v56, %v5904_v57  ;;  %v6359_v56 = vld [vmem:[%s10698_s2 + $0x1c0] sm:$0xff] }
0x1bca   :  { %v5906_v11 = vrot.slane %v5905_v58, 1 }
0x1bcc   :  { %v5907_v36 = vmin.f32 %v5905_v58, %v5906_v11  ;;  %v9156_v11 = vpack.c.bf16 %v6359_v56, %v6358_v55  ;;  %v6020_v56 = vld [vmem:[%s10698_s2 + $0x1e8] sm:$0xff] }
0x1bce   :  { %vm5908_vm4 = vcmp.eq.f32.partialorder %v9469_v49, %v5907_v36 }
0x1bcf   :  { %v5912_v62 = vsel %vm5908_vm4, -1e+30, %v5891_v50  ;;  %v7520_v16 = vsel %vm5908_vm4, 1.0, %v9342_v34  ;;  %v6025_v50 = vld [vmem:[%s10698_s2 + $0x180] sm:$0xff] }
0x1bd0   :  { %v5913_v63 = vsel %vm573_vm5, %v5912_v62, -inf  ;;  %v9132_v29 = vpack.c.bf16 %v6025_v50, %v6024_v48 }
0x1bd1   :  { %v5914_v1 = vrot.slane %v5913_v63, 4 }
0x1bd3   :  { %v5915_v3 = vmax.f32 %v5913_v63, %v5914_v1  ;;  %v6685_v63 = vld [vmem:[%s10700_s4 + $0x88] sm:$0xff]  ;;  %v4352_v1 = vmul.f32 0.125, %v10251_v60  ;;  %v6686_v60 = vld [vmem:[%s10700_s4 + $0x90] sm:$0xff] }
0x1bd5   :  { %v5916_v4 = vrot.slane %v5915_v3, 2 }
0x1bd7   :  { %v5917_v17 = vmax.f32 %v5915_v3, %v5916_v4 }
0x1bd9   :  { %v5918_v20 = vrot.slane %v5917_v17, 1 }
0x1bdb   :  { %v5919_v12 = vmax.f32 %v5917_v17, %v5918_v20  ;;  %v6687_v20 = vld [vmem:[%s10700_s4 + $0x98] sm:$0xff] }
0x1bdd   :  { %vm5920_vm8 = vcmp.ge.f32.partialorder %v5912_v62, %v5919_v12  ;;  %v6684_v62 = vld [vmem:[%s10700_s4 + $0x80] sm:$0xff]  ;;  %v9180_v12 = vpack.c.bf16 %v6687_v20, %v6686_v60  ;;  %v6942_v60 = vld [vmem:[%s10698_s2 + $0x270] sm:$0xff]  ;;  %v7025_v20 = vld [vmem:[%s10698_s2 + $0x278] sm:$0xff] }
0x1bde   :  { %v5921_v13 = vsel %vm5920_vm8, %v9469_v49, 8.0  ;;  %v9176_v17 = vpack.c.bf16 %v6685_v63, %v6684_v62  ;;  %v6857_v62 = vld [vmem:[%s10698_s2 + $0x258] sm:$0xff]  ;;  %v6941_v63 = vld [vmem:[%s10698_s2 + $0x268] sm:$0xff] }
0x1bdf   :  { %v5922_v21 = vsel %vm573_vm5, %v5921_v13, inf  ;;  %v6107_v13 = vld [vmem:[%s10697_s3 + $0x88] sm:$0xff] }
0x1be0   :  { %v5923_v14 = vrot.slane %v5922_v21, 4 }
0x1be2   :  { %v5924_v53 = vmin.f32 %v5922_v21, %v5923_v14  ;;  %v6769_v21 = vld [vmem:[%s10700_s4 + $0xa0] sm:$0xff]  ;;  %v6770_v14 = vld [vmem:[%s10700_s4 + $0xa8] sm:$0xff] }
0x1be4   :  { %v5925_v23 = vrot.slane %v5924_v53, 2 }
0x1be6   :  { %v5926_v24 = vmin.f32 %v5924_v53, %v5925_v23  ;;  %v9184_v53 = vpack.c.bf16 %v6770_v14, %v6769_v21  ;;  %v6771_v23 = vld [vmem:[%s10700_s4 + $0xb0] sm:$0xff] }
0x1be7   :  { %v7110_v21 = vld [vmem:[%s10698_s2 + $0x290] sm:$0xff] }
0x1be8   :  { %v5927_v44 = vrot.slane %v5926_v24, 1 }
0x1bea   :  { %v5928_v15 = vmin.f32 %v5926_v24, %v5927_v44  ;;  %v6772_v24 = vld [vmem:[%s10700_s4 + $0xb8] sm:$0xff] }
0x1beb   :  { %v9188_v44 = vpack.c.bf16 %v6772_v24, %v6771_v23  ;;  %v5811_v23 = vrot.slane %v10303_v25, %v10010_v28  ;;  %v5807_v24 = vld [vmem:[%s10698_s2 + $0x160] sm:$0xff] }
0x1bec   :  { %vm5929_vm9 = vcmp.eq.f32.partialorder %v9469_v49, %v5928_v15  ;;  %v6192_v49 = vld [vmem:[%s10698_s2 + $0x188] sm:$0xff] }
0x1bed   :  { %v7521_v9 = vsel %vm5929_vm9, 1.0, %v9342_v34 }
0x1bee   :  { %v5932_v39 = vadd.f32 %v7521_v9, %v7520_v16 }
0x1bf0   :  { %v5933_v41 = vmul.f32 %v5932_v39, %v5879_v30  ;;  %v5934_v42 = vmul.f32 %v8578_v45, %v5932_v39  ;;  %v6022_v45 = vld [vmem:[%s10698_s2 + $0x168] sm:$0xff]  ;;  %v6195_v30 = vld [vmem:[%s10698_s2 + $0x1a0] sm:$0xff] }
0x1bf2   :  { %v9126_v6 = vpack.c.bf16 %v5934_v42, %v5933_v41 }
0x1bf4   :  { %9127 = vmatpush3.bf16.msra.mxu0 %v9126_v6  ;;  %v6108_v6 = vld [vmem:[%s10697_s3 + $0x90] sm:$0xff] }
0x1bf7   :  { %8584 = vmatmul.mubr.msk.f32.vlgmr.msra.gmra.mrb[62].mxu0 %vm45_vm0, %v10165_v5  ;;  %v6193_v5 = vld [vmem:[%s10698_s2 + $0x190] sm:$0xff] }
0x1bf8   :  { %8586 = vmatprep.mubr.msk.f32.mxu0 %vm9341_vm3, %v9342_v34  ;;  %v9140_v43 = vpack.c.bf16 %v6193_v5, %v6192_v49  ;;  %v6271_v49 = vld [vmem:[%s10697_s3 + $0x98] sm:$0xff] }
0x1bfa   :  { %9141 = vmatprep.subr.bf16.mxu0 %v9140_v43 }
0x1bfb   :  { %8587 = vmatmul.mubr.msk.f32.gmra.mrb[64].mxu0 %vm45_vm0, %v10174_v8  ;;  %v6023_v8 = vld [vmem:[%s10698_s2 + $0x170] sm:$0xff] }
0x1bfc   :  { %8589 = vmatprep.mubr.msk.f32.mxu0 %vm9341_vm3, %v9342_v34  ;;  %v9128_v35 = vpack.c.bf16 %v6023_v8, %v6022_v45  ;;  %9143 = vmatpush3.bf16.msra.mxu0 %v9140_v43  ;;  %v6520_v8 = vld [vmem:[%s10698_s2 + $0x1c8] sm:$0xff] }
0x1bfe   :  { %9129 = vmatprep.subr.bf16.mxu1 %v9128_v35 }
0x1bff   :  { %8590 = vmatmul.mubr.msk.f32.gmra.mrb[66].mxu0 %vm45_vm0, %v10183_v27  ;;  %v6194_v27 = vld [vmem:[%s10698_s2 + $0x198] sm:$0xff]  ;;  %9131 = vmatpush3.bf16.msra.mxu1 %v9128_v35  ;;  %v6521_v35 = vld [vmem:[%s10698_s2 + $0x1d0] sm:$0xff] }
0x1c00   :  { %v9144_v47 = vpack.c.bf16 %v6195_v30, %v6194_v27  ;;  %9133 = vmatprep.subr.bf16.mxu1 %v9132_v29  ;;  %v6272_v27 = vld [vmem:[%s10697_s3 + $0xa0] sm:$0xff]  ;;  %v6435_v30 = vld [vmem:[%s10697_s3 + $0xa8] sm:$0xff] }
0x1c02   :  { %9145 = vmatprep.subr.bf16.mxu0 %v9144_v47 }
0x1c03   :  { %9147 = vmatpush3.bf16.msra.mxu0 %v9144_v47  ;;  %9135 = vmatpush3.bf16.msra.mxu1 %v9132_v29  ;;  %v9164_v47 = vpack.c.bf16 %v6521_v35, %v6520_v8 }
0x1c04   :  { %9153 = vmatprep.subr.bf16.mxu0 %v9152_v37 }
0x1cca   :  { %v6001_v31 = vpop.f32.mrb[62].mxu0 }
0x1ccb   :  { %v6015_v61 = vmul.f32 0.125, %v6001_v31  ;;  %v8585_v52 = vpop.f32.mrb[63].mxu0 }
0x1ccd   :  { %v10517_v54 = vsub.f32 %v10443_v22, %v6015_v61 }
0x1cce   :  { %v6006_v0 = vpop.f32.mrb[64].mxu0 }
0x1ccf   :  { %v6016_v57 = vmul.f32 0.125, %v6006_v0  ;;  %8600 = vmatprep.mubr.msk.f32.mxu1 %vm573_vm5, %v10517_v54  ;;  %8618 = vmatprep.mubr.msk.f32.mxu0 %vm573_vm5, %v10517_v54  ;;  %v8588_v58 = vpop.f32.mrb[65].mxu0 }
0x1cd1   :  { %v10530_v22 = vsub.f32 %v10441_v19, %v6016_v57 }
0x1cd2   :  { %v6011_v36 = vpop.f32.mrb[66].mxu0 }
0x1cd3   :  { %v6017_v3 = vmul.f32 0.125, %v6011_v36  ;;  %8601 = vmatmul.mubr.msk.f32.vlgmr.msra.gmra.mrb[52].mxu1 %vm573_vm5, %v10530_v22  ;;  %8619 = vmatmul.mubr.msk.f32.vlgmr.msra.gmra.mrb[68].mxu0 %vm573_vm5, %v10530_v22  ;;  %v8591_v19 = vpop.f32.mrb[67].mxu0 }
0x1cd4   :  { %9155 = vmatpush3.bf16.msra.mxu0 %v9152_v37  ;;  %8636 = vmatprep.mubr.msk.f32.mxu0 %vm573_vm5, %v10517_v54  ;;  %v6523_v37 = vld [vmem:[%s10698_s2 + $0x1e0] sm:$0xff] }
0x1cd5   :  { %v10545_v4 = vadd.f32 %v6017_v3, %v4352_v1  ;;  %9157 = vmatprep.subr.bf16.mxu0 %v9156_v11  ;;  %8607 = vmatprep.mubr.msk.f32.mxu1 %vm45_vm0, %v6107_v13  ;;  %v7026_v13 = vld [vmem:[%s10698_s2 + $0x280] sm:$0xff] }
0x1cd8   :  { %9159 = vmatpush3.bf16.msra.mxu0 %v9156_v11 }
0x1cd9   :  { %9177 = vmatprep.subr.bf16.mxu0 %v9176_v17 }
0x1cdb   :  { %8637 = vmatmul.mubr.msk.f32.vlgmr.msra.gmra.mrb[70].mxu0 %vm573_vm5, %v10530_v22 }
0x1cdc   :  { %9179 = vmatpush3.bf16.msra.mxu0 %v9176_v17  ;;  %8672 = vmatprep.mubr.msk.f32.mxu0 %vm573_vm5, %v6015_v61  ;;  %v9168_v61 = vpack.c.bf16 %v6523_v37, %v6522_v46  ;;  %v6858_v17 = vld [vmem:[%s10698_s2 + $0x260] sm:$0xff] }
0x1cdd   :  { %9181 = vmatprep.subr.bf16.mxu0 %v9180_v12 }
0x1ce0   :  { %9183 = vmatpush3.bf16.msra.mxu0 %v9180_v12  ;;  %v7109_v12 = vld [vmem:[%s10698_s2 + $0x288] sm:$0xff] }
0x1ce1   :  { %9185 = vmatprep.subr.bf16.mxu0 %v9184_v53 }
0x1ce3   :  { %8673 = vmatmul.mubr.msk.f32.vlgmr.msra.gmra.mrb[72].mxu0 %vm573_vm5, %v6016_v57  ;;  %v6021_v57 = vld [vmem:[%s10698_s2 + $0x1f0] sm:$0xff] }
0x1ce4   :  { %9187 = vmatpush3.bf16.msra.mxu0 %v9184_v53  ;;  %v7193_v53 = vld [vmem:[%s10698_s2 + $0x298] sm:$0xff] }
0x1ce5   :  { %9189 = vmatprep.subr.bf16.mxu0 %v9188_v44 }
0x1ce8   :  { %9191 = vmatpush3.bf16.msra.mxu0 %v9188_v44 }
0x1da6   :  { %v8602_v15 = vpop.f32.mrb[52].mxu1  ;;  %v8620_v16 = vpop.f32.mrb[68].mxu0 }
0x1da7   :  { %v6098_v9 = vpop.f32.mrb[53].mxu1  ;;  %v6262_v39 = vpop.f32.mrb[69].mxu0 }
0x1da8   :  { %v9136_v41 = vpack.c.bf16 %v8602_v15, %v6098_v9  ;;  %v9148_v42 = vpack.c.bf16 %v8620_v16, %v6262_v39  ;;  %v5812_v15 = vmul.f32 %v5811_v23, %v5807_v24  ;;  %v6856_v16 = vld [vmem:[%s10700_s4 + $0xc8] sm:$0xff] }
0x1daa   :  { %9137 = vmatprep.subr.bf16.mxu1 %v9136_v41 }
0x1dab   :  { %9139 = vmatpush3.bf16.msra.mxu1 %v9136_v41 }
0x1dac   :  { %9149 = vmatprep.subr.bf16.mxu1 %v9148_v42 }
0x1dae   :  { %v8638_v5 = vpop.f32.mrb[70].mxu0  ;;  %8608 = vmatmul.mubr.msk.f32.vlgmr.msra.gmra.mrb[54].mxu1 %vm45_vm0, %v6108_v6 }
0x1daf   :  { %v6426_v43 = vpop.f32.mrb[71].mxu0  ;;  %9151 = vmatpush3.bf16.msra.mxu1 %v9148_v42  ;;  %8625 = vmatprep.mubr.msk.f32.mxu1 %vm45_vm0, %v6271_v49 }
0x1db0   :  { %v9160_v45 = vpack.c.bf16 %v8638_v5, %v6426_v43 }
0x1db2   :  { %9161 = vmatprep.subr.bf16.mxu1 %v9160_v45 }
0x1db6   :  { %v8674_v48 = vpop.f32.mrb[72].mxu0  ;;  %8626 = vmatmul.mubr.msk.f32.vlgmr.msra.gmra.mrb[54].mxu1 %vm45_vm0, %v6272_v27 }
0x1db7   :  { %v6855_v50 = vsub.f32 %v10456_v51, %v8674_v48  ;;  %9163 = vmatpush3.bf16.msra.mxu1 %v9160_v45  ;;  %v6760_v29 = vpop.f32.mrb[73].mxu0  ;;  %8643 = vmatprep.mubr.msk.f32.mxu1 %vm45_vm0, %v6435_v30  ;;  %v6436_v51 = vld [vmem:[%s10697_s3 + $0xb0] sm:$0xff] }
0x1db8   :  { %v6854_v18 = vsub.f32 %v10458_v10, %v6760_v29  ;;  %9165 = vmatprep.subr.bf16.mxu1 %v9164_v47  ;;  %v6599_v10 = vld [vmem:[%s10697_s3 + $0xb8] sm:$0xff] }
0x1dba   :  { %v9192_v31 = vpack.c.bf16 %v6855_v50, %v6854_v18 }
0x1dbc   :  { %9201 = vmatprep.subr.bf16.mxu0 %v9192_v31 }
0x1dbe   :  { %8644 = vmatmul.mubr.msk.f32.vlgmr.msra.gmra.mrb[54].mxu1 %vm45_vm0, %v6436_v51 }
0x1dbf   :  { %9167 = vmatpush3.bf16.msra.mxu1 %v9164_v47  ;;  %8654 = vmatprep.mubr.msk.f32.mxu1 %vm573_vm5, %v10517_v54  ;;  %v6600_v54 = vld [vmem:[%s10697_s3 + $0xc0] sm:$0xff] }
0x1dc0   :  { %9169 = vmatprep.subr.bf16.mxu1 %v9168_v61 }
0x1dc3   :  { %9171 = vmatpush3.bf16.msra.mxu1 %v9168_v61 }
0x1dc6   :  { %8655 = vmatmul.mubr.msk.f32.vlgmr.msra.gmra.mrb[56].mxu1 %vm573_vm5, %v10530_v22 }
0x1dc7   :  { %8661 = vmatprep.mubr.msk.f32.mxu1 %vm45_vm0, %v6599_v10 }
0x1e99   :  { %v8656_v52 = vpop.f32.mrb[56].mxu1 }
0x1e9a   :  { %v6590_v0 = vpop.f32.mrb[57].mxu1 }
0x1e9b   :  { %v9172_v55 = vpack.c.bf16 %v8656_v52, %v6590_v0 }
0x1e9d   :  { %9173 = vmatprep.subr.bf16.mxu1 %v9172_v55 }
0x1e9e   :  { %9175 = vmatpush3.bf16.msra.mxu1 %v9172_v55 }
0x1e9f   :  { %9193 = vmatprep.subr.bf16.mxu1 %v9192_v31 }
0x1ea1   :  { %8662 = vmatmul.mubr.msk.f32.vlgmr.msra.gmra.mrb[54].mxu1 %vm45_vm0, %v6600_v54 }
0x1ea2   :  { %9195 = vmatpush3.bf16.msra.mxu1 %v9192_v31  ;;  %8694 = vmatprep.mubr.msk.f32.mxu1 %vm573_vm5, %v6857_v62 }
0x1f74   :  { %v8663_v58 = vpop.f32.mrb[54].mxu1 }
0x1f75   :  { %v6673_v22 = vpop.f32.mrb[55].mxu1  ;;  %v9245_v36 = vadd.f32 %v8663_v58, %v6021_v57 }
0x1f76   :  { %v9246_v11 = vadd.f32 %v6673_v22, %v6020_v56 }
0x1f77   :  { %v7197_v14 = vrot.slane %v9245_v36, %v10010_v28 }
0x1f78   :  { %8683 = vmatprep.mubr.msk.f32.mxu0 %vm573_vm5, %v9246_v11 }
0x1f79   :  { %8684 = vmatmul.mubr.msk.f32.vlgmr.msra.gmra.mrb[74].mxu0 %vm573_vm5, %v9245_v36  ;;  %v7198_v44 = vmul.f32 %v7197_v14, %v7193_v53 }
0x1f7a   :  { %9203 = vmatpush3.bf16.msra.mxu0 %v9192_v31  ;;  %8705 = vmatprep.mubr.msk.f32.mxu0 %vm573_vm5, %v6941_v63 }
0x1f7b   :  { %v7199_v25 = vadd.f32 %v7198_v44, %v5812_v15 }
0x204c   :  { %v8685_v1 = vpop.f32.mrb[74].mxu0 }
0x204d   :  { %v6845_v3 = vpop.f32.mrb[75].mxu0 }
0x204e   :  { %v9196_v19 = vpack.c.bf16 %v8685_v1, %v6845_v3 }
0x2050   :  { %9197 = vmatprep.subr.bf16.mxu1 %v9196_v19  ;;  %9205 = vmatprep.subr.bf16.mxu0 %v9196_v19 }
0x2051   :  { %9199 = vmatpush3.bf16.msra.mxu1 %v9196_v19  ;;  %9207 = vmatpush3.bf16.msra.mxu0 %v9196_v19 }
0x2052   :  { %9209 = vmatprep.subr.bf16.mxu1 %v9192_v31  ;;  %9217 = vmatprep.subr.bf16.mxu0 %v9192_v31 }
0x2054   :  { %8695 = vmatmul.mubr.msk.f32.vlgmr.msra.gmra.mrb[58].mxu1 %vm573_vm5, %v6858_v17  ;;  %8706 = vmatmul.mubr.msk.f32.vlgmr.msra.gmra.mrb[76].mxu0 %vm573_vm5, %v6942_v60 }
0x2055   :  { %9211 = vmatpush3.bf16.msra.mxu1 %v9192_v31  ;;  %9219 = vmatpush3.bf16.msra.mxu0 %v9192_v31 }
0x2056   :  { %9213 = vmatprep.subr.bf16.mxu1 %v9196_v19  ;;  %9221 = vmatprep.subr.bf16.mxu0 %v9196_v19 }
0x2057   :  { %8716 = vmatprep.mubr.msk.f32.mxu1 %vm573_vm5, %v7025_v20  ;;  %8727 = vmatprep.mubr.msk.f32.mxu0 %vm573_vm5, %v7109_v12 }
0x2059   :  { %9215 = vmatpush3.bf16.msra.mxu1 %v9196_v19  ;;  %9223 = vmatpush3.bf16.msra.mxu0 %v9196_v19 }
0x205a   :  { %9224 = vmatprep.subr.bf16.mxu1 %v9340_v33 }
0x205c   :  { %8717 = vmatmul.mubr.msk.f32.vlgmr.msra.gmra.mrb[60].mxu1 %vm573_vm5, %v7026_v13  ;;  %8728 = vmatmul.mubr.msk.f32.vlgmr.msra.gmra.mrb[78].mxu0 %vm573_vm5, %v7110_v21 }
0x205d   :  { %9226 = vmatpush3.bf16.msra.mxu1 %v10018_v59  ;;  %8738 = vmatprep.mubr.msk.f32.mxu1 %vm9341_vm3, %v9342_v34 }
0x205e   :  { %9227 = vmatprep.subr.bf16.mxu1 %v9340_v33 }
0x2061   :  { %9229 = vmatpush3.bf16.msra.mxu1 %v10039_v7 }
0x2062   :  { %9230 = vmatprep.subr.bf16.mxu1 %v9340_v33 }
0x2064   :  { %8739 = vmatmul.mubr.msk.f32.vlgmr.msra.gmra.mrb[62].mxu1 %vm573_vm5, %v7199_v25 }
0x2065   :  { %9232 = vmatpush3.bf16.msra.mxu1 %v10018_v59  ;;  %8749 = vmatprep.mubr.msk.f32.mxu1 %vm9341_vm3, %v9342_v34 }
0x2066   :  { %9233 = vmatprep.subr.bf16.mxu1 %v9340_v33 }
0x2069   :  { %9235 = vmatpush3.bf16.msra.mxu1 %v10039_v7 }
0x206c   :  { %8750 = vmatmul.mubr.msk.f32.vlgmr.msra.gmra.mrb[62].mxu1 %vm573_vm5, %v10545_v4 }
0x2127   :  { %v8696_v9 = vpop.f32.mrb[58].mxu1  ;;  %v8707_v39 = vpop.f32.mrb[76].mxu0 }
0x2128   :  { %v6939_v41 = vmul.f32 %v8696_v9, %v9755_v38  ;;  %v6931_v42 = vpop.f32.mrb[59].mxu1  ;;  %v7023_v59 = vmul.f32 %v8707_v39, %v9757_v26  ;;  %v7015_v6 = vpop.f32.mrb[77].mxu0 }
0x212a   :  { %v6940_v34 = vadd.f32 %v6939_v41, %v6856_v16 }
0x212c   :  { %v7024_v49 = vadd.f32 %v7023_v59, %v6940_v34 }
0x212f   :  { %v8718_v33 = vpop.f32.mrb[60].mxu1  ;;  %v8729_v5 = vpop.f32.mrb[78].mxu0 }
0x2130   :  { %v7107_v7 = vmul.f32 %v8718_v33, %v9787_v2  ;;  %v7191_v4 = vmul.f32 %v8729_v5, %v9792_v32  ;;  %v7099_v43 = vpop.f32.mrb[61].mxu1  ;;  %v7183_v45 = vpop.f32.mrb[79].mxu0 }
0x2132   :  { %v7108_v8 = vadd.f32 %v7107_v7, %v7024_v49 }
0x2134   :  { %v7192_v35 = vadd.f32 %v7191_v4, %v7108_v8 }
0x2136   :  { %v7350_v30 = vrot.slane %v7192_v35, %v10010_v28 }
0x213f   :  { %v7343_v27 = vpop.f32.mrb[62].mxu1 }
0x2140   :  { %v9248_v38 = vadd.f32 %v10112_v40, %v7343_v27  ;;  %v8751_v47 = vpop.f32.mrb[63].mxu1 }
0x2142   :  { %v9249_v26 = vadd.f32 %v9248_v38, %v7350_v30 }
0x2144   :  { %7555 = vst.msk [vmem:[%s10701_s5 + $0x8] sm:$0xff] %vm208_vm2, %v9249_v26 }

</bundles_post_ra>
